<compile_context>
chip_gen: v7x
topology: tpu7x:2x2x1
jax: 0.10.0
libtpu: 0.0.40
codegen_flags: <defaults>
</compile_context>

<pallas_src>
import jax
import jax.numpy as jnp
from jax import lax
from jax.experimental import pallas as pl
from jax.experimental.pallas import tpu as pltpu


# ---------------------------------------------------------------------------
# Per-branch body (traced inside a pl.when for its grid step).
# ---------------------------------------------------------------------------
def _ptap_branch_body(x_ref, dw_ref, scal_ref, y_ref, o_ref, *, base, k, hw, bsz):
    # x_ref   : VMEM (C, B*HW)   features, channels on sublanes, batch in lanes
    # dw_ref  : VMEM (1, B*HW)   discriminator weight, tiled per sample
    # scal_ref: SMEM (12,)       [w0,w1,w2,bias] x 3 branches
    # y_ref   : SMEM (B,)        domain labels (float)
    # o_ref   : VMEM (1, 1, 128) per-branch batch-mean BCE, lane-dense
    x = x_ref[...].astype(jnp.float32)                      # upcast in-kernel
    C, N = x.shape

    w0 = scal_ref[base + 0]
    w1 = scal_ref[base + 1]
    w2 = scal_ref[base + 2]
    bias = scal_ref[base + 3]

    # per-sample lane masks (lane index n = b*HW + s)
    lane = lax.broadcasted_iota(jnp.int32, (1, N), 1)
    masks = [jnp.where((lane >= b * hw) & (lane < (b + 1) * hw), 1.0, 0.0)
             for b in range(bsz)]                           # (1, N) f32 each

    # 1) spatial adaptive-avg-pool per (channel, sample): masked lane reduces
    inv_hw = jnp.float32(1.0 / hw)
    pooled = jnp.concatenate(
        [jnp.sum(x * m, axis=1, keepdims=True) * inv_hw for m in masks],
        axis=1)                                             # (C, B)

    # 2) ECA Conv1d(1,1,3,padding=1,bias=False) over channels — VPU/XLU only:
    #    two sublane shifts (zero boundary == Conv1d zero padding) + 3 FMAs.
    zrow = jnp.zeros((1, bsz), jnp.float32)
    down = jnp.concatenate([zrow, pooled[:C - 1, :]], axis=0)   # pooled[i-1]
    up = jnp.concatenate([pooled[1:, :], zrow], axis=0)         # pooled[i+1]
    attn_pre = w0 * down + w1 * pooled + w2 * up                # (C, B)

    # 3) sigmoid gate (EUP exp) + channel reweighting
    attn = 1.0 / (1.0 + jnp.exp(-attn_pre))                     # (C, B)
    gate = masks[0] * attn[:, 0:1]
    for b in range(1, bsz):
        gate = gate + masks[b] * attn[:, b:b + 1]               # (C, N)
    fw = x * gate                                               # (C, N)

    # 4) exact top-k channel mean via rank selection: element (c, n) is kept
    #    iff fewer than k channels are "better" at position n, where better
    #    means (value greater) or (value equal and smaller channel index).
    #    Matches torch.sort(dim=1, descending=True)[:k].sum() exactly, even
    #    under duplicate values, with no serial cross-sublane reduce chain.
    ci = lax.broadcasted_iota(jnp.int32, (C, N), 0)
    rank = jnp.zeros((C, N), jnp.int32)
    for j in range(C):                                          # static unroll
        xj = fw[j:j + 1, :]                                     # (1, N)
        better = (xj > fw) | ((xj == fw) & (j < ci))
        rank = rank + better.astype(jnp.int32)
    ptap = jnp.sum(jnp.where(rank < k, fw, 0.0), axis=0,
                   keepdims=True) * jnp.float32(1.0 / k)        # (1, N)

    # 5) linear discriminator logit + BCEWithLogits (stable), batch mean
    dw = dw_ref[...].astype(jnp.float32)                        # (1, N)
    prod = ptap * dw
    loss = jnp.zeros((1, 1), jnp.float32)
    for b in range(bsz):
        z = jnp.sum(prod * masks[b], axis=1, keepdims=True) + bias   # (1, 1)
        y = y_ref[b]
        loss = loss + (jnp.maximum(z, 0.0) - z * y
                       + jnp.log(1.0 + jnp.exp(-jnp.abs(z))))
    loss = loss * jnp.float32(1.0 / bsz)
    o_ref[0] = jnp.broadcast_to(loss, (1, 128))                 # lane-dense store


# ---------------------------------------------------------------------------
# PTAPLoss.forward equivalent: ONE fused pallas_call for all three branches.
# ---------------------------------------------------------------------------
def ptap_loss_forward(params, lf, mf, sf, da_preds, da_images, da_labels):
    # da_preds / da_images are unused, exactly as in the reference forward.
    del da_preds, da_images
    y = da_labels.astype(jnp.float32)
    feats = ((lf, params["lf"]), (mf, params["mf"]), (sf, params["sf"]))

    B = lf.shape[0]
    xs, dws, ks, hws, scal_parts = [], [], [], [], []
    for feat, p in feats:
        Bf, C, H, W = feat.shape
        assert Bf == B and C >= 2
        hw = H * W
        # (B, C, H, W) -> (C, B*HW): channels on sublanes, batch folded in lanes
        x = jnp.transpose(feat.reshape(Bf, C, hw), (1, 0, 2)).reshape(C, Bf * hw)
        xs.append(x)                                   # source dtype; cast in-kernel
        dws.append(jnp.tile(p["disc_w"].astype(jnp.float32), (1, Bf)))  # (1, B*HW)
        ks.append(C // 2)                              # int(channel_size * 0.5)
        hws.append(hw)
        scal_parts.append(p["conv_w"].reshape(-1).astype(jnp.float32))
        scal_parts.append(p["disc_b"].reshape(-1).astype(jnp.float32))
    scal = jnp.concatenate(scal_parts)                 # (12,) [w0,w1,w2,b] x 3

    Cs = tuple(xv.shape[0] for xv in xs)
    Ns = tuple(xv.shape[1] for xv in xs)

    def kernel(scal_ref, y_ref, x0, x1, x2, d0, d1, d2, o_ref):
        xrefs = (x0, x1, x2)
        drefs = (d0, d1, d2)
        bi = pl.program_id(0)
        for br in range(3):
            @pl.when(bi == br)
            def _(br=br):
                _ptap_branch_body(xrefs[br], drefs[br], scal_ref, y_ref, o_ref,
                                  base=4 * br, k=ks[br], hw=hws[br], bsz=B)

    out = pl.pallas_call(
        kernel,
        out_shape=jax.ShapeDtypeStruct((3, 1, 128), jnp.float32),
        grid=(3,),
        in_specs=[
            pl.BlockSpec(memory_space=pltpu.MemorySpace.SMEM),   # conv w + bias
            pl.BlockSpec(memory_space=pltpu.MemorySpace.SMEM),   # labels
            pl.BlockSpec((Cs[0], Ns[0]), lambda i: (0, 0)),      # lf features
            pl.BlockSpec((Cs[1], Ns[1]), lambda i: (0, 0)),      # mf features
            pl.BlockSpec((Cs[2], Ns[2]), lambda i: (0, 0)),      # sf features
            pl.BlockSpec((1, Ns[0]), lambda i: (0, 0)),          # lf disc weight
            pl.BlockSpec((1, Ns[1]), lambda i: (0, 0)),          # mf disc weight
            pl.BlockSpec((1, Ns[2]), lambda i: (0, 0)),          # sf disc weight
        ],
        out_specs=pl.BlockSpec((1, 1, 128), lambda i: (i, 0, 0)),
        compiler_params=pltpu.CompilerParams(dimension_semantics=("parallel",)),
    )(scal, y, xs[0], xs[1], xs[2], dws[0], dws[1], dws[2])

    return (out[0, 0, 0], out[1, 0, 0], out[2, 0, 0])


# ---------------------------------------------------------------------------
# Pure-JAX reference for verification.
# ---------------------------------------------------------------------------
def conv1d_channels(pooled, w):
    """pooled: (B, C), w: (3,) -> (B, C). Matches torch Conv1d(1,1,3,pad=1)."""
    p = jnp.pad(pooled, ((0, 0), (1, 1)))
    return w[0] * p[:, :-2] + w[1] * p[:, 1:-1] + w[2] * p[:, 2:]


def ptap_loss_reference(params, lf, mf, sf, da_labels):
    y = da_labels.astype(jnp.float32)
    out = []
    for feat, p in ((lf, params["lf"]), (mf, params["mf"]), (sf, params["sf"])):
        B, C, H, W = feat.shape
        k = C // 2
        feat = feat.astype(jnp.float32)
        pooled = jnp.mean(feat, axis=(2, 3))
        attn = 1.0 / (1.0 + jnp.exp(-conv1d_channels(pooled, p["conv_w"])))
        fw = feat * attn[:, :, None, None]
        fw = -jnp.sort(-fw, axis=1)                              # descending
        ptap_map = jnp.sum(fw[:, :k], axis=1) / k                # (B, H, W)
        z = jnp.sum(ptap_map.reshape(B, -1) * p["disc_w"], axis=1) + p["disc_b"][0, 0]
        out.append(jnp.mean(jnp.maximum(z, 0.0) - z * y
                            + jnp.log(1.0 + jnp.exp(-jnp.abs(z)))))
    return tuple(out)


def init_branch_params(key, C, H, W):
    k1, k2 = jax.random.split(key)
    return {
        "conv_w": jax.random.normal(k1, (3,), jnp.float32) * 0.5,   # Conv1d(1,1,3) weight
        "disc_w": jax.random.normal(k2, (1, H * W), jnp.float32) * (1.0 / (H * W)) ** 0.5,
        "disc_b": jnp.zeros((1, 1), jnp.float32),
    }


if __name__ == "__main__":
    key = jax.random.PRNGKey(0)
    kx1, kx2, kx3, kp = jax.random.split(key, 4)
    B = 2
    # three feature pyramids: (B, C, H, W)
    lf = jax.random.normal(kx1, (B, 8, 16, 16), jnp.float32)
    mf = jax.random.normal(kx2, (B, 16, 8, 8), jnp.float32)
    sf = jax.random.normal(kx3, (B, 32, 4, 4), jnp.float32)
    da_labels = jnp.array([0, 1], jnp.int32)       # .float() applied inside forward
    da_preds = None
    da_images = None

    p1, p2, p3 = jax.random.split(kp, 3)
    params = {
        "lf": init_branch_params(p1, 8, 16, 16),
        "mf": init_branch_params(p2, 16, 8, 8),
        "sf": init_branch_params(p3, 32, 4, 4),
    }

    fwd = jax.jit(ptap_loss_forward)
    losses = fwd(params, lf, mf, sf, da_preds, da_images, da_labels)
    losses = jax.block_until_ready(losses)

    ref = ptap_loss_reference(params, lf, mf, sf, da_labels)
    for got, want in zip(losses, ref):
        g, w = float(got), float(want)
        # Tight tolerance: the kernel math is exact except for reduction order
        # (no MXU matvec or approximations on the data path anymore).
        assert abs(g - w) < 1e-4 + 1e-4 * abs(w), (g, w)

    print("KERNEL_OK")
</pallas_src>

<mosaic_0001>
module attributes {stable_mosaic.version = 11 : i64} {
  func.func @kernel(%arg0: i32, %arg1: memref<12xf32, #tpu.memory_space<smem>>, %arg2: memref<2xf32, #tpu.memory_space<smem>>, %arg3: memref<8x512xf32, #tpu.memory_space<vmem>>, %arg4: memref<16x128xf32, #tpu.memory_space<vmem>>, %arg5: memref<32x32xf32, #tpu.memory_space<vmem>>, %arg6: memref<1x512xf32, #tpu.memory_space<vmem>>, %arg7: memref<1x128xf32, #tpu.memory_space<vmem>>, %arg8: memref<1x32xf32, #tpu.memory_space<vmem>>, %arg9: memref<1x1x128xf32, #tpu.memory_space<vmem>>) attributes {dimension_semantics = [#tpu.dimension_semantics<parallel>], iteration_bounds = array<i64: 3>, scalar_prefetch = 0 : i64, scratch_operands = 0 : i64, tpu.core_type = #tpu.core_type<tc>, window_params = [{transform_indices = @transform_0, window_bounds = array<i64: 12>}, {transform_indices = @transform_1, window_bounds = array<i64: 2>}, {pipeline_mode = #tpu.pipeline_mode<synchronous>, transform_indices = @transform_2, window_bounds = array<i64: 8, 512>}, {pipeline_mode = #tpu.pipeline_mode<synchronous>, transform_indices = @transform_3, window_bounds = array<i64: 16, 128>}, {pipeline_mode = #tpu.pipeline_mode<synchronous>, transform_indices = @transform_4, window_bounds = array<i64: 32, 32>}, {pipeline_mode = #tpu.pipeline_mode<synchronous>, transform_indices = @transform_5, window_bounds = array<i64: 1, 512>}, {pipeline_mode = #tpu.pipeline_mode<synchronous>, transform_indices = @transform_6, window_bounds = array<i64: 1, 128>}, {pipeline_mode = #tpu.pipeline_mode<synchronous>, transform_indices = @transform_7, window_bounds = array<i64: 1, 32>}, {transform_indices = @transform_8, window_bounds = array<i64: 1, 1, 128>}]} {
    %c0_i32 = arith.constant 0 : i32
    %0 = arith.cmpi eq, %arg0, %c0_i32 : i32
    %1 = arith.extui %0 : i1 to i32
    %c0_i32_0 = arith.constant 0 : i32
    %2 = arith.cmpi ne, %1, %c0_i32_0 : i32
    scf.if %2 {
      %c0 = arith.constant 0 : index
      %c0_3 = arith.constant 0 : index
      %9 = vector.load %arg3[%c0, %c0_3] : memref<8x512xf32, #tpu.memory_space<vmem>>, vector<8x512xf32>
      %c0_4 = arith.constant 0 : index
      %10 = memref.load %arg1[%c0_4] : memref<12xf32, #tpu.memory_space<smem>>
      %c1 = arith.constant 1 : index
      %11 = memref.load %arg1[%c1] : memref<12xf32, #tpu.memory_space<smem>>
      %c2 = arith.constant 2 : index
      %12 = memref.load %arg1[%c2] : memref<12xf32, #tpu.memory_space<smem>>
      %c3 = arith.constant 3 : index
      %13 = memref.load %arg1[%c3] : memref<12xf32, #tpu.memory_space<smem>>
      %14 = tpu.iota {dimensions = array<i32: 1>} : vector<1x512xi32>
      %c0_i32_5 = arith.constant 0 : i32
      %15 = vector.broadcast %c0_i32_5 : i32 to vector<1x512xi32>
      %16 = arith.cmpi sge, %14, %15 : vector<1x512xi32>
      %c256_i32 = arith.constant 256 : i32
      %17 = vector.broadcast %c256_i32 : i32 to vector<1x512xi32>
      %18 = arith.cmpi slt, %14, %17 : vector<1x512xi32>
      %19 = arith.andi %16, %18 : vector<1x512xi1>
      %cst = arith.constant 1.000000e+00 : f32
      %cst_6 = arith.constant 0.000000e+00 : f32
      %20 = vector.broadcast %cst : f32 to vector<1x512xf32>
      %21 = vector.broadcast %cst_6 : f32 to vector<1x512xf32>
      %22 = arith.select %19, %20, %21 : vector<1x512xi1>, vector<1x512xf32>
      %c256_i32_7 = arith.constant 256 : i32
      %23 = vector.broadcast %c256_i32_7 : i32 to vector<1x512xi32>
      %24 = arith.cmpi sge, %14, %23 : vector<1x512xi32>
      %c512_i32 = arith.constant 512 : i32
      %25 = vector.broadcast %c512_i32 : i32 to vector<1x512xi32>
      %26 = arith.cmpi slt, %14, %25 : vector<1x512xi32>
      %27 = arith.andi %24, %26 : vector<1x512xi1>
      %cst_8 = arith.constant 1.000000e+00 : f32
      %cst_9 = arith.constant 0.000000e+00 : f32
      %28 = vector.broadcast %cst_8 : f32 to vector<1x512xf32>
      %29 = vector.broadcast %cst_9 : f32 to vector<1x512xf32>
      %30 = arith.select %27, %28, %29 : vector<1x512xi1>, vector<1x512xf32>
      %31 = vector.broadcast %22 : vector<1x512xf32> to vector<8x512xf32>
      %32 = arith.mulf %9, %31 : vector<8x512xf32>
      %cst_10 = arith.constant dense<0.000000e+00> : vector<8xf32>
      %33 = vector.multi_reduction <add>, %32, %cst_10 [1] : vector<8x512xf32> to vector<8xf32>
      %34 = vector.shape_cast %33 : vector<8xf32> to vector<8x1xf32>
      %cst_11 = arith.constant 3.906250e-03 : f32
      %35 = vector.broadcast %cst_11 : f32 to vector<8x1xf32>
      %36 = arith.mulf %34, %35 : vector<8x1xf32>
      %37 = vector.broadcast %30 : vector<1x512xf32> to vector<8x512xf32>
      %38 = arith.mulf %9, %37 : vector<8x512xf32>
      %cst_12 = arith.constant dense<0.000000e+00> : vector<8xf32>
      %39 = vector.multi_reduction <add>, %38, %cst_12 [1] : vector<8x512xf32> to vector<8xf32>
      %40 = vector.shape_cast %39 : vector<8xf32> to vector<8x1xf32>
      %cst_13 = arith.constant 3.906250e-03 : f32
      %41 = vector.broadcast %cst_13 : f32 to vector<8x1xf32>
      %42 = arith.mulf %40, %41 : vector<8x1xf32>
      %43 = tpu.concatenate %36, %42 in 1 : vector<8x1xf32>, vector<8x1xf32> -> vector<8x2xf32>
      %cst_14 = arith.constant 0.000000e+00 : f32
      %44 = vector.broadcast %cst_14 : f32 to vector<1x2xf32>
      %45 = vector.extract_strided_slice %43 {offsets = [0, 0], sizes = [7, 2], strides = [1, 1]} : vector<8x2xf32> to vector<7x2xf32>
      %46 = tpu.concatenate %44, %45 in 0 : vector<1x2xf32>, vector<7x2xf32> -> vector<8x2xf32>
      %47 = vector.extract_strided_slice %43 {offsets = [1, 0], sizes = [7, 2], strides = [1, 1]} : vector<8x2xf32> to vector<7x2xf32>
      %48 = tpu.concatenate %47, %44 in 0 : vector<7x2xf32>, vector<1x2xf32> -> vector<8x2xf32>
      %49 = vector.broadcast %10 : f32 to vector<8x2xf32>
      %50 = arith.mulf %49, %46 : vector<8x2xf32>
      %51 = vector.broadcast %11 : f32 to vector<8x2xf32>
      %52 = arith.mulf %51, %43 : vector<8x2xf32>
      %53 = arith.addf %50, %52 : vector<8x2xf32>
      %54 = vector.broadcast %12 : f32 to vector<8x2xf32>
      %55 = arith.mulf %54, %48 : vector<8x2xf32>
      %56 = arith.addf %53, %55 : vector<8x2xf32>
      %cst_15 = arith.constant 0.000000e+00 : f32
      %57 = vector.broadcast %cst_15 : f32 to vector<8x2xf32>
      %58 = arith.subf %57, %56 : vector<8x2xf32>
      %59 = math.exp %58 : vector<8x2xf32>
      %cst_16 = arith.constant 1.000000e+00 : f32
      %60 = vector.broadcast %cst_16 : f32 to vector<8x2xf32>
      %61 = arith.addf %60, %59 : vector<8x2xf32>
      %cst_17 = arith.constant 1.000000e+00 : f32
      %62 = vector.broadcast %cst_17 : f32 to vector<8x2xf32>
      %63 = arith.divf %62, %61 : vector<8x2xf32>
      %64 = vector.extract_strided_slice %63 {offsets = [0, 0], sizes = [8, 1], strides = [1, 1]} : vector<8x2xf32> to vector<8x1xf32>
      %65 = vector.broadcast %22 : vector<1x512xf32> to vector<8x512xf32>
      %66 = vector.broadcast %64 : vector<8x1xf32> to vector<8x512xf32>
      %67 = arith.mulf %65, %66 : vector<8x512xf32>
      %68 = vector.extract_strided_slice %63 {offsets = [0, 1], sizes = [8, 1], strides = [1, 1]} : vector<8x2xf32> to vector<8x1xf32>
      %69 = vector.broadcast %30 : vector<1x512xf32> to vector<8x512xf32>
      %70 = vector.broadcast %68 : vector<8x1xf32> to vector<8x512xf32>
      %71 = arith.mulf %69, %70 : vector<8x512xf32>
      %72 = arith.addf %67, %71 : vector<8x512xf32>
      %73 = arith.mulf %9, %72 : vector<8x512xf32>
      %74 = tpu.iota {dimensions = array<i32: 0>} : vector<8x512xi32>
      %c0_i32_18 = arith.constant 0 : i32
      %75 = vector.broadcast %c0_i32_18 : i32 to vector<8x512xi32>
      %76 = vector.extract_strided_slice %73 {offsets = [0, 0], sizes = [1, 512], strides = [1, 1]} : vector<8x512xf32> to vector<1x512xf32>
      %77 = vector.broadcast %76 : vector<1x512xf32> to vector<8x512xf32>
      %78 = arith.cmpf ogt, %77, %73 : vector<8x512xf32>
      %79 = vector.broadcast %76 : vector<1x512xf32> to vector<8x512xf32>
      %80 = arith.cmpf oeq, %79, %73 : vector<8x512xf32>
      %c0_i32_19 = arith.constant 0 : i32
      %81 = vector.broadcast %c0_i32_19 : i32 to vector<8x512xi32>
      %82 = arith.cmpi sgt, %74, %81 : vector<8x512xi32>
      %83 = arith.andi %80, %82 : vector<8x512xi1>
      %84 = arith.ori %78, %83 : vector<8x512xi1>
      %85 = arith.extui %84 : vector<8x512xi1> to vector<8x512xi32>
      %86 = arith.addi %75, %85 : vector<8x512xi32>
      %87 = vector.extract_strided_slice %73 {offsets = [1, 0], sizes = [1, 512], strides = [1, 1]} : vector<8x512xf32> to vector<1x512xf32>
      %88 = vector.broadcast %87 : vector<1x512xf32> to vector<8x512xf32>
      %89 = arith.cmpf ogt, %88, %73 : vector<8x512xf32>
      %90 = vector.broadcast %87 : vector<1x512xf32> to vector<8x512xf32>
      %91 = arith.cmpf oeq, %90, %73 : vector<8x512xf32>
      %c1_i32_20 = arith.constant 1 : i32
      %92 = vector.broadcast %c1_i32_20 : i32 to vector<8x512xi32>
      %93 = arith.cmpi sgt, %74, %92 : vector<8x512xi32>
      %94 = arith.andi %91, %93 : vector<8x512xi1>
      %95 = arith.ori %89, %94 : vector<8x512xi1>
      %96 = arith.extui %95 : vector<8x512xi1> to vector<8x512xi32>
      %97 = arith.addi %86, %96 : vector<8x512xi32>
      %98 = vector.extract_strided_slice %73 {offsets = [2, 0], sizes = [1, 512], strides = [1, 1]} : vector<8x512xf32> to vector<1x512xf32>
      %99 = vector.broadcast %98 : vector<1x512xf32> to vector<8x512xf32>
      %100 = arith.cmpf ogt, %99, %73 : vector<8x512xf32>
      %101 = vector.broadcast %98 : vector<1x512xf32> to vector<8x512xf32>
      %102 = arith.cmpf oeq, %101, %73 : vector<8x512xf32>
      %c2_i32_21 = arith.constant 2 : i32
      %103 = vector.broadcast %c2_i32_21 : i32 to vector<8x512xi32>
      %104 = arith.cmpi sgt, %74, %103 : vector<8x512xi32>
      %105 = arith.andi %102, %104 : vector<8x512xi1>
      %106 = arith.ori %100, %105 : vector<8x512xi1>
      %107 = arith.extui %106 : vector<8x512xi1> to vector<8x512xi32>
      %108 = arith.addi %97, %107 : vector<8x512xi32>
      %109 = vector.extract_strided_slice %73 {offsets = [3, 0], sizes = [1, 512], strides = [1, 1]} : vector<8x512xf32> to vector<1x512xf32>
      %110 = vector.broadcast %109 : vector<1x512xf32> to vector<8x512xf32>
      %111 = arith.cmpf ogt, %110, %73 : vector<8x512xf32>
      %112 = vector.broadcast %109 : vector<1x512xf32> to vector<8x512xf32>
      %113 = arith.cmpf oeq, %112, %73 : vector<8x512xf32>
      %c3_i32 = arith.constant 3 : i32
      %114 = vector.broadcast %c3_i32 : i32 to vector<8x512xi32>
      %115 = arith.cmpi sgt, %74, %114 : vector<8x512xi32>
      %116 = arith.andi %113, %115 : vector<8x512xi1>
      %117 = arith.ori %111, %116 : vector<8x512xi1>
      %118 = arith.extui %117 : vector<8x512xi1> to vector<8x512xi32>
      %119 = arith.addi %108, %118 : vector<8x512xi32>
      %120 = vector.extract_strided_slice %73 {offsets = [4, 0], sizes = [1, 512], strides = [1, 1]} : vector<8x512xf32> to vector<1x512xf32>
      %121 = vector.broadcast %120 : vector<1x512xf32> to vector<8x512xf32>
      %122 = arith.cmpf ogt, %121, %73 : vector<8x512xf32>
      %123 = vector.broadcast %120 : vector<1x512xf32> to vector<8x512xf32>
      %124 = arith.cmpf oeq, %123, %73 : vector<8x512xf32>
      %c4_i32 = arith.constant 4 : i32
      %125 = vector.broadcast %c4_i32 : i32 to vector<8x512xi32>
      %126 = arith.cmpi sgt, %74, %125 : vector<8x512xi32>
      %127 = arith.andi %124, %126 : vector<8x512xi1>
      %128 = arith.ori %122, %127 : vector<8x512xi1>
      %129 = arith.extui %128 : vector<8x512xi1> to vector<8x512xi32>
      %130 = arith.addi %119, %129 : vector<8x512xi32>
      %131 = vector.extract_strided_slice %73 {offsets = [5, 0], sizes = [1, 512], strides = [1, 1]} : vector<8x512xf32> to vector<1x512xf32>
      %132 = vector.broadcast %131 : vector<1x512xf32> to vector<8x512xf32>
      %133 = arith.cmpf ogt, %132, %73 : vector<8x512xf32>
      %134 = vector.broadcast %131 : vector<1x512xf32> to vector<8x512xf32>
      %135 = arith.cmpf oeq, %134, %73 : vector<8x512xf32>
      %c5_i32 = arith.constant 5 : i32
      %136 = vector.broadcast %c5_i32 : i32 to vector<8x512xi32>
      %137 = arith.cmpi sgt, %74, %136 : vector<8x512xi32>
      %138 = arith.andi %135, %137 : vector<8x512xi1>
      %139 = arith.ori %133, %138 : vector<8x512xi1>
      %140 = arith.extui %139 : vector<8x512xi1> to vector<8x512xi32>
      %141 = arith.addi %130, %140 : vector<8x512xi32>
      %142 = vector.extract_strided_slice %73 {offsets = [6, 0], sizes = [1, 512], strides = [1, 1]} : vector<8x512xf32> to vector<1x512xf32>
      %143 = vector.broadcast %142 : vector<1x512xf32> to vector<8x512xf32>
      %144 = arith.cmpf ogt, %143, %73 : vector<8x512xf32>
      %145 = vector.broadcast %142 : vector<1x512xf32> to vector<8x512xf32>
      %146 = arith.cmpf oeq, %145, %73 : vector<8x512xf32>
      %c6_i32 = arith.constant 6 : i32
      %147 = vector.broadcast %c6_i32 : i32 to vector<8x512xi32>
      %148 = arith.cmpi sgt, %74, %147 : vector<8x512xi32>
      %149 = arith.andi %146, %148 : vector<8x512xi1>
      %150 = arith.ori %144, %149 : vector<8x512xi1>
      %151 = arith.extui %150 : vector<8x512xi1> to vector<8x512xi32>
      %152 = arith.addi %141, %151 : vector<8x512xi32>
      %153 = vector.extract_strided_slice %73 {offsets = [7, 0], sizes = [1, 512], strides = [1, 1]} : vector<8x512xf32> to vector<1x512xf32>
      %154 = vector.broadcast %153 : vector<1x512xf32> to vector<8x512xf32>
      %155 = arith.cmpf ogt, %154, %73 : vector<8x512xf32>
      %156 = vector.broadcast %153 : vector<1x512xf32> to vector<8x512xf32>
      %157 = arith.cmpf oeq, %156, %73 : vector<8x512xf32>
      %c7_i32 = arith.constant 7 : i32
      %158 = vector.broadcast %c7_i32 : i32 to vector<8x512xi32>
      %159 = arith.cmpi sgt, %74, %158 : vector<8x512xi32>
      %160 = arith.andi %157, %159 : vector<8x512xi1>
      %161 = arith.ori %155, %160 : vector<8x512xi1>
      %162 = arith.extui %161 : vector<8x512xi1> to vector<8x512xi32>
      %163 = arith.addi %152, %162 : vector<8x512xi32>
      %c4_i32_22 = arith.constant 4 : i32
      %164 = vector.broadcast %c4_i32_22 : i32 to vector<8x512xi32>
      %165 = arith.cmpi slt, %163, %164 : vector<8x512xi32>
      %cst_23 = arith.constant 0.000000e+00 : f32
      %166 = vector.broadcast %cst_23 : f32 to vector<8x512xf32>
      %167 = arith.select %165, %73, %166 : vector<8x512xi1>, vector<8x512xf32>
      %cst_24 = arith.constant dense<0.000000e+00> : vector<512xf32>
      %168 = vector.multi_reduction <add>, %167, %cst_24 [0] : vector<8x512xf32> to vector<512xf32>
      %169 = vector.shape_cast %168 : vector<512xf32> to vector<1x512xf32>
      %cst_25 = arith.constant 2.500000e-01 : f32
      %170 = vector.broadcast %cst_25 : f32 to vector<1x512xf32>
      %171 = arith.mulf %169, %170 : vector<1x512xf32>
      %c0_26 = arith.constant 0 : index
      %c0_27 = arith.constant 0 : index
      %172 = vector.load %arg6[%c0_26, %c0_27] : memref<1x512xf32, #tpu.memory_space<vmem>>, vector<1x512xf32>
      %173 = arith.mulf %171, %172 : vector<1x512xf32>
      %cst_28 = arith.constant 0.000000e+00 : f32
      %174 = vector.broadcast %cst_28 : f32 to vector<1x1xf32>
      %175 = arith.mulf %173, %22 : vector<1x512xf32>
      %cst_29 = arith.constant dense<0.000000e+00> : vector<1xf32>
      %176 = vector.multi_reduction <add>, %175, %cst_29 [1] : vector<1x512xf32> to vector<1xf32>
      %177 = vector.shape_cast %176 : vector<1xf32> to vector<1x1xf32>
      %178 = vector.broadcast %13 : f32 to vector<1x1xf32>
      %179 = arith.addf %177, %178 : vector<1x1xf32>
      %c0_30 = arith.constant 0 : index
      %180 = memref.load %arg2[%c0_30] : memref<2xf32, #tpu.memory_space<smem>>
      %cst_31 = arith.constant 0.000000e+00 : f32
      %181 = vector.broadcast %cst_31 : f32 to vector<1x1xf32>
      %182 = arith.maximumf %179, %181 : vector<1x1xf32>
      %183 = vector.broadcast %180 : f32 to vector<1x1xf32>
      %184 = arith.mulf %179, %183 : vector<1x1xf32>
      %185 = arith.subf %182, %184 : vector<1x1xf32>
      %186 = math.absf %179 : vector<1x1xf32>
      %cst_32 = arith.constant 0.000000e+00 : f32
      %187 = vector.broadcast %cst_32 : f32 to vector<1x1xf32>
      %188 = arith.subf %187, %186 : vector<1x1xf32>
      %189 = math.exp %188 : vector<1x1xf32>
      %cst_33 = arith.constant 1.000000e+00 : f32
      %190 = vector.broadcast %cst_33 : f32 to vector<1x1xf32>
      %191 = arith.addf %190, %189 : vector<1x1xf32>
      %192 = math.log %191 : vector<1x1xf32>
      %193 = arith.addf %185, %192 : vector<1x1xf32>
      %194 = arith.addf %174, %193 : vector<1x1xf32>
      %195 = arith.mulf %173, %30 : vector<1x512xf32>
      %cst_34 = arith.constant dense<0.000000e+00> : vector<1xf32>
      %196 = vector.multi_reduction <add>, %195, %cst_34 [1] : vector<1x512xf32> to vector<1xf32>
      %197 = vector.shape_cast %196 : vector<1xf32> to vector<1x1xf32>
      %198 = vector.broadcast %13 : f32 to vector<1x1xf32>
      %199 = arith.addf %197, %198 : vector<1x1xf32>
      %c1_35 = arith.constant 1 : index
      %200 = memref.load %arg2[%c1_35] : memref<2xf32, #tpu.memory_space<smem>>
      %cst_36 = arith.constant 0.000000e+00 : f32
      %201 = vector.broadcast %cst_36 : f32 to vector<1x1xf32>
      %202 = arith.maximumf %199, %201 : vector<1x1xf32>
      %203 = vector.broadcast %200 : f32 to vector<1x1xf32>
      %204 = arith.mulf %199, %203 : vector<1x1xf32>
      %205 = arith.subf %202, %204 : vector<1x1xf32>
      %206 = math.absf %199 : vector<1x1xf32>
      %cst_37 = arith.constant 0.000000e+00 : f32
      %207 = vector.broadcast %cst_37 : f32 to vector<1x1xf32>
      %208 = arith.subf %207, %206 : vector<1x1xf32>
      %209 = math.exp %208 : vector<1x1xf32>
      %cst_38 = arith.constant 1.000000e+00 : f32
      %210 = vector.broadcast %cst_38 : f32 to vector<1x1xf32>
      %211 = arith.addf %210, %209 : vector<1x1xf32>
      %212 = math.log %211 : vector<1x1xf32>
      %213 = arith.addf %205, %212 : vector<1x1xf32>
      %214 = arith.addf %194, %213 : vector<1x1xf32>
      %cst_39 = arith.constant 5.000000e-01 : f32
      %215 = vector.broadcast %cst_39 : f32 to vector<1x1xf32>
      %216 = arith.mulf %214, %215 : vector<1x1xf32>
      %217 = vector.shape_cast %216 : vector<1x1xf32> to vector<1x1xf32>
      %218 = vector.broadcast %217 : vector<1x1xf32> to vector<1x128xf32>
      %c0_40 = arith.constant 0 : index
      %c0_41 = arith.constant 0 : index
      %c0_42 = arith.constant 0 : index
      %219 = vector.load %arg9[%c0_40, %c0_41, %c0_42] : memref<1x1x128xf32, #tpu.memory_space<vmem>>, vector<1x1x128xf32>
      %220 = vector.shape_cast %219 : vector<1x1x128xf32> to vector<1x128xf32>
      %221 = vector.shape_cast %218 : vector<1x128xf32> to vector<1x1x128xf32>
      tpu.vector_store %arg9[%c0_40, %c0_41, %c0_42], %221 {strides = array<i32>} : memref<1x1x128xf32, #tpu.memory_space<vmem>>, vector<1x1x128xf32>,
    } else {
    }
    %c1_i32 = arith.constant 1 : i32
    %3 = arith.cmpi eq, %arg0, %c1_i32 : i32
    %4 = arith.extui %3 : i1 to i32
    %c0_i32_1 = arith.constant 0 : i32
    %5 = arith.cmpi ne, %4, %c0_i32_1 : i32
    scf.if %5 {
      %c0 = arith.constant 0 : index
      %c0_3 = arith.constant 0 : index
      %9 = vector.load %arg4[%c0, %c0_3] : memref<16x128xf32, #tpu.memory_space<vmem>>, vector<16x128xf32>
      %c4 = arith.constant 4 : index
      %10 = memref.load %arg1[%c4] : memref<12xf32, #tpu.memory_space<smem>>
      %c5 = arith.constant 5 : index
      %11 = memref.load %arg1[%c5] : memref<12xf32, #tpu.memory_space<smem>>
      %c6 = arith.constant 6 : index
      %12 = memref.load %arg1[%c6] : memref<12xf32, #tpu.memory_space<smem>>
      %c7 = arith.constant 7 : index
      %13 = memref.load %arg1[%c7] : memref<12xf32, #tpu.memory_space<smem>>
      %14 = tpu.iota {dimensions = array<i32: 1>} : vector<1x128xi32>
      %c0_i32_4 = arith.constant 0 : i32
      %15 = vector.broadcast %c0_i32_4 : i32 to vector<1x128xi32>
      %16 = arith.cmpi sge, %14, %15 : vector<1x128xi32>
      %c64_i32 = arith.constant 64 : i32
      %17 = vector.broadcast %c64_i32 : i32 to vector<1x128xi32>
      %18 = arith.cmpi slt, %14, %17 : vector<1x128xi32>
      %19 = arith.andi %16, %18 : vector<1x128xi1>
      %cst = arith.constant 1.000000e+00 : f32
      %cst_5 = arith.constant 0.000000e+00 : f32
      %20 = vector.broadcast %cst : f32 to vector<1x128xf32>
      %21 = vector.broadcast %cst_5 : f32 to vector<1x128xf32>
      %22 = arith.select %19, %20, %21 : vector<1x128xi1>, vector<1x128xf32>
      %c64_i32_6 = arith.constant 64 : i32
      %23 = vector.broadcast %c64_i32_6 : i32 to vector<1x128xi32>
      %24 = arith.cmpi sge, %14, %23 : vector<1x128xi32>
      %c128_i32 = arith.constant 128 : i32
      %25 = vector.broadcast %c128_i32 : i32 to vector<1x128xi32>
      %26 = arith.cmpi slt, %14, %25 : vector<1x128xi32>
      %27 = arith.andi %24, %26 : vector<1x128xi1>
      %cst_7 = arith.constant 1.000000e+00 : f32
      %cst_8 = arith.constant 0.000000e+00 : f32
      %28 = vector.broadcast %cst_7 : f32 to vector<1x128xf32>
      %29 = vector.broadcast %cst_8 : f32 to vector<1x128xf32>
      %30 = arith.select %27, %28, %29 : vector<1x128xi1>, vector<1x128xf32>
      %31 = vector.broadcast %22 : vector<1x128xf32> to vector<16x128xf32>
      %32 = arith.mulf %9, %31 : vector<16x128xf32>
      %cst_9 = arith.constant dense<0.000000e+00> : vector<16xf32>
      %33 = vector.multi_reduction <add>, %32, %cst_9 [1] : vector<16x128xf32> to vector<16xf32>
      %34 = vector.shape_cast %33 : vector<16xf32> to vector<16x1xf32>
      %cst_10 = arith.constant 1.562500e-02 : f32
      %35 = vector.broadcast %cst_10 : f32 to vector<16x1xf32>
      %36 = arith.mulf %34, %35 : vector<16x1xf32>
      %37 = vector.broadcast %30 : vector<1x128xf32> to vector<16x128xf32>
      %38 = arith.mulf %9, %37 : vector<16x128xf32>
      %cst_11 = arith.constant dense<0.000000e+00> : vector<16xf32>
      %39 = vector.multi_reduction <add>, %38, %cst_11 [1] : vector<16x128xf32> to vector<16xf32>
      %40 = vector.shape_cast %39 : vector<16xf32> to vector<16x1xf32>
      %cst_12 = arith.constant 1.562500e-02 : f32
      %41 = vector.broadcast %cst_12 : f32 to vector<16x1xf32>
      %42 = arith.mulf %40, %41 : vector<16x1xf32>
      %43 = tpu.concatenate %36, %42 in 1 : vector<16x1xf32>, vector<16x1xf32> -> vector<16x2xf32>
      %cst_13 = arith.constant 0.000000e+00 : f32
      %44 = vector.broadcast %cst_13 : f32 to vector<1x2xf32>
      %45 = vector.extract_strided_slice %43 {offsets = [0, 0], sizes = [15, 2], strides = [1, 1]} : vector<16x2xf32> to vector<15x2xf32>
      %46 = tpu.concatenate %44, %45 in 0 : vector<1x2xf32>, vector<15x2xf32> -> vector<16x2xf32>
      %47 = vector.extract_strided_slice %43 {offsets = [1, 0], sizes = [15, 2], strides = [1, 1]} : vector<16x2xf32> to vector<15x2xf32>
      %48 = tpu.concatenate %47, %44 in 0 : vector<15x2xf32>, vector<1x2xf32> -> vector<16x2xf32>
      %49 = vector.broadcast %10 : f32 to vector<16x2xf32>
      %50 = arith.mulf %49, %46 : vector<16x2xf32>
      %51 = vector.broadcast %11 : f32 to vector<16x2xf32>
      %52 = arith.mulf %51, %43 : vector<16x2xf32>
      %53 = arith.addf %50, %52 : vector<16x2xf32>
      %54 = vector.broadcast %12 : f32 to vector<16x2xf32>
      %55 = arith.mulf %54, %48 : vector<16x2xf32>
      %56 = arith.addf %53, %55 : vector<16x2xf32>
      %cst_14 = arith.constant 0.000000e+00 : f32
      %57 = vector.broadcast %cst_14 : f32 to vector<16x2xf32>
      %58 = arith.subf %57, %56 : vector<16x2xf32>
      %59 = math.exp %58 : vector<16x2xf32>
      %cst_15 = arith.constant 1.000000e+00 : f32
      %60 = vector.broadcast %cst_15 : f32 to vector<16x2xf32>
      %61 = arith.addf %60, %59 : vector<16x2xf32>
      %cst_16 = arith.constant 1.000000e+00 : f32
      %62 = vector.broadcast %cst_16 : f32 to vector<16x2xf32>
      %63 = arith.divf %62, %61 : vector<16x2xf32>
      %64 = vector.extract_strided_slice %63 {offsets = [0, 0], sizes = [16, 1], strides = [1, 1]} : vector<16x2xf32> to vector<16x1xf32>
      %65 = vector.broadcast %22 : vector<1x128xf32> to vector<16x128xf32>
      %66 = vector.broadcast %64 : vector<16x1xf32> to vector<16x128xf32>
      %67 = arith.mulf %65, %66 : vector<16x128xf32>
      %68 = vector.extract_strided_slice %63 {offsets = [0, 1], sizes = [16, 1], strides = [1, 1]} : vector<16x2xf32> to vector<16x1xf32>
      %69 = vector.broadcast %30 : vector<1x128xf32> to vector<16x128xf32>
      %70 = vector.broadcast %68 : vector<16x1xf32> to vector<16x128xf32>
      %71 = arith.mulf %69, %70 : vector<16x128xf32>
      %72 = arith.addf %67, %71 : vector<16x128xf32>
      %73 = arith.mulf %9, %72 : vector<16x128xf32>
      %74 = tpu.iota {dimensions = array<i32: 0>} : vector<16x128xi32>
      %c0_i32_17 = arith.constant 0 : i32
      %75 = vector.broadcast %c0_i32_17 : i32 to vector<16x128xi32>
      %76 = vector.extract_strided_slice %73 {offsets = [0, 0], sizes = [1, 128], strides = [1, 1]} : vector<16x128xf32> to vector<1x128xf32>
      %77 = vector.broadcast %76 : vector<1x128xf32> to vector<16x128xf32>
      %78 = arith.cmpf ogt, %77, %73 : vector<16x128xf32>
      %79 = vector.broadcast %76 : vector<1x128xf32> to vector<16x128xf32>
      %80 = arith.cmpf oeq, %79, %73 : vector<16x128xf32>
      %c0_i32_18 = arith.constant 0 : i32
      %81 = vector.broadcast %c0_i32_18 : i32 to vector<16x128xi32>
      %82 = arith.cmpi sgt, %74, %81 : vector<16x128xi32>
      %83 = arith.andi %80, %82 : vector<16x128xi1>
      %84 = arith.ori %78, %83 : vector<16x128xi1>
      %85 = arith.extui %84 : vector<16x128xi1> to vector<16x128xi32>
      %86 = arith.addi %75, %85 : vector<16x128xi32>
      %87 = vector.extract_strided_slice %73 {offsets = [1, 0], sizes = [1, 128], strides = [1, 1]} : vector<16x128xf32> to vector<1x128xf32>
      %88 = vector.broadcast %87 : vector<1x128xf32> to vector<16x128xf32>
      %89 = arith.cmpf ogt, %88, %73 : vector<16x128xf32>
      %90 = vector.broadcast %87 : vector<1x128xf32> to vector<16x128xf32>
      %91 = arith.cmpf oeq, %90, %73 : vector<16x128xf32>
      %c1_i32_19 = arith.constant 1 : i32
      %92 = vector.broadcast %c1_i32_19 : i32 to vector<16x128xi32>
      %93 = arith.cmpi sgt, %74, %92 : vector<16x128xi32>
      %94 = arith.andi %91, %93 : vector<16x128xi1>
      %95 = arith.ori %89, %94 : vector<16x128xi1>
      %96 = arith.extui %95 : vector<16x128xi1> to vector<16x128xi32>
      %97 = arith.addi %86, %96 : vector<16x128xi32>
      %98 = vector.extract_strided_slice %73 {offsets = [2, 0], sizes = [1, 128], strides = [1, 1]} : vector<16x128xf32> to vector<1x128xf32>
      %99 = vector.broadcast %98 : vector<1x128xf32> to vector<16x128xf32>
      %100 = arith.cmpf ogt, %99, %73 : vector<16x128xf32>
      %101 = vector.broadcast %98 : vector<1x128xf32> to vector<16x128xf32>
      %102 = arith.cmpf oeq, %101, %73 : vector<16x128xf32>
      %c2_i32_20 = arith.constant 2 : i32
      %103 = vector.broadcast %c2_i32_20 : i32 to vector<16x128xi32>
      %104 = arith.cmpi sgt, %74, %103 : vector<16x128xi32>
      %105 = arith.andi %102, %104 : vector<16x128xi1>
      %106 = arith.ori %100, %105 : vector<16x128xi1>
      %107 = arith.extui %106 : vector<16x128xi1> to vector<16x128xi32>
      %108 = arith.addi %97, %107 : vector<16x128xi32>
      %109 = vector.extract_strided_slice %73 {offsets = [3, 0], sizes = [1, 128], strides = [1, 1]} : vector<16x128xf32> to vector<1x128xf32>
      %110 = vector.broadcast %109 : vector<1x128xf32> to vector<16x128xf32>
      %111 = arith.cmpf ogt, %110, %73 : vector<16x128xf32>
      %112 = vector.broadcast %109 : vector<1x128xf32> to vector<16x128xf32>
      %113 = arith.cmpf oeq, %112, %73 : vector<16x128xf32>
      %c3_i32 = arith.constant 3 : i32
      %114 = vector.broadcast %c3_i32 : i32 to vector<16x128xi32>
      %115 = arith.cmpi sgt, %74, %114 : vector<16x128xi32>
      %116 = arith.andi %113, %115 : vector<16x128xi1>
      %117 = arith.ori %111, %116 : vector<16x128xi1>
      %118 = arith.extui %117 : vector<16x128xi1> to vector<16x128xi32>
      %119 = arith.addi %108, %118 : vector<16x128xi32>
      %120 = vector.extract_strided_slice %73 {offsets = [4, 0], sizes = [1, 128], strides = [1, 1]} : vector<16x128xf32> to vector<1x128xf32>
      %121 = vector.broadcast %120 : vector<1x128xf32> to vector<16x128xf32>
      %122 = arith.cmpf ogt, %121, %73 : vector<16x128xf32>
      %123 = vector.broadcast %120 : vector<1x128xf32> to vector<16x128xf32>
      %124 = arith.cmpf oeq, %123, %73 : vector<16x128xf32>
      %c4_i32 = arith.constant 4 : i32
      %125 = vector.broadcast %c4_i32 : i32 to vector<16x128xi32>
      %126 = arith.cmpi sgt, %74, %125 : vector<16x128xi32>
      %127 = arith.andi %124, %126 : vector<16x128xi1>
      %128 = arith.ori %122, %127 : vector<16x128xi1>
      %129 = arith.extui %128 : vector<16x128xi1> to vector<16x128xi32>
      %130 = arith.addi %119, %129 : vector<16x128xi32>
      %131 = vector.extract_strided_slice %73 {offsets = [5, 0], sizes = [1, 128], strides = [1, 1]} : vector<16x128xf32> to vector<1x128xf32>
      %132 = vector.broadcast %131 : vector<1x128xf32> to vector<16x128xf32>
      %133 = arith.cmpf ogt, %132, %73 : vector<16x128xf32>
      %134 = vector.broadcast %131 : vector<1x128xf32> to vector<16x128xf32>
      %135 = arith.cmpf oeq, %134, %73 : vector<16x128xf32>
      %c5_i32 = arith.constant 5 : i32
      %136 = vector.broadcast %c5_i32 : i32 to vector<16x128xi32>
      %137 = arith.cmpi sgt, %74, %136 : vector<16x128xi32>
      %138 = arith.andi %135, %137 : vector<16x128xi1>
      %139 = arith.ori %133, %138 : vector<16x128xi1>
      %140 = arith.extui %139 : vector<16x128xi1> to vector<16x128xi32>
      %141 = arith.addi %130, %140 : vector<16x128xi32>
      %142 = vector.extract_strided_slice %73 {offsets = [6, 0], sizes = [1, 128], strides = [1, 1]} : vector<16x128xf32> to vector<1x128xf32>
      %143 = vector.broadcast %142 : vector<1x128xf32> to vector<16x128xf32>
      %144 = arith.cmpf ogt, %143, %73 : vector<16x128xf32>
      %145 = vector.broadcast %142 : vector<1x128xf32> to vector<16x128xf32>
      %146 = arith.cmpf oeq, %145, %73 : vector<16x128xf32>
      %c6_i32 = arith.constant 6 : i32
      %147 = vector.broadcast %c6_i32 : i32 to vector<16x128xi32>
      %148 = arith.cmpi sgt, %74, %147 : vector<16x128xi32>
      %149 = arith.andi %146, %148 : vector<16x128xi1>
      %150 = arith.ori %144, %149 : vector<16x128xi1>
      %151 = arith.extui %150 : vector<16x128xi1> to vector<16x128xi32>
      %152 = arith.addi %141, %151 : vector<16x128xi32>
      %153 = vector.extract_strided_slice %73 {offsets = [7, 0], sizes = [1, 128], strides = [1, 1]} : vector<16x128xf32> to vector<1x128xf32>
      %154 = vector.broadcast %153 : vector<1x128xf32> to vector<16x128xf32>
      %155 = arith.cmpf ogt, %154, %73 : vector<16x128xf32>
      %156 = vector.broadcast %153 : vector<1x128xf32> to vector<16x128xf32>
      %157 = arith.cmpf oeq, %156, %73 : vector<16x128xf32>
      %c7_i32 = arith.constant 7 : i32
      %158 = vector.broadcast %c7_i32 : i32 to vector<16x128xi32>
      %159 = arith.cmpi sgt, %74, %158 : vector<16x128xi32>
      %160 = arith.andi %157, %159 : vector<16x128xi1>
      %161 = arith.ori %155, %160 : vector<16x128xi1>
      %162 = arith.extui %161 : vector<16x128xi1> to vector<16x128xi32>
      %163 = arith.addi %152, %162 : vector<16x128xi32>
      %164 = vector.extract_strided_slice %73 {offsets = [8, 0], sizes = [1, 128], strides = [1, 1]} : vector<16x128xf32> to vector<1x128xf32>
      %165 = vector.broadcast %164 : vector<1x128xf32> to vector<16x128xf32>
      %166 = arith.cmpf ogt, %165, %73 : vector<16x128xf32>
      %167 = vector.broadcast %164 : vector<1x128xf32> to vector<16x128xf32>
      %168 = arith.cmpf oeq, %167, %73 : vector<16x128xf32>
      %c8_i32 = arith.constant 8 : i32
      %169 = vector.broadcast %c8_i32 : i32 to vector<16x128xi32>
      %170 = arith.cmpi sgt, %74, %169 : vector<16x128xi32>
      %171 = arith.andi %168, %170 : vector<16x128xi1>
      %172 = arith.ori %166, %171 : vector<16x128xi1>
      %173 = arith.extui %172 : vector<16x128xi1> to vector<16x128xi32>
      %174 = arith.addi %163, %173 : vector<16x128xi32>
      %175 = vector.extract_strided_slice %73 {offsets = [9, 0], sizes = [1, 128], strides = [1, 1]} : vector<16x128xf32> to vector<1x128xf32>
      %176 = vector.broadcast %175 : vector<1x128xf32> to vector<16x128xf32>
      %177 = arith.cmpf ogt, %176, %73 : vector<16x128xf32>
      %178 = vector.broadcast %175 : vector<1x128xf32> to vector<16x128xf32>
      %179 = arith.cmpf oeq, %178, %73 : vector<16x128xf32>
      %c9_i32 = arith.constant 9 : i32
      %180 = vector.broadcast %c9_i32 : i32 to vector<16x128xi32>
      %181 = arith.cmpi sgt, %74, %180 : vector<16x128xi32>
      %182 = arith.andi %179, %181 : vector<16x128xi1>
      %183 = arith.ori %177, %182 : vector<16x128xi1>
      %184 = arith.extui %183 : vector<16x128xi1> to vector<16x128xi32>
      %185 = arith.addi %174, %184 : vector<16x128xi32>
      %186 = vector.extract_strided_slice %73 {offsets = [10, 0], sizes = [1, 128], strides = [1, 1]} : vector<16x128xf32> to vector<1x128xf32>
      %187 = vector.broadcast %186 : vector<1x128xf32> to vector<16x128xf32>
      %188 = arith.cmpf ogt, %187, %73 : vector<16x128xf32>
      %189 = vector.broadcast %186 : vector<1x128xf32> to vector<16x128xf32>
      %190 = arith.cmpf oeq, %189, %73 : vector<16x128xf32>
      %c10_i32 = arith.constant 10 : i32
      %191 = vector.broadcast %c10_i32 : i32 to vector<16x128xi32>
      %192 = arith.cmpi sgt, %74, %191 : vector<16x128xi32>
      %193 = arith.andi %190, %192 : vector<16x128xi1>
      %194 = arith.ori %188, %193 : vector<16x128xi1>
      %195 = arith.extui %194 : vector<16x128xi1> to vector<16x128xi32>
      %196 = arith.addi %185, %195 : vector<16x128xi32>
      %197 = vector.extract_strided_slice %73 {offsets = [11, 0], sizes = [1, 128], strides = [1, 1]} : vector<16x128xf32> to vector<1x128xf32>
      %198 = vector.broadcast %197 : vector<1x128xf32> to vector<16x128xf32>
      %199 = arith.cmpf ogt, %198, %73 : vector<16x128xf32>
      %200 = vector.broadcast %197 : vector<1x128xf32> to vector<16x128xf32>
      %201 = arith.cmpf oeq, %200, %73 : vector<16x128xf32>
      %c11_i32 = arith.constant 11 : i32
      %202 = vector.broadcast %c11_i32 : i32 to vector<16x128xi32>
      %203 = arith.cmpi sgt, %74, %202 : vector<16x128xi32>
      %204 = arith.andi %201, %203 : vector<16x128xi1>
      %205 = arith.ori %199, %204 : vector<16x128xi1>
      %206 = arith.extui %205 : vector<16x128xi1> to vector<16x128xi32>
      %207 = arith.addi %196, %206 : vector<16x128xi32>
      %208 = vector.extract_strided_slice %73 {offsets = [12, 0], sizes = [1, 128], strides = [1, 1]} : vector<16x128xf32> to vector<1x128xf32>
      %209 = vector.broadcast %208 : vector<1x128xf32> to vector<16x128xf32>
      %210 = arith.cmpf ogt, %209, %73 : vector<16x128xf32>
      %211 = vector.broadcast %208 : vector<1x128xf32> to vector<16x128xf32>
      %212 = arith.cmpf oeq, %211, %73 : vector<16x128xf32>
      %c12_i32 = arith.constant 12 : i32
      %213 = vector.broadcast %c12_i32 : i32 to vector<16x128xi32>
      %214 = arith.cmpi sgt, %74, %213 : vector<16x128xi32>
      %215 = arith.andi %212, %214 : vector<16x128xi1>
      %216 = arith.ori %210, %215 : vector<16x128xi1>
      %217 = arith.extui %216 : vector<16x128xi1> to vector<16x128xi32>
      %218 = arith.addi %207, %217 : vector<16x128xi32>
      %219 = vector.extract_strided_slice %73 {offsets = [13, 0], sizes = [1, 128], strides = [1, 1]} : vector<16x128xf32> to vector<1x128xf32>
      %220 = vector.broadcast %219 : vector<1x128xf32> to vector<16x128xf32>
      %221 = arith.cmpf ogt, %220, %73 : vector<16x128xf32>
      %222 = vector.broadcast %219 : vector<1x128xf32> to vector<16x128xf32>
      %223 = arith.cmpf oeq, %222, %73 : vector<16x128xf32>
      %c13_i32 = arith.constant 13 : i32
      %224 = vector.broadcast %c13_i32 : i32 to vector<16x128xi32>
      %225 = arith.cmpi sgt, %74, %224 : vector<16x128xi32>
      %226 = arith.andi %223, %225 : vector<16x128xi1>
      %227 = arith.ori %221, %226 : vector<16x128xi1>
      %228 = arith.extui %227 : vector<16x128xi1> to vector<16x128xi32>
      %229 = arith.addi %218, %228 : vector<16x128xi32>
      %230 = vector.extract_strided_slice %73 {offsets = [14, 0], sizes = [1, 128], strides = [1, 1]} : vector<16x128xf32> to vector<1x128xf32>
      %231 = vector.broadcast %230 : vector<1x128xf32> to vector<16x128xf32>
      %232 = arith.cmpf ogt, %231, %73 : vector<16x128xf32>
      %233 = vector.broadcast %230 : vector<1x128xf32> to vector<16x128xf32>
      %234 = arith.cmpf oeq, %233, %73 : vector<16x128xf32>
      %c14_i32 = arith.constant 14 : i32
      %235 = vector.broadcast %c14_i32 : i32 to vector<16x128xi32>
      %236 = arith.cmpi sgt, %74, %235 : vector<16x128xi32>
      %237 = arith.andi %234, %236 : vector<16x128xi1>
      %238 = arith.ori %232, %237 : vector<16x128xi1>
      %239 = arith.extui %238 : vector<16x128xi1> to vector<16x128xi32>
      %240 = arith.addi %229, %239 : vector<16x128xi32>
      %241 = vector.extract_strided_slice %73 {offsets = [15, 0], sizes = [1, 128], strides = [1, 1]} : vector<16x128xf32> to vector<1x128xf32>
      %242 = vector.broadcast %241 : vector<1x128xf32> to vector<16x128xf32>
      %243 = arith.cmpf ogt, %242, %73 : vector<16x128xf32>
      %244 = vector.broadcast %241 : vector<1x128xf32> to vector<16x128xf32>
      %245 = arith.cmpf oeq, %244, %73 : vector<16x128xf32>
      %c15_i32 = arith.constant 15 : i32
      %246 = vector.broadcast %c15_i32 : i32 to vector<16x128xi32>
      %247 = arith.cmpi sgt, %74, %246 : vector<16x128xi32>
      %248 = arith.andi %245, %247 : vector<16x128xi1>
      %249 = arith.ori %243, %248 : vector<16x128xi1>
      %250 = arith.extui %249 : vector<16x128xi1> to vector<16x128xi32>
      %251 = arith.addi %240, %250 : vector<16x128xi32>
      %c8_i32_21 = arith.constant 8 : i32
      %252 = vector.broadcast %c8_i32_21 : i32 to vector<16x128xi32>
      %253 = arith.cmpi slt, %251, %252 : vector<16x128xi32>
      %cst_22 = arith.constant 0.000000e+00 : f32
      %254 = vector.broadcast %cst_22 : f32 to vector<16x128xf32>
      %255 = arith.select %253, %73, %254 : vector<16x128xi1>, vector<16x128xf32>
      %cst_23 = arith.constant dense<0.000000e+00> : vector<128xf32>
      %256 = vector.multi_reduction <add>, %255, %cst_23 [0] : vector<16x128xf32> to vector<128xf32>
      %257 = vector.shape_cast %256 : vector<128xf32> to vector<1x128xf32>
      %cst_24 = arith.constant 1.250000e-01 : f32
      %258 = vector.broadcast %cst_24 : f32 to vector<1x128xf32>
      %259 = arith.mulf %257, %258 : vector<1x128xf32>
      %c0_25 = arith.constant 0 : index
      %c0_26 = arith.constant 0 : index
      %260 = vector.load %arg7[%c0_25, %c0_26] : memref<1x128xf32, #tpu.memory_space<vmem>>, vector<1x128xf32>
      %261 = arith.mulf %259, %260 : vector<1x128xf32>
      %cst_27 = arith.constant 0.000000e+00 : f32
      %262 = vector.broadcast %cst_27 : f32 to vector<1x1xf32>
      %263 = arith.mulf %261, %22 : vector<1x128xf32>
      %cst_28 = arith.constant dense<0.000000e+00> : vector<1xf32>
      %264 = vector.multi_reduction <add>, %263, %cst_28 [1] : vector<1x128xf32> to vector<1xf32>
      %265 = vector.shape_cast %264 : vector<1xf32> to vector<1x1xf32>
      %266 = vector.broadcast %13 : f32 to vector<1x1xf32>
      %267 = arith.addf %265, %266 : vector<1x1xf32>
      %c0_29 = arith.constant 0 : index
      %268 = memref.load %arg2[%c0_29] : memref<2xf32, #tpu.memory_space<smem>>
      %cst_30 = arith.constant 0.000000e+00 : f32
      %269 = vector.broadcast %cst_30 : f32 to vector<1x1xf32>
      %270 = arith.maximumf %267, %269 : vector<1x1xf32>
      %271 = vector.broadcast %268 : f32 to vector<1x1xf32>
      %272 = arith.mulf %267, %271 : vector<1x1xf32>
      %273 = arith.subf %270, %272 : vector<1x1xf32>
      %274 = math.absf %267 : vector<1x1xf32>
      %cst_31 = arith.constant 0.000000e+00 : f32
      %275 = vector.broadcast %cst_31 : f32 to vector<1x1xf32>
      %276 = arith.subf %275, %274 : vector<1x1xf32>
      %277 = math.exp %276 : vector<1x1xf32>
      %cst_32 = arith.constant 1.000000e+00 : f32
      %278 = vector.broadcast %cst_32 : f32 to vector<1x1xf32>
      %279 = arith.addf %278, %277 : vector<1x1xf32>
      %280 = math.log %279 : vector<1x1xf32>
      %281 = arith.addf %273, %280 : vector<1x1xf32>
      %282 = arith.addf %262, %281 : vector<1x1xf32>
      %283 = arith.mulf %261, %30 : vector<1x128xf32>
      %cst_33 = arith.constant dense<0.000000e+00> : vector<1xf32>
      %284 = vector.multi_reduction <add>, %283, %cst_33 [1] : vector<1x128xf32> to vector<1xf32>
      %285 = vector.shape_cast %284 : vector<1xf32> to vector<1x1xf32>
      %286 = vector.broadcast %13 : f32 to vector<1x1xf32>
      %287 = arith.addf %285, %286 : vector<1x1xf32>
      %c1 = arith.constant 1 : index
      %288 = memref.load %arg2[%c1] : memref<2xf32, #tpu.memory_space<smem>>
      %cst_34 = arith.constant 0.000000e+00 : f32
      %289 = vector.broadcast %cst_34 : f32 to vector<1x1xf32>
      %290 = arith.maximumf %287, %289 : vector<1x1xf32>
      %291 = vector.broadcast %288 : f32 to vector<1x1xf32>
      %292 = arith.mulf %287, %291 : vector<1x1xf32>
      %293 = arith.subf %290, %292 : vector<1x1xf32>
      %294 = math.absf %287 : vector<1x1xf32>
      %cst_35 = arith.constant 0.000000e+00 : f32
      %295 = vector.broadcast %cst_35 : f32 to vector<1x1xf32>
      %296 = arith.subf %295, %294 : vector<1x1xf32>
      %297 = math.exp %296 : vector<1x1xf32>
      %cst_36 = arith.constant 1.000000e+00 : f32
      %298 = vector.broadcast %cst_36 : f32 to vector<1x1xf32>
      %299 = arith.addf %298, %297 : vector<1x1xf32>
      %300 = math.log %299 : vector<1x1xf32>
      %301 = arith.addf %293, %300 : vector<1x1xf32>
      %302 = arith.addf %282, %301 : vector<1x1xf32>
      %cst_37 = arith.constant 5.000000e-01 : f32
      %303 = vector.broadcast %cst_37 : f32 to vector<1x1xf32>
      %304 = arith.mulf %302, %303 : vector<1x1xf32>
      %305 = vector.shape_cast %304 : vector<1x1xf32> to vector<1x1xf32>
      %306 = vector.broadcast %305 : vector<1x1xf32> to vector<1x128xf32>
      %c0_38 = arith.constant 0 : index
      %c0_39 = arith.constant 0 : index
      %c0_40 = arith.constant 0 : index
      %307 = vector.load %arg9[%c0_38, %c0_39, %c0_40] : memref<1x1x128xf32, #tpu.memory_space<vmem>>, vector<1x1x128xf32>
      %308 = vector.shape_cast %307 : vector<1x1x128xf32> to vector<1x128xf32>
      %309 = vector.shape_cast %306 : vector<1x128xf32> to vector<1x1x128xf32>
      tpu.vector_store %arg9[%c0_38, %c0_39, %c0_40], %309 {strides = array<i32>} : memref<1x1x128xf32, #tpu.memory_space<vmem>>, vector<1x1x128xf32>,
    } else {
    }
    %c2_i32 = arith.constant 2 : i32
    %6 = arith.cmpi eq, %arg0, %c2_i32 : i32
    %7 = arith.extui %6 : i1 to i32
    %c0_i32_2 = arith.constant 0 : i32
    %8 = arith.cmpi ne, %7, %c0_i32_2 : i32
    scf.if %8 {
      %c0 = arith.constant 0 : index
      %c0_3 = arith.constant 0 : index
      %9 = vector.load %arg5[%c0, %c0_3] : memref<32x32xf32, #tpu.memory_space<vmem>>, vector<32x32xf32>
      %c8 = arith.constant 8 : index
      %10 = memref.load %arg1[%c8] : memref<12xf32, #tpu.memory_space<smem>>
      %c9 = arith.constant 9 : index
      %11 = memref.load %arg1[%c9] : memref<12xf32, #tpu.memory_space<smem>>
      %c10 = arith.constant 10 : index
      %12 = memref.load %arg1[%c10] : memref<12xf32, #tpu.memory_space<smem>>
      %c11 = arith.constant 11 : index
      %13 = memref.load %arg1[%c11] : memref<12xf32, #tpu.memory_space<smem>>
      %14 = tpu.iota {dimensions = array<i32: 1>} : vector<1x32xi32>
      %c0_i32_4 = arith.constant 0 : i32
      %15 = vector.broadcast %c0_i32_4 : i32 to vector<1x32xi32>
      %16 = arith.cmpi sge, %14, %15 : vector<1x32xi32>
      %c16_i32 = arith.constant 16 : i32
      %17 = vector.broadcast %c16_i32 : i32 to vector<1x32xi32>
      %18 = arith.cmpi slt, %14, %17 : vector<1x32xi32>
      %19 = arith.andi %16, %18 : vector<1x32xi1>
      %cst = arith.constant 1.000000e+00 : f32
      %cst_5 = arith.constant 0.000000e+00 : f32
      %20 = vector.broadcast %cst : f32 to vector<1x32xf32>
      %21 = vector.broadcast %cst_5 : f32 to vector<1x32xf32>
      %22 = arith.select %19, %20, %21 : vector<1x32xi1>, vector<1x32xf32>
      %c16_i32_6 = arith.constant 16 : i32
      %23 = vector.broadcast %c16_i32_6 : i32 to vector<1x32xi32>
      %24 = arith.cmpi sge, %14, %23 : vector<1x32xi32>
      %c32_i32 = arith.constant 32 : i32
      %25 = vector.broadcast %c32_i32 : i32 to vector<1x32xi32>
      %26 = arith.cmpi slt, %14, %25 : vector<1x32xi32>
      %27 = arith.andi %24, %26 : vector<1x32xi1>
      %cst_7 = arith.constant 1.000000e+00 : f32
      %cst_8 = arith.constant 0.000000e+00 : f32
      %28 = vector.broadcast %cst_7 : f32 to vector<1x32xf32>
      %29 = vector.broadcast %cst_8 : f32 to vector<1x32xf32>
      %30 = arith.select %27, %28, %29 : vector<1x32xi1>, vector<1x32xf32>
      %31 = vector.broadcast %22 : vector<1x32xf32> to vector<32x32xf32>
      %32 = arith.mulf %9, %31 : vector<32x32xf32>
      %cst_9 = arith.constant dense<0.000000e+00> : vector<32xf32>
      %33 = vector.multi_reduction <add>, %32, %cst_9 [1] : vector<32x32xf32> to vector<32xf32>
      %34 = vector.shape_cast %33 : vector<32xf32> to vector<32x1xf32>
      %cst_10 = arith.constant 6.250000e-02 : f32
      %35 = vector.broadcast %cst_10 : f32 to vector<32x1xf32>
      %36 = arith.mulf %34, %35 : vector<32x1xf32>
      %37 = vector.broadcast %30 : vector<1x32xf32> to vector<32x32xf32>
      %38 = arith.mulf %9, %37 : vector<32x32xf32>
      %cst_11 = arith.constant dense<0.000000e+00> : vector<32xf32>
      %39 = vector.multi_reduction <add>, %38, %cst_11 [1] : vector<32x32xf32> to vector<32xf32>
      %40 = vector.shape_cast %39 : vector<32xf32> to vector<32x1xf32>
      %cst_12 = arith.constant 6.250000e-02 : f32
      %41 = vector.broadcast %cst_12 : f32 to vector<32x1xf32>
      %42 = arith.mulf %40, %41 : vector<32x1xf32>
      %43 = tpu.concatenate %36, %42 in 1 : vector<32x1xf32>, vector<32x1xf32> -> vector<32x2xf32>
      %cst_13 = arith.constant 0.000000e+00 : f32
      %44 = vector.broadcast %cst_13 : f32 to vector<1x2xf32>
      %45 = vector.extract_strided_slice %43 {offsets = [0, 0], sizes = [31, 2], strides = [1, 1]} : vector<32x2xf32> to vector<31x2xf32>
      %46 = tpu.concatenate %44, %45 in 0 : vector<1x2xf32>, vector<31x2xf32> -> vector<32x2xf32>
      %47 = vector.extract_strided_slice %43 {offsets = [1, 0], sizes = [31, 2], strides = [1, 1]} : vector<32x2xf32> to vector<31x2xf32>
      %48 = tpu.concatenate %47, %44 in 0 : vector<31x2xf32>, vector<1x2xf32> -> vector<32x2xf32>
      %49 = vector.broadcast %10 : f32 to vector<32x2xf32>
      %50 = arith.mulf %49, %46 : vector<32x2xf32>
      %51 = vector.broadcast %11 : f32 to vector<32x2xf32>
      %52 = arith.mulf %51, %43 : vector<32x2xf32>
      %53 = arith.addf %50, %52 : vector<32x2xf32>
      %54 = vector.broadcast %12 : f32 to vector<32x2xf32>
      %55 = arith.mulf %54, %48 : vector<32x2xf32>
      %56 = arith.addf %53, %55 : vector<32x2xf32>
      %cst_14 = arith.constant 0.000000e+00 : f32
      %57 = vector.broadcast %cst_14 : f32 to vector<32x2xf32>
      %58 = arith.subf %57, %56 : vector<32x2xf32>
      %59 = math.exp %58 : vector<32x2xf32>
      %cst_15 = arith.constant 1.000000e+00 : f32
      %60 = vector.broadcast %cst_15 : f32 to vector<32x2xf32>
      %61 = arith.addf %60, %59 : vector<32x2xf32>
      %cst_16 = arith.constant 1.000000e+00 : f32
      %62 = vector.broadcast %cst_16 : f32 to vector<32x2xf32>
      %63 = arith.divf %62, %61 : vector<32x2xf32>
      %64 = vector.extract_strided_slice %63 {offsets = [0, 0], sizes = [32, 1], strides = [1, 1]} : vector<32x2xf32> to vector<32x1xf32>
      %65 = vector.broadcast %22 : vector<1x32xf32> to vector<32x32xf32>
      %66 = vector.broadcast %64 : vector<32x1xf32> to vector<32x32xf32>
      %67 = arith.mulf %65, %66 : vector<32x32xf32>
      %68 = vector.extract_strided_slice %63 {offsets = [0, 1], sizes = [32, 1], strides = [1, 1]} : vector<32x2xf32> to vector<32x1xf32>
      %69 = vector.broadcast %30 : vector<1x32xf32> to vector<32x32xf32>
      %70 = vector.broadcast %68 : vector<32x1xf32> to vector<32x32xf32>
      %71 = arith.mulf %69, %70 : vector<32x32xf32>
      %72 = arith.addf %67, %71 : vector<32x32xf32>
      %73 = arith.mulf %9, %72 : vector<32x32xf32>
      %74 = tpu.iota {dimensions = array<i32: 0>} : vector<32x32xi32>
      %c0_i32_17 = arith.constant 0 : i32
      %75 = vector.broadcast %c0_i32_17 : i32 to vector<32x32xi32>
      %76 = vector.extract_strided_slice %73 {offsets = [0, 0], sizes = [1, 32], strides = [1, 1]} : vector<32x32xf32> to vector<1x32xf32>
      %77 = vector.broadcast %76 : vector<1x32xf32> to vector<32x32xf32>
      %78 = arith.cmpf ogt, %77, %73 : vector<32x32xf32>
      %79 = vector.broadcast %76 : vector<1x32xf32> to vector<32x32xf32>
      %80 = arith.cmpf oeq, %79, %73 : vector<32x32xf32>
      %c0_i32_18 = arith.constant 0 : i32
      %81 = vector.broadcast %c0_i32_18 : i32 to vector<32x32xi32>
      %82 = arith.cmpi sgt, %74, %81 : vector<32x32xi32>
      %83 = arith.andi %80, %82 : vector<32x32xi1>
      %84 = arith.ori %78, %83 : vector<32x32xi1>
      %85 = arith.extui %84 : vector<32x32xi1> to vector<32x32xi32>
      %86 = arith.addi %75, %85 : vector<32x32xi32>
      %87 = vector.extract_strided_slice %73 {offsets = [1, 0], sizes = [1, 32], strides = [1, 1]} : vector<32x32xf32> to vector<1x32xf32>
      %88 = vector.broadcast %87 : vector<1x32xf32> to vector<32x32xf32>
      %89 = arith.cmpf ogt, %88, %73 : vector<32x32xf32>
      %90 = vector.broadcast %87 : vector<1x32xf32> to vector<32x32xf32>
      %91 = arith.cmpf oeq, %90, %73 : vector<32x32xf32>
      %c1_i32_19 = arith.constant 1 : i32
      %92 = vector.broadcast %c1_i32_19 : i32 to vector<32x32xi32>
      %93 = arith.cmpi sgt, %74, %92 : vector<32x32xi32>
      %94 = arith.andi %91, %93 : vector<32x32xi1>
      %95 = arith.ori %89, %94 : vector<32x32xi1>
      %96 = arith.extui %95 : vector<32x32xi1> to vector<32x32xi32>
      %97 = arith.addi %86, %96 : vector<32x32xi32>
      %98 = vector.extract_strided_slice %73 {offsets = [2, 0], sizes = [1, 32], strides = [1, 1]} : vector<32x32xf32> to vector<1x32xf32>
      %99 = vector.broadcast %98 : vector<1x32xf32> to vector<32x32xf32>
      %100 = arith.cmpf ogt, %99, %73 : vector<32x32xf32>
      %101 = vector.broadcast %98 : vector<1x32xf32> to vector<32x32xf32>
      %102 = arith.cmpf oeq, %101, %73 : vector<32x32xf32>
      %c2_i32_20 = arith.constant 2 : i32
      %103 = vector.broadcast %c2_i32_20 : i32 to vector<32x32xi32>
      %104 = arith.cmpi sgt, %74, %103 : vector<32x32xi32>
      %105 = arith.andi %102, %104 : vector<32x32xi1>
      %106 = arith.ori %100, %105 : vector<32x32xi1>
      %107 = arith.extui %106 : vector<32x32xi1> to vector<32x32xi32>
      %108 = arith.addi %97, %107 : vector<32x32xi32>
      %109 = vector.extract_strided_slice %73 {offsets = [3, 0], sizes = [1, 32], strides = [1, 1]} : vector<32x32xf32> to vector<1x32xf32>
      %110 = vector.broadcast %109 : vector<1x32xf32> to vector<32x32xf32>
      %111 = arith.cmpf ogt, %110, %73 : vector<32x32xf32>
      %112 = vector.broadcast %109 : vector<1x32xf32> to vector<32x32xf32>
      %113 = arith.cmpf oeq, %112, %73 : vector<32x32xf32>
      %c3_i32 = arith.constant 3 : i32
      %114 = vector.broadcast %c3_i32 : i32 to vector<32x32xi32>
      %115 = arith.cmpi sgt, %74, %114 : vector<32x32xi32>
      %116 = arith.andi %113, %115 : vector<32x32xi1>
      %117 = arith.ori %111, %116 : vector<32x32xi1>
      %118 = arith.extui %117 : vector<32x32xi1> to vector<32x32xi32>
      %119 = arith.addi %108, %118 : vector<32x32xi32>
      %120 = vector.extract_strided_slice %73 {offsets = [4, 0], sizes = [1, 32], strides = [1, 1]} : vector<32x32xf32> to vector<1x32xf32>
      %121 = vector.broadcast %120 : vector<1x32xf32> to vector<32x32xf32>
      %122 = arith.cmpf ogt, %121, %73 : vector<32x32xf32>
      %123 = vector.broadcast %120 : vector<1x32xf32> to vector<32x32xf32>
      %124 = arith.cmpf oeq, %123, %73 : vector<32x32xf32>
      %c4_i32 = arith.constant 4 : i32
      %125 = vector.broadcast %c4_i32 : i32 to vector<32x32xi32>
      %126 = arith.cmpi sgt, %74, %125 : vector<32x32xi32>
      %127 = arith.andi %124, %126 : vector<32x32xi1>
      %128 = arith.ori %122, %127 : vector<32x32xi1>
      %129 = arith.extui %128 : vector<32x32xi1> to vector<32x32xi32>
      %130 = arith.addi %119, %129 : vector<32x32xi32>
      %131 = vector.extract_strided_slice %73 {offsets = [5, 0], sizes = [1, 32], strides = [1, 1]} : vector<32x32xf32> to vector<1x32xf32>
      %132 = vector.broadcast %131 : vector<1x32xf32> to vector<32x32xf32>
      %133 = arith.cmpf ogt, %132, %73 : vector<32x32xf32>
      %134 = vector.broadcast %131 : vector<1x32xf32> to vector<32x32xf32>
      %135 = arith.cmpf oeq, %134, %73 : vector<32x32xf32>
      %c5_i32 = arith.constant 5 : i32
      %136 = vector.broadcast %c5_i32 : i32 to vector<32x32xi32>
      %137 = arith.cmpi sgt, %74, %136 : vector<32x32xi32>
      %138 = arith.andi %135, %137 : vector<32x32xi1>
      %139 = arith.ori %133, %138 : vector<32x32xi1>
      %140 = arith.extui %139 : vector<32x32xi1> to vector<32x32xi32>
      %141 = arith.addi %130, %140 : vector<32x32xi32>
      %142 = vector.extract_strided_slice %73 {offsets = [6, 0], sizes = [1, 32], strides = [1, 1]} : vector<32x32xf32> to vector<1x32xf32>
      %143 = vector.broadcast %142 : vector<1x32xf32> to vector<32x32xf32>
      %144 = arith.cmpf ogt, %143, %73 : vector<32x32xf32>
      %145 = vector.broadcast %142 : vector<1x32xf32> to vector<32x32xf32>
      %146 = arith.cmpf oeq, %145, %73 : vector<32x32xf32>
      %c6_i32 = arith.constant 6 : i32
      %147 = vector.broadcast %c6_i32 : i32 to vector<32x32xi32>
      %148 = arith.cmpi sgt, %74, %147 : vector<32x32xi32>
      %149 = arith.andi %146, %148 : vector<32x32xi1>
      %150 = arith.ori %144, %149 : vector<32x32xi1>
      %151 = arith.extui %150 : vector<32x32xi1> to vector<32x32xi32>
      %152 = arith.addi %141, %151 : vector<32x32xi32>
      %153 = vector.extract_strided_slice %73 {offsets = [7, 0], sizes = [1, 32], strides = [1, 1]} : vector<32x32xf32> to vector<1x32xf32>
      %154 = vector.broadcast %153 : vector<1x32xf32> to vector<32x32xf32>
      %155 = arith.cmpf ogt, %154, %73 : vector<32x32xf32>
      %156 = vector.broadcast %153 : vector<1x32xf32> to vector<32x32xf32>
      %157 = arith.cmpf oeq, %156, %73 : vector<32x32xf32>
      %c7_i32 = arith.constant 7 : i32
      %158 = vector.broadcast %c7_i32 : i32 to vector<32x32xi32>
      %159 = arith.cmpi sgt, %74, %158 : vector<32x32xi32>
      %160 = arith.andi %157, %159 : vector<32x32xi1>
      %161 = arith.ori %155, %160 : vector<32x32xi1>
      %162 = arith.extui %161 : vector<32x32xi1> to vector<32x32xi32>
      %163 = arith.addi %152, %162 : vector<32x32xi32>
      %164 = vector.extract_strided_slice %73 {offsets = [8, 0], sizes = [1, 32], strides = [1, 1]} : vector<32x32xf32> to vector<1x32xf32>
      %165 = vector.broadcast %164 : vector<1x32xf32> to vector<32x32xf32>
      %166 = arith.cmpf ogt, %165, %73 : vector<32x32xf32>
      %167 = vector.broadcast %164 : vector<1x32xf32> to vector<32x32xf32>
      %168 = arith.cmpf oeq, %167, %73 : vector<32x32xf32>
      %c8_i32 = arith.constant 8 : i32
      %169 = vector.broadcast %c8_i32 : i32 to vector<32x32xi32>
      %170 = arith.cmpi sgt, %74, %169 : vector<32x32xi32>
      %171 = arith.andi %168, %170 : vector<32x32xi1>
      %172 = arith.ori %166, %171 : vector<32x32xi1>
      %173 = arith.extui %172 : vector<32x32xi1> to vector<32x32xi32>
      %174 = arith.addi %163, %173 : vector<32x32xi32>
      %175 = vector.extract_strided_slice %73 {offsets = [9, 0], sizes = [1, 32], strides = [1, 1]} : vector<32x32xf32> to vector<1x32xf32>
      %176 = vector.broadcast %175 : vector<1x32xf32> to vector<32x32xf32>
      %177 = arith.cmpf ogt, %176, %73 : vector<32x32xf32>
      %178 = vector.broadcast %175 : vector<1x32xf32> to vector<32x32xf32>
      %179 = arith.cmpf oeq, %178, %73 : vector<32x32xf32>
      %c9_i32 = arith.constant 9 : i32
      %180 = vector.broadcast %c9_i32 : i32 to vector<32x32xi32>
      %181 = arith.cmpi sgt, %74, %180 : vector<32x32xi32>
      %182 = arith.andi %179, %181 : vector<32x32xi1>
      %183 = arith.ori %177, %182 : vector<32x32xi1>
      %184 = arith.extui %183 : vector<32x32xi1> to vector<32x32xi32>
      %185 = arith.addi %174, %184 : vector<32x32xi32>
      %186 = vector.extract_strided_slice %73 {offsets = [10, 0], sizes = [1, 32], strides = [1, 1]} : vector<32x32xf32> to vector<1x32xf32>
      %187 = vector.broadcast %186 : vector<1x32xf32> to vector<32x32xf32>
      %188 = arith.cmpf ogt, %187, %73 : vector<32x32xf32>
      %189 = vector.broadcast %186 : vector<1x32xf32> to vector<32x32xf32>
      %190 = arith.cmpf oeq, %189, %73 : vector<32x32xf32>
      %c10_i32 = arith.constant 10 : i32
      %191 = vector.broadcast %c10_i32 : i32 to vector<32x32xi32>
      %192 = arith.cmpi sgt, %74, %191 : vector<32x32xi32>
      %193 = arith.andi %190, %192 : vector<32x32xi1>
      %194 = arith.ori %188, %193 : vector<32x32xi1>
      %195 = arith.extui %194 : vector<32x32xi1> to vector<32x32xi32>
      %196 = arith.addi %185, %195 : vector<32x32xi32>
      %197 = vector.extract_strided_slice %73 {offsets = [11, 0], sizes = [1, 32], strides = [1, 1]} : vector<32x32xf32> to vector<1x32xf32>
      %198 = vector.broadcast %197 : vector<1x32xf32> to vector<32x32xf32>
      %199 = arith.cmpf ogt, %198, %73 : vector<32x32xf32>
      %200 = vector.broadcast %197 : vector<1x32xf32> to vector<32x32xf32>
      %201 = arith.cmpf oeq, %200, %73 : vector<32x32xf32>
      %c11_i32 = arith.constant 11 : i32
      %202 = vector.broadcast %c11_i32 : i32 to vector<32x32xi32>
      %203 = arith.cmpi sgt, %74, %202 : vector<32x32xi32>
      %204 = arith.andi %201, %203 : vector<32x32xi1>
      %205 = arith.ori %199, %204 : vector<32x32xi1>
      %206 = arith.extui %205 : vector<32x32xi1> to vector<32x32xi32>
      %207 = arith.addi %196, %206 : vector<32x32xi32>
      %208 = vector.extract_strided_slice %73 {offsets = [12, 0], sizes = [1, 32], strides = [1, 1]} : vector<32x32xf32> to vector<1x32xf32>
      %209 = vector.broadcast %208 : vector<1x32xf32> to vector<32x32xf32>
      %210 = arith.cmpf ogt, %209, %73 : vector<32x32xf32>
      %211 = vector.broadcast %208 : vector<1x32xf32> to vector<32x32xf32>
      %212 = arith.cmpf oeq, %211, %73 : vector<32x32xf32>
      %c12_i32 = arith.constant 12 : i32
      %213 = vector.broadcast %c12_i32 : i32 to vector<32x32xi32>
      %214 = arith.cmpi sgt, %74, %213 : vector<32x32xi32>
      %215 = arith.andi %212, %214 : vector<32x32xi1>
      %216 = arith.ori %210, %215 : vector<32x32xi1>
      %217 = arith.extui %216 : vector<32x32xi1> to vector<32x32xi32>
      %218 = arith.addi %207, %217 : vector<32x32xi32>
      %219 = vector.extract_strided_slice %73 {offsets = [13, 0], sizes = [1, 32], strides = [1, 1]} : vector<32x32xf32> to vector<1x32xf32>
      %220 = vector.broadcast %219 : vector<1x32xf32> to vector<32x32xf32>
      %221 = arith.cmpf ogt, %220, %73 : vector<32x32xf32>
      %222 = vector.broadcast %219 : vector<1x32xf32> to vector<32x32xf32>
      %223 = arith.cmpf oeq, %222, %73 : vector<32x32xf32>
      %c13_i32 = arith.constant 13 : i32
      %224 = vector.broadcast %c13_i32 : i32 to vector<32x32xi32>
      %225 = arith.cmpi sgt, %74, %224 : vector<32x32xi32>
      %226 = arith.andi %223, %225 : vector<32x32xi1>
      %227 = arith.ori %221, %226 : vector<32x32xi1>
      %228 = arith.extui %227 : vector<32x32xi1> to vector<32x32xi32>
      %229 = arith.addi %218, %228 : vector<32x32xi32>
      %230 = vector.extract_strided_slice %73 {offsets = [14, 0], sizes = [1, 32], strides = [1, 1]} : vector<32x32xf32> to vector<1x32xf32>
      %231 = vector.broadcast %230 : vector<1x32xf32> to vector<32x32xf32>
      %232 = arith.cmpf ogt, %231, %73 : vector<32x32xf32>
      %233 = vector.broadcast %230 : vector<1x32xf32> to vector<32x32xf32>
      %234 = arith.cmpf oeq, %233, %73 : vector<32x32xf32>
      %c14_i32 = arith.constant 14 : i32
      %235 = vector.broadcast %c14_i32 : i32 to vector<32x32xi32>
      %236 = arith.cmpi sgt, %74, %235 : vector<32x32xi32>
      %237 = arith.andi %234, %236 : vector<32x32xi1>
      %238 = arith.ori %232, %237 : vector<32x32xi1>
      %239 = arith.extui %238 : vector<32x32xi1> to vector<32x32xi32>
      %240 = arith.addi %229, %239 : vector<32x32xi32>
      %241 = vector.extract_strided_slice %73 {offsets = [15, 0], sizes = [1, 32], strides = [1, 1]} : vector<32x32xf32> to vector<1x32xf32>
      %242 = vector.broadcast %241 : vector<1x32xf32> to vector<32x32xf32>
      %243 = arith.cmpf ogt, %242, %73 : vector<32x32xf32>
      %244 = vector.broadcast %241 : vector<1x32xf32> to vector<32x32xf32>
      %245 = arith.cmpf oeq, %244, %73 : vector<32x32xf32>
      %c15_i32 = arith.constant 15 : i32
      %246 = vector.broadcast %c15_i32 : i32 to vector<32x32xi32>
      %247 = arith.cmpi sgt, %74, %246 : vector<32x32xi32>
      %248 = arith.andi %245, %247 : vector<32x32xi1>
      %249 = arith.ori %243, %248 : vector<32x32xi1>
      %250 = arith.extui %249 : vector<32x32xi1> to vector<32x32xi32>
      %251 = arith.addi %240, %250 : vector<32x32xi32>
      %252 = vector.extract_strided_slice %73 {offsets = [16, 0], sizes = [1, 32], strides = [1, 1]} : vector<32x32xf32> to vector<1x32xf32>
      %253 = vector.broadcast %252 : vector<1x32xf32> to vector<32x32xf32>
      %254 = arith.cmpf ogt, %253, %73 : vector<32x32xf32>
      %255 = vector.broadcast %252 : vector<1x32xf32> to vector<32x32xf32>
      %256 = arith.cmpf oeq, %255, %73 : vector<32x32xf32>
      %c16_i32_21 = arith.constant 16 : i32
      %257 = vector.broadcast %c16_i32_21 : i32 to vector<32x32xi32>
      %258 = arith.cmpi sgt, %74, %257 : vector<32x32xi32>
      %259 = arith.andi %256, %258 : vector<32x32xi1>
      %260 = arith.ori %254, %259 : vector<32x32xi1>
      %261 = arith.extui %260 : vector<32x32xi1> to vector<32x32xi32>
      %262 = arith.addi %251, %261 : vector<32x32xi32>
      %263 = vector.extract_strided_slice %73 {offsets = [17, 0], sizes = [1, 32], strides = [1, 1]} : vector<32x32xf32> to vector<1x32xf32>
      %264 = vector.broadcast %263 : vector<1x32xf32> to vector<32x32xf32>
      %265 = arith.cmpf ogt, %264, %73 : vector<32x32xf32>
      %266 = vector.broadcast %263 : vector<1x32xf32> to vector<32x32xf32>
      %267 = arith.cmpf oeq, %266, %73 : vector<32x32xf32>
      %c17_i32 = arith.constant 17 : i32
      %268 = vector.broadcast %c17_i32 : i32 to vector<32x32xi32>
      %269 = arith.cmpi sgt, %74, %268 : vector<32x32xi32>
      %270 = arith.andi %267, %269 : vector<32x32xi1>
      %271 = arith.ori %265, %270 : vector<32x32xi1>
      %272 = arith.extui %271 : vector<32x32xi1> to vector<32x32xi32>
      %273 = arith.addi %262, %272 : vector<32x32xi32>
      %274 = vector.extract_strided_slice %73 {offsets = [18, 0], sizes = [1, 32], strides = [1, 1]} : vector<32x32xf32> to vector<1x32xf32>
      %275 = vector.broadcast %274 : vector<1x32xf32> to vector<32x32xf32>
      %276 = arith.cmpf ogt, %275, %73 : vector<32x32xf32>
      %277 = vector.broadcast %274 : vector<1x32xf32> to vector<32x32xf32>
      %278 = arith.cmpf oeq, %277, %73 : vector<32x32xf32>
      %c18_i32 = arith.constant 18 : i32
      %279 = vector.broadcast %c18_i32 : i32 to vector<32x32xi32>
      %280 = arith.cmpi sgt, %74, %279 : vector<32x32xi32>
      %281 = arith.andi %278, %280 : vector<32x32xi1>
      %282 = arith.ori %276, %281 : vector<32x32xi1>
      %283 = arith.extui %282 : vector<32x32xi1> to vector<32x32xi32>
      %284 = arith.addi %273, %283 : vector<32x32xi32>
      %285 = vector.extract_strided_slice %73 {offsets = [19, 0], sizes = [1, 32], strides = [1, 1]} : vector<32x32xf32> to vector<1x32xf32>
      %286 = vector.broadcast %285 : vector<1x32xf32> to vector<32x32xf32>
      %287 = arith.cmpf ogt, %286, %73 : vector<32x32xf32>
      %288 = vector.broadcast %285 : vector<1x32xf32> to vector<32x32xf32>
      %289 = arith.cmpf oeq, %288, %73 : vector<32x32xf32>
      %c19_i32 = arith.constant 19 : i32
      %290 = vector.broadcast %c19_i32 : i32 to vector<32x32xi32>
      %291 = arith.cmpi sgt, %74, %290 : vector<32x32xi32>
      %292 = arith.andi %289, %291 : vector<32x32xi1>
      %293 = arith.ori %287, %292 : vector<32x32xi1>
      %294 = arith.extui %293 : vector<32x32xi1> to vector<32x32xi32>
      %295 = arith.addi %284, %294 : vector<32x32xi32>
      %296 = vector.extract_strided_slice %73 {offsets = [20, 0], sizes = [1, 32], strides = [1, 1]} : vector<32x32xf32> to vector<1x32xf32>
      %297 = vector.broadcast %296 : vector<1x32xf32> to vector<32x32xf32>
      %298 = arith.cmpf ogt, %297, %73 : vector<32x32xf32>
      %299 = vector.broadcast %296 : vector<1x32xf32> to vector<32x32xf32>
      %300 = arith.cmpf oeq, %299, %73 : vector<32x32xf32>
      %c20_i32 = arith.constant 20 : i32
      %301 = vector.broadcast %c20_i32 : i32 to vector<32x32xi32>
      %302 = arith.cmpi sgt, %74, %301 : vector<32x32xi32>
      %303 = arith.andi %300, %302 : vector<32x32xi1>
      %304 = arith.ori %298, %303 : vector<32x32xi1>
      %305 = arith.extui %304 : vector<32x32xi1> to vector<32x32xi32>
      %306 = arith.addi %295, %305 : vector<32x32xi32>
      %307 = vector.extract_strided_slice %73 {offsets = [21, 0], sizes = [1, 32], strides = [1, 1]} : vector<32x32xf32> to vector<1x32xf32>
      %308 = vector.broadcast %307 : vector<1x32xf32> to vector<32x32xf32>
      %309 = arith.cmpf ogt, %308, %73 : vector<32x32xf32>
      %310 = vector.broadcast %307 : vector<1x32xf32> to vector<32x32xf32>
      %311 = arith.cmpf oeq, %310, %73 : vector<32x32xf32>
      %c21_i32 = arith.constant 21 : i32
      %312 = vector.broadcast %c21_i32 : i32 to vector<32x32xi32>
      %313 = arith.cmpi sgt, %74, %312 : vector<32x32xi32>
      %314 = arith.andi %311, %313 : vector<32x32xi1>
      %315 = arith.ori %309, %314 : vector<32x32xi1>
      %316 = arith.extui %315 : vector<32x32xi1> to vector<32x32xi32>
      %317 = arith.addi %306, %316 : vector<32x32xi32>
      %318 = vector.extract_strided_slice %73 {offsets = [22, 0], sizes = [1, 32], strides = [1, 1]} : vector<32x32xf32> to vector<1x32xf32>
      %319 = vector.broadcast %318 : vector<1x32xf32> to vector<32x32xf32>
      %320 = arith.cmpf ogt, %319, %73 : vector<32x32xf32>
      %321 = vector.broadcast %318 : vector<1x32xf32> to vector<32x32xf32>
      %322 = arith.cmpf oeq, %321, %73 : vector<32x32xf32>
      %c22_i32 = arith.constant 22 : i32
      %323 = vector.broadcast %c22_i32 : i32 to vector<32x32xi32>
      %324 = arith.cmpi sgt, %74, %323 : vector<32x32xi32>
      %325 = arith.andi %322, %324 : vector<32x32xi1>
      %326 = arith.ori %320, %325 : vector<32x32xi1>
      %327 = arith.extui %326 : vector<32x32xi1> to vector<32x32xi32>
      %328 = arith.addi %317, %327 : vector<32x32xi32>
      %329 = vector.extract_strided_slice %73 {offsets = [23, 0], sizes = [1, 32], strides = [1, 1]} : vector<32x32xf32> to vector<1x32xf32>
      %330 = vector.broadcast %329 : vector<1x32xf32> to vector<32x32xf32>
      %331 = arith.cmpf ogt, %330, %73 : vector<32x32xf32>
      %332 = vector.broadcast %329 : vector<1x32xf32> to vector<32x32xf32>
      %333 = arith.cmpf oeq, %332, %73 : vector<32x32xf32>
      %c23_i32 = arith.constant 23 : i32
      %334 = vector.broadcast %c23_i32 : i32 to vector<32x32xi32>
      %335 = arith.cmpi sgt, %74, %334 : vector<32x32xi32>
      %336 = arith.andi %333, %335 : vector<32x32xi1>
      %337 = arith.ori %331, %336 : vector<32x32xi1>
      %338 = arith.extui %337 : vector<32x32xi1> to vector<32x32xi32>
      %339 = arith.addi %328, %338 : vector<32x32xi32>
      %340 = vector.extract_strided_slice %73 {offsets = [24, 0], sizes = [1, 32], strides = [1, 1]} : vector<32x32xf32> to vector<1x32xf32>
      %341 = vector.broadcast %340 : vector<1x32xf32> to vector<32x32xf32>
      %342 = arith.cmpf ogt, %341, %73 : vector<32x32xf32>
      %343 = vector.broadcast %340 : vector<1x32xf32> to vector<32x32xf32>
      %344 = arith.cmpf oeq, %343, %73 : vector<32x32xf32>
      %c24_i32 = arith.constant 24 : i32
      %345 = vector.broadcast %c24_i32 : i32 to vector<32x32xi32>
      %346 = arith.cmpi sgt, %74, %345 : vector<32x32xi32>
      %347 = arith.andi %344, %346 : vector<32x32xi1>
      %348 = arith.ori %342, %347 : vector<32x32xi1>
      %349 = arith.extui %348 : vector<32x32xi1> to vector<32x32xi32>
      %350 = arith.addi %339, %349 : vector<32x32xi32>
      %351 = vector.extract_strided_slice %73 {offsets = [25, 0], sizes = [1, 32], strides = [1, 1]} : vector<32x32xf32> to vector<1x32xf32>
      %352 = vector.broadcast %351 : vector<1x32xf32> to vector<32x32xf32>
      %353 = arith.cmpf ogt, %352, %73 : vector<32x32xf32>
      %354 = vector.broadcast %351 : vector<1x32xf32> to vector<32x32xf32>
      %355 = arith.cmpf oeq, %354, %73 : vector<32x32xf32>
      %c25_i32 = arith.constant 25 : i32
      %356 = vector.broadcast %c25_i32 : i32 to vector<32x32xi32>
      %357 = arith.cmpi sgt, %74, %356 : vector<32x32xi32>
      %358 = arith.andi %355, %357 : vector<32x32xi1>
      %359 = arith.ori %353, %358 : vector<32x32xi1>
      %360 = arith.extui %359 : vector<32x32xi1> to vector<32x32xi32>
      %361 = arith.addi %350, %360 : vector<32x32xi32>
      %362 = vector.extract_strided_slice %73 {offsets = [26, 0], sizes = [1, 32], strides = [1, 1]} : vector<32x32xf32> to vector<1x32xf32>
      %363 = vector.broadcast %362 : vector<1x32xf32> to vector<32x32xf32>
      %364 = arith.cmpf ogt, %363, %73 : vector<32x32xf32>
      %365 = vector.broadcast %362 : vector<1x32xf32> to vector<32x32xf32>
      %366 = arith.cmpf oeq, %365, %73 : vector<32x32xf32>
      %c26_i32 = arith.constant 26 : i32
      %367 = vector.broadcast %c26_i32 : i32 to vector<32x32xi32>
      %368 = arith.cmpi sgt, %74, %367 : vector<32x32xi32>
      %369 = arith.andi %366, %368 : vector<32x32xi1>
      %370 = arith.ori %364, %369 : vector<32x32xi1>
      %371 = arith.extui %370 : vector<32x32xi1> to vector<32x32xi32>
      %372 = arith.addi %361, %371 : vector<32x32xi32>
      %373 = vector.extract_strided_slice %73 {offsets = [27, 0], sizes = [1, 32], strides = [1, 1]} : vector<32x32xf32> to vector<1x32xf32>
      %374 = vector.broadcast %373 : vector<1x32xf32> to vector<32x32xf32>
      %375 = arith.cmpf ogt, %374, %73 : vector<32x32xf32>
      %376 = vector.broadcast %373 : vector<1x32xf32> to vector<32x32xf32>
      %377 = arith.cmpf oeq, %376, %73 : vector<32x32xf32>
      %c27_i32 = arith.constant 27 : i32
      %378 = vector.broadcast %c27_i32 : i32 to vector<32x32xi32>
      %379 = arith.cmpi sgt, %74, %378 : vector<32x32xi32>
      %380 = arith.andi %377, %379 : vector<32x32xi1>
      %381 = arith.ori %375, %380 : vector<32x32xi1>
      %382 = arith.extui %381 : vector<32x32xi1> to vector<32x32xi32>
      %383 = arith.addi %372, %382 : vector<32x32xi32>
      %384 = vector.extract_strided_slice %73 {offsets = [28, 0], sizes = [1, 32], strides = [1, 1]} : vector<32x32xf32> to vector<1x32xf32>
      %385 = vector.broadcast %384 : vector<1x32xf32> to vector<32x32xf32>
      %386 = arith.cmpf ogt, %385, %73 : vector<32x32xf32>
      %387 = vector.broadcast %384 : vector<1x32xf32> to vector<32x32xf32>
      %388 = arith.cmpf oeq, %387, %73 : vector<32x32xf32>
      %c28_i32 = arith.constant 28 : i32
      %389 = vector.broadcast %c28_i32 : i32 to vector<32x32xi32>
      %390 = arith.cmpi sgt, %74, %389 : vector<32x32xi32>
      %391 = arith.andi %388, %390 : vector<32x32xi1>
      %392 = arith.ori %386, %391 : vector<32x32xi1>
      %393 = arith.extui %392 : vector<32x32xi1> to vector<32x32xi32>
      %394 = arith.addi %383, %393 : vector<32x32xi32>
      %395 = vector.extract_strided_slice %73 {offsets = [29, 0], sizes = [1, 32], strides = [1, 1]} : vector<32x32xf32> to vector<1x32xf32>
      %396 = vector.broadcast %395 : vector<1x32xf32> to vector<32x32xf32>
      %397 = arith.cmpf ogt, %396, %73 : vector<32x32xf32>
      %398 = vector.broadcast %395 : vector<1x32xf32> to vector<32x32xf32>
      %399 = arith.cmpf oeq, %398, %73 : vector<32x32xf32>
      %c29_i32 = arith.constant 29 : i32
      %400 = vector.broadcast %c29_i32 : i32 to vector<32x32xi32>
      %401 = arith.cmpi sgt, %74, %400 : vector<32x32xi32>
      %402 = arith.andi %399, %401 : vector<32x32xi1>
      %403 = arith.ori %397, %402 : vector<32x32xi1>
      %404 = arith.extui %403 : vector<32x32xi1> to vector<32x32xi32>
      %405 = arith.addi %394, %404 : vector<32x32xi32>
      %406 = vector.extract_strided_slice %73 {offsets = [30, 0], sizes = [1, 32], strides = [1, 1]} : vector<32x32xf32> to vector<1x32xf32>
      %407 = vector.broadcast %406 : vector<1x32xf32> to vector<32x32xf32>
      %408 = arith.cmpf ogt, %407, %73 : vector<32x32xf32>
      %409 = vector.broadcast %406 : vector<1x32xf32> to vector<32x32xf32>
      %410 = arith.cmpf oeq, %409, %73 : vector<32x32xf32>
      %c30_i32 = arith.constant 30 : i32
      %411 = vector.broadcast %c30_i32 : i32 to vector<32x32xi32>
      %412 = arith.cmpi sgt, %74, %411 : vector<32x32xi32>
      %413 = arith.andi %410, %412 : vector<32x32xi1>
      %414 = arith.ori %408, %413 : vector<32x32xi1>
      %415 = arith.extui %414 : vector<32x32xi1> to vector<32x32xi32>
      %416 = arith.addi %405, %415 : vector<32x32xi32>
      %417 = vector.extract_strided_slice %73 {offsets = [31, 0], sizes = [1, 32], strides = [1, 1]} : vector<32x32xf32> to vector<1x32xf32>
      %418 = vector.broadcast %417 : vector<1x32xf32> to vector<32x32xf32>
      %419 = arith.cmpf ogt, %418, %73 : vector<32x32xf32>
      %420 = vector.broadcast %417 : vector<1x32xf32> to vector<32x32xf32>
      %421 = arith.cmpf oeq, %420, %73 : vector<32x32xf32>
      %c31_i32 = arith.constant 31 : i32
      %422 = vector.broadcast %c31_i32 : i32 to vector<32x32xi32>
      %423 = arith.cmpi sgt, %74, %422 : vector<32x32xi32>
      %424 = arith.andi %421, %423 : vector<32x32xi1>
      %425 = arith.ori %419, %424 : vector<32x32xi1>
      %426 = arith.extui %425 : vector<32x32xi1> to vector<32x32xi32>
      %427 = arith.addi %416, %426 : vector<32x32xi32>
      %c16_i32_22 = arith.constant 16 : i32
      %428 = vector.broadcast %c16_i32_22 : i32 to vector<32x32xi32>
      %429 = arith.cmpi slt, %427, %428 : vector<32x32xi32>
      %cst_23 = arith.constant 0.000000e+00 : f32
      %430 = vector.broadcast %cst_23 : f32 to vector<32x32xf32>
      %431 = arith.select %429, %73, %430 : vector<32x32xi1>, vector<32x32xf32>
      %cst_24 = arith.constant dense<0.000000e+00> : vector<32xf32>
      %432 = vector.multi_reduction <add>, %431, %cst_24 [0] : vector<32x32xf32> to vector<32xf32>
      %433 = vector.shape_cast %432 : vector<32xf32> to vector<1x32xf32>
      %cst_25 = arith.constant 6.250000e-02 : f32
      %434 = vector.broadcast %cst_25 : f32 to vector<1x32xf32>
      %435 = arith.mulf %433, %434 : vector<1x32xf32>
      %c0_26 = arith.constant 0 : index
      %c0_27 = arith.constant 0 : index
      %436 = vector.load %arg8[%c0_26, %c0_27] : memref<1x32xf32, #tpu.memory_space<vmem>>, vector<1x32xf32>
      %437 = arith.mulf %435, %436 : vector<1x32xf32>
      %cst_28 = arith.constant 0.000000e+00 : f32
      %438 = vector.broadcast %cst_28 : f32 to vector<1x1xf32>
      %439 = arith.mulf %437, %22 : vector<1x32xf32>
      %cst_29 = arith.constant dense<0.000000e+00> : vector<1xf32>
      %440 = vector.multi_reduction <add>, %439, %cst_29 [1] : vector<1x32xf32> to vector<1xf32>
      %441 = vector.shape_cast %440 : vector<1xf32> to vector<1x1xf32>
      %442 = vector.broadcast %13 : f32 to vector<1x1xf32>
      %443 = arith.addf %441, %442 : vector<1x1xf32>
      %c0_30 = arith.constant 0 : index
      %444 = memref.load %arg2[%c0_30] : memref<2xf32, #tpu.memory_space<smem>>
      %cst_31 = arith.constant 0.000000e+00 : f32
      %445 = vector.broadcast %cst_31 : f32 to vector<1x1xf32>
      %446 = arith.maximumf %443, %445 : vector<1x1xf32>
      %447 = vector.broadcast %444 : f32 to vector<1x1xf32>
      %448 = arith.mulf %443, %447 : vector<1x1xf32>
      %449 = arith.subf %446, %448 : vector<1x1xf32>
      %450 = math.absf %443 : vector<1x1xf32>
      %cst_32 = arith.constant 0.000000e+00 : f32
      %451 = vector.broadcast %cst_32 : f32 to vector<1x1xf32>
      %452 = arith.subf %451, %450 : vector<1x1xf32>
      %453 = math.exp %452 : vector<1x1xf32>
      %cst_33 = arith.constant 1.000000e+00 : f32
      %454 = vector.broadcast %cst_33 : f32 to vector<1x1xf32>
      %455 = arith.addf %454, %453 : vector<1x1xf32>
      %456 = math.log %455 : vector<1x1xf32>
      %457 = arith.addf %449, %456 : vector<1x1xf32>
      %458 = arith.addf %438, %457 : vector<1x1xf32>
      %459 = arith.mulf %437, %30 : vector<1x32xf32>
      %cst_34 = arith.constant dense<0.000000e+00> : vector<1xf32>
      %460 = vector.multi_reduction <add>, %459, %cst_34 [1] : vector<1x32xf32> to vector<1xf32>
      %461 = vector.shape_cast %460 : vector<1xf32> to vector<1x1xf32>
      %462 = vector.broadcast %13 : f32 to vector<1x1xf32>
      %463 = arith.addf %461, %462 : vector<1x1xf32>
      %c1 = arith.constant 1 : index
      %464 = memref.load %arg2[%c1] : memref<2xf32, #tpu.memory_space<smem>>
      %cst_35 = arith.constant 0.000000e+00 : f32
      %465 = vector.broadcast %cst_35 : f32 to vector<1x1xf32>
      %466 = arith.maximumf %463, %465 : vector<1x1xf32>
      %467 = vector.broadcast %464 : f32 to vector<1x1xf32>
      %468 = arith.mulf %463, %467 : vector<1x1xf32>
      %469 = arith.subf %466, %468 : vector<1x1xf32>
      %470 = math.absf %463 : vector<1x1xf32>
      %cst_36 = arith.constant 0.000000e+00 : f32
      %471 = vector.broadcast %cst_36 : f32 to vector<1x1xf32>
      %472 = arith.subf %471, %470 : vector<1x1xf32>
      %473 = math.exp %472 : vector<1x1xf32>
      %cst_37 = arith.constant 1.000000e+00 : f32
      %474 = vector.broadcast %cst_37 : f32 to vector<1x1xf32>
      %475 = arith.addf %474, %473 : vector<1x1xf32>
      %476 = math.log %475 : vector<1x1xf32>
      %477 = arith.addf %469, %476 : vector<1x1xf32>
      %478 = arith.addf %458, %477 : vector<1x1xf32>
      %cst_38 = arith.constant 5.000000e-01 : f32
      %479 = vector.broadcast %cst_38 : f32 to vector<1x1xf32>
      %480 = arith.mulf %478, %479 : vector<1x1xf32>
      %481 = vector.shape_cast %480 : vector<1x1xf32> to vector<1x1xf32>
      %482 = vector.broadcast %481 : vector<1x1xf32> to vector<1x128xf32>
      %c0_39 = arith.constant 0 : index
      %c0_40 = arith.constant 0 : index
      %c0_41 = arith.constant 0 : index
      %483 = vector.load %arg9[%c0_39, %c0_40, %c0_41] : memref<1x1x128xf32, #tpu.memory_space<vmem>>, vector<1x1x128xf32>
      %484 = vector.shape_cast %483 : vector<1x1x128xf32> to vector<1x128xf32>
      %485 = vector.shape_cast %482 : vector<1x128xf32> to vector<1x1x128xf32>
      tpu.vector_store %arg9[%c0_39, %c0_40, %c0_41], %485 {strides = array<i32>} : memref<1x1x128xf32, #tpu.memory_space<vmem>>, vector<1x1x128xf32>,
    } else {
    }
    return
  }
  func.func @transform_0(%arg0: i32) -> i32 {
    %c0_i32 = arith.constant 0 : i32
    %c0_i32_0 = arith.constant 0 : i32
    return %c0_i32 : i32
  }
  func.func @transform_1(%arg0: i32) -> i32 {
    %c0_i32 = arith.constant 0 : i32
    %c0_i32_0 = arith.constant 0 : i32
    return %c0_i32 : i32
  }
  func.func @transform_2(%arg0: i32) -> (i32, i32) {
    %c0_i32 = arith.constant 0 : i32
    %c0_i32_0 = arith.constant 0 : i32
    %c0_i32_1 = arith.constant 0 : i32
    return %c0_i32, %c0_i32_0 : i32, i32
  }
  func.func @transform_3(%arg0: i32) -> (i32, i32) {
    %c0_i32 = arith.constant 0 : i32
    %c0_i32_0 = arith.constant 0 : i32
    %c0_i32_1 = arith.constant 0 : i32
    return %c0_i32, %c0_i32_0 : i32, i32
  }
  func.func @transform_4(%arg0: i32) -> (i32, i32) {
    %c0_i32 = arith.constant 0 : i32
    %c0_i32_0 = arith.constant 0 : i32
    %c0_i32_1 = arith.constant 0 : i32
    return %c0_i32, %c0_i32_0 : i32, i32
  }
  func.func @transform_5(%arg0: i32) -> (i32, i32) {
    %c0_i32 = arith.constant 0 : i32
    %c0_i32_0 = arith.constant 0 : i32
    %c0_i32_1 = arith.constant 0 : i32
    return %c0_i32, %c0_i32_0 : i32, i32
  }
  func.func @transform_6(%arg0: i32) -> (i32, i32) {
    %c0_i32 = arith.constant 0 : i32
    %c0_i32_0 = arith.constant 0 : i32
    %c0_i32_1 = arith.constant 0 : i32
    return %c0_i32, %c0_i32_0 : i32, i32
  }
  func.func @transform_7(%arg0: i32) -> (i32, i32) {
    %c0_i32 = arith.constant 0 : i32
    %c0_i32_0 = arith.constant 0 : i32
    %c0_i32_1 = arith.constant 0 : i32
    return %c0_i32, %c0_i32_0 : i32, i32
  }
  func.func @transform_8(%arg0: i32) -> (i32, i32, i32) {
    %c0_i32 = arith.constant 0 : i32
    %c0_i32_0 = arith.constant 0 : i32
    %c0_i32_1 = arith.constant 0 : i32
    return %arg0, %c0_i32, %c0_i32_0 : i32, i32, i32
  }
}

</mosaic_0001>

<bundles_post_ra>
// kernel: ptap_loss_forward.1
= control target key start
LH: loop header
LB: loop body
LE: loop exit
PB: predicated region body
PF: predicated region fallthrough
CT: control target
= control target key end

     0   :  { %13 = vsyncpa [#allocation3], 0  ;;  %s4938_s0 = inlined_call_operand.vmem [shape: f32[12], index: 0, kind: input, shape index: {}]   ;;  %s4939_s1 = inlined_call_operand.vmem [shape: f32[2], index: 1, kind: input, shape index: {}]   ;;  %s4940_s2 = inlined_call_operand.vmem [shape: f32[8,512], index: 2, kind: input, shape index: {}]   ;;  %s4941_s3 = inlined_call_operand.vmem [shape: f32[16,128], index: 3, kind: input, shape index: {}]   ;;  %s4942_s4 = inlined_call_operand.vmem [shape: f32[32,32], index: 4, kind: input, shape index: {}]   ;;  %s4943_s5 = inlined_call_operand.vmem [shape: f32[1,512], index: 5, kind: input, shape index: {}]   ;;  %s4944_s6 = inlined_call_operand.vmem [shape: f32[1,128], index: 6, kind: input, shape index: {}]   ;;  %s4945_s7 = inlined_call_operand.vmem [shape: f32[1,32], index: 7, kind: input, shape index: {}]   ;;  %s4946_s8 = inlined_call_operand.vmem [shape: f32[3,1,128], index: 8, kind: output, shape index: {}]  }
   0x1   :  { %14 = vsyncpa [#allocation5], 0  ;;  %s2904_s27 = smov 0  }
   0x2 LB: > { %s2910_s28 = sadd.s32 4294967295, %s2847_s27   ;;  %p2672_p0 = scmp.ge.s32.totalorder %s2847_s27, 1  ;;  %s2847_s27 = sphi %s2904_s27, %s20_s27  }
   0x3   : > { %p219_p1 = scmp.lt.s32.totalorder %s2847_s27, 4  ;;  %s232_s9 = sshll.u32 %s4938_s0, 4  ;;  %s233_s9 = int_to_ptr.vmem [resolvable:$true] %s232_s9 }
   0x4   : > { %p4947_p4 = scmp.eq.s32.totalorder %s2910_s28, 0  ;;  %s243_s13 = sshll.u32 %s4939_s1, 4  ;;  %s244_s13 = int_to_ptr.vmem [resolvable:$true] %s243_s13 }
   0x5   : > { %p2918_p3 = pnand %p2672_p0, %p219_p1  ;;  %s2803_s15 = scalar_lea.vmem %s233_s9, 16 }
   0x6   : > { %p2804_p7 = scmp.ne.s32.totalorder %s233_s9, %s2803_s15  ;;  %p2811_p11 = scmp.lt.s32.totalorder %s233_s9, %s233_s9 }
   0x7   : > { %s4952_s10 = scalar_select %p2918_p3, 1, 0 }
   0x8   : > { %p2705_p5 = pneg %p2918_p3  ;;  %p2812_p12 = scmp.lt.s32.totalorder %s2803_s15, %s2803_s15 }
   0xa   : > { %p2930_p6 = pnand %p4947_p4, %p2705_p5  ;;  %p2813_p13 = por %p2812_p12, %p2811_p11 }
   0xc   : > { %p2805_p8 = pneg %p2930_p6 }
   0xe   : > { %p2806_p9 = pnand %p2805_p8, %p2804_p7 }
  0x10   : > { %p2807_p10 = pneg %p2806_p9 }
  0x12   : > { %p2814_p0 = pnand %p2813_p13, %p2807_p10 }
  0x14   : > { %2817 = shalt.err (!%p2814_p0)
}
  0x15   : > { %s2849_s16 = smov [#allocation2]   ;;  %s2818_s17 = scalar_lea.vmem %s244_s13, 16 }
  0x16   : > { %2708 = dma.vmem_to_smem (!%p2930_p6), %s233_s9, 16, %s2849_s16, [#allocation3]  }
  0x17   : > { %p2819_p1 = scmp.ne.s32.totalorder %s244_s13, %s2818_s17  ;;  %p2826_p4 = scmp.lt.s32.totalorder %s244_s13, %s244_s13 }
  0x18   : > { %p2827_p3 = scmp.lt.s32.totalorder %s2818_s17, %s2818_s17 }
  0x19   : > { %p2821_p5 = pnand %p2819_p1, %p2805_p8 }
  0x1a   : > { %p2828_p7 = por %p2827_p3, %p2826_p4 }
  0x1b   : > { %p2822_p2 = pneg %p2821_p5 }
  0x1d   : > { %p2829_p9 = pnand %p2828_p7, %p2822_p2 }
  0x1f   : > { %2832 = shalt.err (!%p2829_p9)
}
  0x20   : > { %s2850_s18 = smov [#allocation4]   ;;  %p4954_p10 = scmp.ne.s32.totalorder %s4952_s10, 0 }
  0x21   : > { %2711 = dma.vmem_to_smem (!%p2930_p6), %s244_s13, 16, %s2850_s18, [#allocation5]  }
  0x22   : > { %274 = sbr.rel (%p4954_p10) target bundleno = 1916 (0x77c), region = 52  ;;  %p4955_p11 = scmp.eq.s32.totalorder (!%p4954_p10), %s2910_s28, 0 }
  0x29   : > { %2838 = dma.done.wait (%p4955_p11), [#allocation3], 16   ;;  %p4956_p12 = pmov %p4955_p11 }
  0x2a   : > { %p4957_p8 = pmov %p4955_p11 }
  0x2b   : > { %2840 = vsyncadd (%p4956_p12), [#allocation3], 4294967280 }
  0x2c   : > { %2842 = dma.done.wait (%p4957_p8), [#allocation5], 16   ;;  %p4958_p3 = pmov %p4957_p8 }
  0x2e   : > { %2844 = vsyncadd (%p4958_p3), [#allocation5], 4294967280 }
  0x2f   : > { %284 = sfence }
  0x30   : > { %p306_p2 = scmp.lt.s32.totalorder %s2910_s28, 2  ;;  %p4959_p4 = scmp.ne.s32.totalorder %s2910_s28, 0 }
  0x31   : > { %v313_v0 = vld [vmem:[%s4940_s2] sm:$0xff] (!%p4959_p4)  ;;  %v314_v1 = vld [vmem:[%s4940_s2 + $0x8] sm:$0xff] (!%p4959_p4)  ;;  %v315_v2 = vld [vmem:[%s4940_s2 + $0x10] sm:$0xff] (!%p4959_p4)  ;;  %v2851_v14 = vmov (!%p4959_p4), 1   ;;  %s317_s11 = sld [smem:[#allocation2]] (!%p4959_p4)  ;;  %s2679_s12 = sld [smem:[#allocation2 + $0x1]] (!%p4959_p4)  ;;  %v428_v40 = vlaneseq (!%p4959_p4) }
  0x32   : > { %s307_s19 = scalar_select %p306_p2, %s2910_s28, 2 }
  0x33   : > { %312 = sbr.rel (%p4959_p4) target bundleno = 657 (0x291), region = 64  ;;  %v316_v3 = vld [vmem:[%s4940_s2 + $0x18] sm:$0xff] (!%p4959_p4)  ;;  %v360_v4 = vmul.f32 (!%p4959_p4), 0.0, %v315_v2  ;;  %v362_v5 = vadd.f32 (!%p4959_p4), %v314_v1, %v313_v0  ;;  %v368_v6 = vmul.f32 (!%p4959_p4), 0.0, %v313_v0  ;;  %v369_v7 = vmul.f32 (!%p4959_p4), 0.0, %v314_v1  ;;  %2734 = vset.pattern.permute.xlu1 (!%p4959_p4), %v2851_v14  ;;  %2736 = vset.pattern.permute.xlu0 (!%p4959_p4), %v2851_v14  ;;  %s2680_s13 = sld [smem:[#allocation2 + $0x2]] (!%p4959_p4) }
  0x34   : > { %s2955_s22 = scalar_lea.vmem %s4946_s8, %s307_s19  ;;  %v361_v8 = vmul.f32 (!%p4959_p4), 0.0, %v316_v3  ;;  %vm378_vm0 = vcmask (!%p4959_p4), 7168   ;;  %vm4949_vm1 = vcmask (!%p4959_p4), 1040384   ;;  %vm387_vm2 = vcmask (!%p4959_p4), 1046528   ;;  %s2681_s16 = sld [smem:[#allocation2 + $0x3]] (!%p4959_p4) }
  0x35   : > { %v363_v9 = vadd.f32 (!%p4959_p4), %v362_v5, %v360_v4  ;;  %v372_v10 = vadd.f32 (!%p4959_p4), %v369_v7, %v368_v6  ;;  %v2852_v37 = vmov (!%p4959_p4), 0   ;;  %v2973_v44 = vshrl.u32 (!%p4959_p4), %v428_v40, 7  ;;  %s831_s17 = sld [smem:[#allocation4]] (!%p4959_p4)  ;;  %s2682_s18 = sld [smem:[#allocation4 + $0x1]] (!%p4959_p4) }
  0x36   : > { %v4982_v14 = vmov (!%p4959_p4), 0  ;;  %v5047_v60 = vmov (!%p4959_p4), 0 }
  0x37   : > { %v364_v11 = vadd.f32 (!%p4959_p4), %v363_v9, %v361_v8  ;;  %v373_v12 = vadd.f32 (!%p4959_p4), %v372_v10, %v315_v2  ;;  %v389_v20 = vstv (!%p4959_p4), %s317_s11  ;;  %v391_v21 = vstv (!%p4959_p4), %s2679_s12 }
  0x38   : > { %v2978_v47 = vsub.s32 (!%p4959_p4), 0, %v2973_v44  ;;  %v2989_v52 = vsub.s32 (!%p4959_p4), 1, %v2973_v44  ;;  %vm454_vm4 = vcmp.gt.s32.totalorder (!%p4959_p4), %v2973_v44, 0  ;;  %v3008_v59 = vsub.s32 (!%p4959_p4), 2, %v2973_v44 }
  0x39   : > { %365 = vadd.xlane.f32.xlu0 (!%p4959_p4), %v364_v11  ;;  %v374_v13 = vadd.f32 (!%p4959_p4), %v373_v12, %v316_v3  ;;  %v394_v24 = vstv (!%p4959_p4), %s2680_s13  ;;  %vm491_vm11 = vcmp.gt.s32.totalorder (!%p4959_p4), %v2973_v44, 1  ;;  %v4977_v11 = vmov (!%p4959_p4), 0 }
  0x3a   : > { %v4980_v12 = vmov 0  ;;  %v633_v40 = vsub.s32 5, %v2973_v44 }
  0x3d   : > { %375 = vadd.xlane.f32.xlu0 %v374_v13 }
  0xc6   : > { %v366_v15 = vpop.xlane.xlu0 %365 }
  0xc7   : > { %v367_v17 = vmul.f32 0.00390625, %v366_v15  ;;  %v4984_v15 = vmov 0 }
  0xca   : > { %v376_v16 = vpop.xlane.xlu0 %375 }
  0xcb   : > { %v377_v18 = vmul.f32 0.00390625, %v376_v16  ;;  %v4987_v16 = vmov 0 }
  0xcd   : > { %v379_v19 = vsel %vm378_vm0, %v367_v17, %v377_v18  ;;  %v592_v18 = vsub.s32 4, %v2973_v44 }
  0xce   : > { %v381_v22 = vrot.slane %v379_v19, 7  ;;  %v385_v23 = vrot.slane %v379_v19, 1  ;;  %v392_v28 = vmul.f32 %v391_v21, %v379_v19  ;;  %v4990_v19 = vmov 0 }
  0xd0   : > { %v384_v25 = vsel %vm4949_vm1, 0.0, %v381_v22  ;;  %v388_v26 = vsel %vm387_vm2, %v385_v23, 0.0  ;;  %v5000_v23 = vmov 0 }
  0xd1   : > { %v390_v27 = vmul.f32 %v389_v20, %v384_v25  ;;  %v395_v30 = vmul.f32 %v394_v24, %v388_v26  ;;  %v4993_v20 = vmov 0 }
  0xd3   : > { %v393_v29 = vadd.f32 %v392_v28, %v390_v27  ;;  %v5011_v28 = vmov 0 }
  0xd5   : > { %v396_v31 = vadd.f32 %v395_v30, %v393_v29 }
  0xd7   : > { %v397_v32 = vsub.f32 0.0, %v396_v31 }
  0xd9   : > { %v398_v33 = vmul.f32 1.442695, %v397_v32 }
  0xdb   : > { %2737 = vpow2.f32 %v398_v33 }
  0xe5   : > { %v2738_v34 = vpop.eup %2737 }
  0xe6   : > { %v400_v35 = vadd.f32 1.0, %v2738_v34  ;;  %v5021_v34 = vmov 0 }
  0xe8   : > { %2739 = vrcp.f32 %v400_v35 }
  0xf2   : > { %v2740_v36 = vpop.eup %2739 }
  0xf3   : > { %413 = vperm.xlu1 %2734, %v2740_v36  }
  0xf7   : > { %2735 = vset.pattern.permute.xlu1 %v2852_v37 }
  0xf8   : > { %405 = vperm.xlu1 %2735, %v2740_v36  }
 0x172   : > { %v414_v38 = vpop.permute.xlu1 %413 }
 0x173   : > { %v416_v41 = vmul.f32 0.0, %v414_v38 }
 0x177   : > { %v406_v39 = vpop.permute.xlu1 %405 }
 0x178   : > { %v410_v42 = vmul.f32 0.0, %v406_v39  ;;  %v420_v43 = vadd.f32 %v416_v41, %v406_v39 }
 0x17a   : > { %v422_v45 = vadd.f32 %v414_v38, %v410_v42  ;;  %v2975_v46 = vmul.f32 %v420_v43, %v313_v0  ;;  %v2980_v48 = vmul.f32 %v420_v43, %v314_v1 }
 0x17c   : > { %v2982_v49 = vmul.f32 %v422_v45, %v315_v2  ;;  %v2984_v50 = vmul.f32 %v422_v45, %v316_v3  ;;  %v433_v51 = vrot.slane %v2975_v46, %v2978_v47  ;;  %v437_v53 = vrot.slane %v2980_v48, %v2978_v47 }
 0x17d   : > { %v470_v56 = vrot.slane %v2975_v46, %v2989_v52  ;;  %v474_v57 = vrot.slane %v2980_v48, %v2989_v52  ;;  %v511_v1 = vrot.slane %v2975_v46, %v3008_v59  ;;  %v3044_v2 = vsub.s32 3, %v2973_v44 }
 0x17e   : > { %v441_v54 = vrot.slane %v2982_v49, %v2978_v47  ;;  %v445_v55 = vrot.slane %v2984_v50, %v2978_v47  ;;  %vm450_vm3 = vcmp.eq.f32.partialorder %v433_v51, %v2975_v46  ;;  %vm451_vm5 = vcmp.eq.f32.partialorder %v437_v53, %v2980_v48 }
 0x17f   : > { %v478_v58 = vrot.slane %v2982_v49, %v2989_v52  ;;  %vm3013_vm8 = vmand %vm450_vm3, %vm454_vm4  ;;  %v482_v61 = vrot.slane %v2984_v50, %v2989_v52  ;;  %vm487_vm10 = vcmp.eq.f32.partialorder %v470_v56, %v2975_v46  ;;  %vm488_vm13 = vcmp.eq.f32.partialorder %v474_v57, %v2980_v48 }
 0x180   : > { %vm452_vm6 = vcmp.eq.f32.partialorder %v441_v54, %v2982_v49  ;;  %vm453_vm7 = vcmp.eq.f32.partialorder %v445_v55, %v2984_v50  ;;  %vm3021_vm9 = vmand %vm451_vm5, %vm454_vm4  ;;  %v515_v4 = vrot.slane %v2980_v48, %v3008_v59  ;;  %v519_v6 = vrot.slane %v2982_v49, %v3008_v59 }
 0x181   : > { %vm3029_vm12 = vmand %vm452_vm6, %vm454_vm4  ;;  %vm489_vm15 = vcmp.eq.f32.partialorder %v478_v58, %v2982_v49  ;;  %vm490_vm0 = vcmp.eq.f32.partialorder %v482_v61, %v2984_v50  ;;  %v523_v8 = vrot.slane %v2984_v50, %v3008_v59  ;;  %v552_v10 = vrot.slane %v2975_v46, %v3044_v2 }
 0x182   : > { %vm3036_vm14 = vmand %vm453_vm7, %vm454_vm4  ;;  %vm447_vm7 = vcmp.gt.f32.partialorder %v437_v53, %v2980_v48  ;;  %vm4976_vm1 = vcmp.gt.f32.partialorder %v433_v51, %v2975_v46  ;;  %v556_v13 = vrot.slane %v2980_v48, %v3044_v2  ;;  %v560_v17 = vrot.slane %v2982_v49, %v3044_v2 }
 0x183   : > { %vm3049_vm2 = vmand %vm487_vm10, %vm491_vm11  ;;  %vm448_vm10 = vcmp.gt.f32.partialorder %v441_v54, %v2982_v49  ;;  %vm4996_vm3 = vcmp.eq.f32.partialorder %v511_v1, %v2975_v46  ;;  %v564_v22 = vrot.slane %v2984_v50, %v3044_v2  ;;  %v593_v27 = vrot.slane %v2975_v46, %v592_v18 }
 0x184   : > { %vm3059_vm5 = vmand %vm488_vm13, %vm491_vm11  ;;  %v597_v30 = vrot.slane %v2980_v48, %v592_v18  ;;  %v601_v33 = vrot.slane %v2982_v49, %v592_v18  ;;  %v605_v36 = vrot.slane %v2984_v50, %v592_v18  ;;  %v634_v62 = vrot.slane %v2975_v46, %v633_v40 }
 0x185   : > { %vm3071_vm4 = vmand %vm489_vm15, %vm491_vm11  ;;  %vm4995_vm15 = vcmp.gt.s32.totalorder %v2973_v44, 2  ;;  %v638_v3 = vrot.slane %v2980_v48, %v633_v40  ;;  %v646_v9 = vrot.slane %v2984_v50, %v633_v40 }
 0x186   : > { %vm3083_vm6 = vmand %vm490_vm0, %vm491_vm11  ;;  %vm4979_vm11 = vcmp.gt.f32.partialorder %v470_v56, %v2975_v46 }
 0x187   : > { %vm3094_vm13 = vmor %vm4976_vm1, %vm3013_vm8 }
 0x188   : > { %v4978_v11 = vsel %vm3094_vm13, 4294967295, %v4977_v11  ;;  %vm3103_vm0 = vmor %vm4979_vm11, %vm3049_vm2  ;;  %vm4986_vm2 = vcmp.gt.f32.partialorder %v474_v57, %v2980_v48  ;;  %vm5013_vm13 = vcmp.gt.s32.totalorder %v2973_v44, 3 }
 0x189   : > { %v4981_v12 = vsel %vm3103_vm0, 4294967295, %v4980_v12  ;;  %vm3114_vm1 = vmor %vm447_vm7, %vm3021_vm9  ;;  %vm530_vm9 = vcmp.eq.f32.partialorder %v519_v6, %v2982_v49  ;;  %vm527_vm0 = vcmp.gt.f32.partialorder %v523_v8, %v2984_v50 }
 0x18a   : > { %v4983_v14 = vsel %vm3114_vm1, 4294967295, %v4982_v14  ;;  %vm3122_vm8 = vmor %vm448_vm10, %vm3029_vm12  ;;  %vm4989_vm12 = vcmp.gt.f32.partialorder %v445_v55, %v2984_v50  ;;  %vm526_vm1 = vcmp.gt.f32.partialorder %v519_v6, %v2982_v49  ;;  %v642_v6 = vrot.slane %v2982_v49, %v633_v40 }
 0x18b   : > { %v4985_v15 = vsel %vm3122_vm8, 4294967295, %v4984_v15  ;;  %vm3130_vm11 = vmor %vm4986_vm2, %vm3059_vm5  ;;  %vm4992_vm5 = vcmp.gt.f32.partialorder %v478_v58, %v2982_v49  ;;  %vm531_vm2 = vcmp.eq.f32.partialorder %v523_v8, %v2984_v50  ;;  %vm525_vm8 = vcmp.gt.f32.partialorder %v515_v4, %v2980_v48 }
 0x18c   : > { %v4988_v16 = vsel %vm3130_vm11, 4294967295, %v4987_v16  ;;  %vm3142_vm7 = vmor %vm4989_vm12, %vm3036_vm14  ;;  %vm4999_vm14 = vcmp.gt.f32.partialorder %v482_v61, %v2984_v50  ;;  %vm524_vm12 = vcmp.gt.f32.partialorder %v511_v1, %v2975_v46 }
 0x18d   : > { %v4991_v19 = vsel %vm3142_vm7, 4294967295, %v4990_v19  ;;  %vm3150_vm10 = vmor %vm4992_vm5, %vm3071_vm4  ;;  %vm571_vm7 = vcmp.eq.f32.partialorder %v560_v17, %v2982_v49 }
 0x18e   : > { %v4994_v20 = vsel %vm3150_vm10, 4294967295, %v4993_v20  ;;  %vm3159_vm11 = vmand %vm4996_vm3, %vm4995_vm15  ;;  %vm5003_vm3 = vcmp.eq.f32.partialorder %v515_v4, %v2980_v48  ;;  %vm569_vm10 = vcmp.eq.f32.partialorder %v552_v10, %v2975_v46 }
 0x18f   : > { %vm3169_vm4 = vmor %vm4999_vm14, %vm3083_vm6 }
 0x190   : > { %v5001_v23 = vsel %vm3169_vm4, 4294967295, %v5000_v23  ;;  %vm5002_vm5 = vmmov %vm4995_vm15  ;;  %vm570_vm4 = vcmp.eq.f32.partialorder %v556_v13, %v2980_v48 }
 0x191   : > { %vm3178_vm15 = vmand %vm5003_vm3, %vm5002_vm5 }
 0x192   : > { %vm5006_vm6 = vmmov %vm5002_vm5 }
 0x193   : > { %vm3187_vm14 = vmand %vm530_vm9, %vm5006_vm6  ;;  %vm572_vm6 = vcmp.eq.f32.partialorder %v564_v22, %v2984_v50 }
 0x194   : > { %vm3195_vm3 = vmand %vm531_vm2, %vm5002_vm5 }
 0x195   : > { %vm3204_vm9 = vmor %vm524_vm12, %vm3159_vm11  ;;  %vm565_vm11 = vcmp.gt.f32.partialorder %v552_v10, %v2975_v46 }
 0x196   : > { %v5012_v28 = vsel %vm3204_vm9, 4294967295, %v5011_v28  ;;  %vm3211_vm2 = vmand %vm569_vm10, %vm5013_vm13 }
 0x197   : > { %vm3218_vm5 = vmor %vm525_vm8, %vm3178_vm15  ;;  %vm566_vm8 = vcmp.gt.f32.partialorder %v556_v13, %v2980_v48  ;;  %v674_v13 = vsub.s32 6, %v2973_v44 }
 0x198   : > { %vm5018_vm12 = vmmov %vm5013_vm13 }
 0x199   : > { %vm3225_vm9 = vmand %vm570_vm4, %vm5018_vm12  ;;  %v679_v31 = vrot.slane %v2980_v48, %v674_v13  ;;  %v683_v35 = vrot.slane %v2982_v49, %v674_v13  ;;  %v687_v40 = vrot.slane %v2984_v50, %v674_v13 }
 0x19a   : > { %vm3232_vm13 = vmor %vm526_vm1, %vm3187_vm14  ;;  %vm567_vm1 = vcmp.gt.f32.partialorder %v560_v17, %v2982_v49 }
 0x19b   : > { %v5022_v34 = vsel %vm3232_vm13, 4294967295, %v5021_v34  ;;  %vm5023_vm10 = vmmov %vm5018_vm12  ;;  %vm568_vm13 = vcmp.gt.f32.partialorder %v564_v22, %v2984_v50 }
 0x19c   : > { %vm3239_vm15 = vmand %vm571_vm7, %vm5023_vm10 }
 0x19d   : > { %vm3246_vm4 = vmor %vm527_vm0, %vm3195_vm3  ;;  %vm5038_vm3 = vnez %v4985_v15 }
 0x19e   : > { %vm5028_vm14 = vmmov %vm5023_vm10  ;;  %vm614_vm10 = vcmp.gt.s32.totalorder %v2973_v44, 4  ;;  %v465_v53 = vsel %vm5038_vm3, 1, %v2852_v37  ;;  %vm5045_vm3 = vnez %v4991_v19 }
 0x19f   : > { %vm3253_vm12 = vmand %vm572_vm6, %vm5028_vm14  ;;  %vm5033_vm6 = vnez %v4978_v11  ;;  %vm5034_vm14 = vnez %v4981_v12  ;;  %v466_v57 = vsel %vm5045_vm3, 1, %v2852_v37  ;;  %vm5052_vm3 = vnez %v5001_v23 }
 0x1a0   : > { %vm3263_vm0 = vmor %vm565_vm11, %vm3211_vm2  ;;  %v463_v42 = vsel %vm5033_vm6, 1, %v2852_v37  ;;  %v500_v43 = vsel %vm5034_vm14, 1, %v2852_v37  ;;  %vm612_vm2 = vcmp.eq.f32.partialorder %v601_v33, %v2982_v49  ;;  %vm5037_vm11 = vnez %v4983_v14 }
 0x1a1   : > { %vm3276_vm7 = vmor %vm566_vm8, %vm3225_vm9  ;;  %v464_v51 = vsel %vm5037_vm11, 1, %v2852_v37  ;;  %vm5039_vm6 = vnez %v4988_v16  ;;  %vm5042_vm14 = vcmp.eq.f32.partialorder %v593_v27, %v2975_v46  ;;  %v503_v63 = vsel %vm5052_vm3, 1, %v2852_v37 }
 0x1a2   : > { %v501_v54 = vsel %vm5039_vm6, 1, %v2852_v37  ;;  %vm3294_vm9 = vmor %vm567_vm1, %vm3239_vm15  ;;  %vm5046_vm15 = vnez %v4994_v20  ;;  %vm606_vm6 = vcmp.gt.f32.partialorder %v593_v27, %v2975_v46  ;;  %v504_v0 = vadd.s32 %v500_v43, %v463_v42 }
 0x1a3   : > { %vm3303_vm11 = vmand %vm5042_vm14, %vm614_vm10  ;;  %v502_v58 = vsel %vm5046_vm15, 1, %v2852_v37  ;;  %vm5049_vm14 = vcmp.eq.f32.partialorder %v597_v30, %v2980_v48  ;;  %v505_v4 = vadd.s32 %v501_v54, %v464_v51  ;;  %vm655_vm15 = vcmp.gt.s32.totalorder %v2973_v44, 5 }
 0x1a4   : > { %vm3317_vm1 = vmor %vm568_vm13, %vm3253_vm12  ;;  %vm607_vm13 = vcmp.gt.f32.partialorder %v597_v30, %v2980_v48  ;;  %v506_v7 = vadd.s32 %v502_v58, %v465_v53  ;;  %v507_v10 = vadd.s32 %v503_v63, %v466_v57  ;;  %v542_v14 = vsel %vm3218_vm5, 1, %v2852_v37 }
 0x1a5   : > { %v5048_v60 = vsel %vm3317_vm1, 4294967295, %v5047_v60  ;;  %vm3326_vm8 = vmand %vm5049_vm14, %vm614_vm10  ;;  %vm5055_vm14 = vcmp.eq.f32.partialorder %v605_v36, %v2984_v50  ;;  %v546_v18 = vadd.s32 %v542_v14, %v505_v4  ;;  %v544_v20 = vsel %vm3246_vm4, 1, %v2852_v37 }
 0x1a6   : > { %vm3339_vm12 = vmand %vm612_vm2, %vm614_vm10  ;;  %vm609_vm2 = vcmp.gt.f32.partialorder %v605_v36, %v2984_v50  ;;  %v3409_v23 = vsub.s32 7, %v2973_v44  ;;  %v548_v24 = vadd.s32 %v544_v20, %v507_v10  ;;  %v582_v25 = vsel %vm3263_vm0, 1, %v2852_v37 }
 0x1a7   : > { %vm3349_vm3 = vmand %vm5055_vm14, %vm614_vm10  ;;  %vm5060_vm10 = vnez %v5012_v28  ;;  %v675_v27 = vrot.slane %v2975_v46, %v674_v13  ;;  %v583_v28 = vsel %vm3276_vm7, 1, %v2852_v37  ;;  %v584_v32 = vsel %vm3294_vm9, 1, %v2852_v37 }
 0x1a8   : > { %vm3357_vm1 = vmor %vm606_vm6, %vm3303_vm11  ;;  %v541_v11 = vsel %vm5060_vm10, 1, %v2852_v37  ;;  %vm651_vm11 = vcmp.eq.f32.partialorder %v634_v62, %v2975_v46  ;;  %vm5063_vm6 = vcmp.gt.f32.partialorder %v601_v33, %v2982_v49  ;;  %v587_v33 = vadd.s32 %v583_v28, %v546_v18 }
 0x1a9   : > { %vm3368_vm14 = vmor %vm607_vm13, %vm3326_vm8  ;;  %v545_v15 = vadd.s32 %v541_v11, %v504_v0  ;;  %vm652_vm8 = vcmp.eq.f32.partialorder %v638_v3, %v2980_v48  ;;  %vm5066_vm13 = vnez %v5022_v34  ;;  %vm650_vm9 = vcmp.gt.f32.partialorder %v646_v9, %v2984_v50 }
 0x1aa   : > { %vm3381_vm10 = vmor %vm5063_vm6, %vm3339_vm12  ;;  %v543_v17 = vsel %vm5066_vm13, 1, %v2852_v37  ;;  %vm653_vm12 = vcmp.eq.f32.partialorder %v642_v6, %v2982_v49  ;;  %vm654_vm6 = vcmp.eq.f32.partialorder %v646_v9, %v2984_v50  ;;  %v623_v42 = vsel %vm3357_vm1, 1, %v2852_v37 }
 0x1ab   : > { %vm3393_vm5 = vmor %vm609_vm2, %vm3349_vm3  ;;  %v547_v21 = vadd.s32 %v543_v17, %v506_v7  ;;  %vm647_vm3 = vcmp.gt.f32.partialorder %v634_v62, %v2975_v46  ;;  %v586_v29 = vadd.s32 %v582_v25, %v545_v15  ;;  %vm648_vm2 = vcmp.gt.f32.partialorder %v638_v3, %v2980_v48 }
 0x1ac   : > { %vm3404_vm13 = vmand %vm651_vm11, %vm655_vm15  ;;  %vm649_vm11 = vcmp.gt.f32.partialorder %v642_v6, %v2982_v49  ;;  %v624_v45 = vsel %vm3368_vm14, 1, %v2852_v37  ;;  %v625_v54 = vsel %vm3381_vm10, 1, %v2852_v37  ;;  %vm694_vm14 = vcmp.eq.f32.partialorder %v683_v35, %v2982_v49 }
 0x1ad   : > { %vm3417_vm4 = vmand %vm652_vm8, %vm655_vm15  ;;  %vm5077_vm8 = vnez %v5048_v60  ;;  %v588_v38 = vadd.s32 %v584_v32, %v547_v21  ;;  %v627_v51 = vadd.s32 %v623_v42, %v586_v29  ;;  %v628_v55 = vadd.s32 %v624_v45, %v587_v33 }
 0x1ae   : > { %vm3428_vm0 = vmand %vm653_vm12, %vm655_vm15  ;;  %v585_v36 = vsel %vm5077_vm8, 1, %v2852_v37  ;;  %v626_v57 = vsel %vm3393_vm5, 1, %v2852_v37  ;;  %v716_v61 = vrot.slane %v2975_v46, %v3409_v23  ;;  %vm688_vm10 = vcmp.gt.f32.partialorder %v675_v27, %v2975_v46 }
 0x1af   : > { %vm3441_vm7 = vmand %vm654_vm6, %vm655_vm15  ;;  %v589_v41 = vadd.s32 %v585_v36, %v548_v24  ;;  %vm692_vm6 = vcmp.eq.f32.partialorder %v675_v27, %v2975_v46  ;;  %v629_v58 = vadd.s32 %v625_v54, %v588_v38  ;;  %v720_v1 = vrot.slane %v2980_v48, %v3409_v23 }
 0x1b0   : > { %vm3454_vm12 = vmor %vm647_vm3, %vm3404_vm13  ;;  %vm696_vm13 = vcmp.gt.s32.totalorder %v2973_v44, 6  ;;  %vm693_vm3 = vcmp.eq.f32.partialorder %v679_v31, %v2980_v48  ;;  %v724_v6 = vrot.slane %v2982_v49, %v3409_v23  ;;  %vm690_vm8 = vcmp.gt.f32.partialorder %v683_v35, %v2982_v49 }
 0x1b1   : > { %vm3466_vm15 = vmor %vm648_vm2, %vm3417_vm4  ;;  %vm695_vm2 = vcmp.eq.f32.partialorder %v687_v40, %v2984_v50  ;;  %v630_v62 = vadd.s32 %v626_v57, %v589_v41  ;;  %v664_v63 = vsel %vm3454_vm12, 1, %v2852_v37  ;;  %v728_v10 = vrot.slane %v2984_v50, %v3409_v23 }
 0x1b2   : > { %vm3479_vm1 = vmor %vm649_vm11, %vm3428_vm0  ;;  %v665_v3 = vsel %vm3466_vm15, 1, %v2852_v37  ;;  %v668_v4 = vadd.s32 %v664_v63, %v627_v51  ;;  %vm689_vm11 = vcmp.gt.f32.partialorder %v679_v31, %v2980_v48  ;;  %vm691_vm12 = vcmp.gt.f32.partialorder %v687_v40, %v2984_v50 }
 0x1b3   : > { %vm3489_vm4 = vmor %vm650_vm9, %vm3441_vm7  ;;  %v666_v7 = vsel %vm3479_vm1, 1, %v2852_v37  ;;  %v669_v8 = vadd.s32 %v665_v3, %v628_v55  ;;  %vm730_vm1 = vcmp.gt.f32.partialorder %v720_v1, %v2980_v48 }
 0x1b4   : > { %vm3500_vm0 = vmand %vm692_vm6, %vm696_vm13  ;;  %v667_v11 = vsel %vm3489_vm4, 1, %v2852_v37  ;;  %v670_v12 = vadd.s32 %v666_v7, %v629_v58  ;;  %vm729_vm6 = vcmp.gt.f32.partialorder %v716_v61, %v2975_v46  ;;  %vm731_vm4 = vcmp.gt.f32.partialorder %v724_v6, %v2982_v49 }
 0x1b5   : > { %vm3512_vm5 = vmand %vm693_vm3, %vm696_vm13  ;;  %v671_v44 = vadd.s32 %v667_v11, %v630_v62  ;;  %v746_v18 = vsel %vm729_vm6, 1, %v2852_v37  ;;  %v747_v21 = vsel %vm730_vm1, 1, %v2852_v37  ;;  %v748_v24 = vsel %vm731_vm4, 1, %v2852_v37 }
 0x1b6   : > { %vm3524_vm7 = vmand %vm694_vm14, %vm696_vm13 }
 0x1b7   : > { %vm3538_vm9 = vmand %vm695_vm2, %vm696_vm13  ;;  %vm732_vm2 = vcmp.gt.f32.partialorder %v728_v10, %v2984_v50 }
 0x1b8   : > { %vm701_vm15 = vmor %vm688_vm10, %vm3500_vm0  ;;  %v749_v26 = vsel %vm732_vm2, 1, %v2852_v37 }
 0x1b9   : > { %vm702_vm13 = vmor %vm689_vm11, %vm3512_vm5  ;;  %v705_v13 = vsel %vm701_vm15, 1, %v2852_v37 }
 0x1ba   : > { %vm703_vm3 = vmor %vm690_vm8, %vm3524_vm7  ;;  %v706_v14 = vsel %vm702_vm13, 1, %v2852_v37  ;;  %v709_v15 = vadd.s32 %v705_v13, %v668_v4  ;;  %vm5094_vm7 = vcmask 1040384  }
 0x1bb   : > { %vm704_vm14 = vmor %vm691_vm12, %vm3538_vm9  ;;  %v707_v16 = vsel %vm703_vm3, 1, %v2852_v37  ;;  %v710_v17 = vadd.s32 %v706_v14, %v669_v8 }
 0x1bc   : > { %v708_v19 = vsel %vm704_vm14, 1, %v2852_v37  ;;  %v711_v20 = vadd.s32 %v707_v16, %v670_v12  ;;  %v750_v22 = vadd.s32 %v746_v18, %v709_v15  ;;  %vm5095_vm8 = vmmov %vm5094_vm7 }
 0x1bd   : > { %v712_v23 = vadd.s32 %v708_v19, %v671_v44  ;;  %v751_v25 = vadd.s32 %v747_v21, %v710_v17  ;;  %vm5096_vm9 = vmmov %vm5094_vm7 }
 0x1be   : > { %v752_v27 = vadd.s32 %v748_v24, %v711_v20  ;;  %vm754_vm0 = vcmp.lt.s32.totalorder %v750_v22, 4  ;;  %vm5097_vm12 = vmmov %vm5094_vm7  ;;  %v829_v24 = vstv %s2681_s16 }
 0x1bf   : > { %v753_v28 = vadd.s32 %v749_v26, %v712_v23  ;;  %vm755_vm10 = vcmp.lt.s32.totalorder %v751_v25, 4  ;;  %v758_v29 = vsel %vm754_vm0, %v2975_v46, 0.0  ;;  %vm5098_vm15 = vmmov %vm5094_vm7 }
 0x1c0   : > { %vm756_vm5 = vcmp.lt.s32.totalorder %v752_v27, 4  ;;  %v759_v30 = vsel %vm755_vm10, %v2980_v48, 0.0  ;;  %v762_v31 = vrot.slane %v758_v29, 4  ;;  %v790_v48 = vld [vmem:[%s4943_s5] sm:$0xf]  ;;  %vm5099_vm6 = vmmov %vm5094_vm7 }
 0x1c1   : > { %vm757_vm11 = vcmp.lt.s32.totalorder %v753_v28, 4  ;;  %v760_v32 = vsel %vm756_vm5, %v2982_v49, 0.0  ;;  %v768_v33 = vrot.slane %v759_v30, 4  ;;  %v795_v57 = vrot.slane %v790_v48, %v2978_v47  ;;  %vm5100_vm13 = vmmov %vm5099_vm6 }
 0x1c2   : > { %v761_v34 = vsel %vm757_vm11, %v2984_v50, 0.0  ;;  %v763_v35 = vadd.f32 %v762_v31, %v758_v29  ;;  %v774_v36 = vrot.slane %v760_v32, 4  ;;  %v799_v61 = vrot.slane %v790_v48, %v2989_v52  ;;  %vm5101_vm1 = vmmov %vm5099_vm6 }
 0x1c3   : > { %v769_v38 = vadd.f32 %v768_v33, %v759_v30  ;;  %v780_v37 = vrot.slane %v761_v34, 4  ;;  %v803_v0 = vrot.slane %v790_v48, %v3008_v59  ;;  %v807_v4 = vrot.slane %v790_v48, %v3044_v2 }
 0x1c4   : > { %v764_v39 = vrot.slane %v763_v35, 2  ;;  %v775_v40 = vadd.f32 %v774_v36, %v760_v32 }
 0x1c5   : > { %v770_v41 = vrot.slane %v769_v38, 2  ;;  %v781_v42 = vadd.f32 %v780_v37, %v761_v34 }
 0x1c6   : > { %v765_v43 = vadd.f32 %v764_v39, %v763_v35  ;;  %v776_v46 = vrot.slane %v775_v40, 2  ;;  %v833_v39 = vstv %s831_s17 }
 0x1c7   : > { %v771_v45 = vadd.f32 %v770_v41, %v769_v38  ;;  %v782_v51 = vrot.slane %v781_v42, 2 }
 0x1c8   : > { %v766_v49 = vrot.slane %v765_v43, 1  ;;  %v777_v53 = vadd.f32 %v776_v46, %v775_v40  ;;  %v861_v40 = vstv %s2682_s18 }
 0x1c9   : > { %v772_v54 = vrot.slane %v771_v45, 1  ;;  %v783_v50 = vadd.f32 %v782_v51, %v781_v42 }
 0x1ca   : > { %v767_v55 = vadd.f32 %v766_v49, %v765_v43  ;;  %v778_v56 = vrot.slane %v777_v53, 1 }
 0x1cb   : > { %v773_v58 = vadd.f32 %v772_v54, %v771_v45  ;;  %v784_v60 = vrot.slane %v783_v50, 1 }
 0x1cc   : > { %v779_v62 = vadd.f32 %v778_v56, %v777_v53  ;;  %v786_v63 = vmul.f32 0.25, %v767_v55 }
 0x1cd   : > { %v785_v1 = vadd.f32 %v784_v60, %v783_v50  ;;  %v787_v3 = vmul.f32 0.25, %v773_v58 }
 0x1ce   : > { %v788_v5 = vmul.f32 0.25, %v779_v62  ;;  %v812_v6 = vmul.f32 %v795_v57, %v786_v63 }
 0x1cf   : > { %v789_v7 = vmul.f32 0.25, %v785_v1  ;;  %v813_v8 = vmul.f32 %v799_v61, %v787_v3 }
 0x1d0   : > { %v814_v9 = vmul.f32 %v803_v0, %v788_v5  ;;  %v845_v10 = vmul.f32 0.0, %v812_v6  ;;  %v820_v47 = vsel %vm5094_vm7, %v812_v6, 0.0 }
 0x1d1   : > { %v815_v11 = vmul.f32 %v807_v4, %v789_v7  ;;  %v846_v12 = vmul.f32 0.0, %v813_v8  ;;  %v821_v52 = vsel %vm5095_vm8, %v813_v8, 0.0 }
 0x1d2   : > { %v849_v44 = vsel %vm5096_vm9, %v845_v10, 0.0  ;;  %v818_v13 = vmul.f32 0.0, %v814_v9  ;;  %v822_v15 = vadd.f32 %v821_v52, %v820_v47  ;;  %v852_v17 = vsel %vm5099_vm6, %v814_v9, 0.0 }
 0x1d3   : > { %v850_v59 = vsel %vm5097_vm12, %v846_v12, 0.0  ;;  %v819_v14 = vmul.f32 0.0, %v815_v11  ;;  %v854_v21 = vsel %vm5101_vm1, %v815_v11, 0.0 }
 0x1d4   : > { %v851_v2 = vadd.f32 %v850_v59, %v849_v44  ;;  %v823_v16 = vsel %vm5098_vm15, %v818_v13, 0.0 }
 0x1d5   : > { %v824_v18 = vadd.f32 %v823_v16, %v822_v15  ;;  %v825_v20 = vsel %vm5100_vm13, %v819_v14, 0.0 }
 0x1d6   : > { %v853_v19 = vadd.f32 %v852_v17, %v851_v2 }
 0x1d7   : > { %v826_v22 = vadd.f32 %v825_v20, %v824_v18 }
 0x1d8   : > { %v855_v23 = vadd.f32 %v854_v21, %v853_v19 }
 0x1d9   : > { %827 = vadd.xlane.f32.xlu0 %v826_v22 }
 0x1da   : > { %856 = vadd.xlane.f32.xlu1 %v855_v23 }
 0x266   : > { %v828_v25 = vpop.xlane.xlu0 %827 }
 0x267   : > { %v857_v26 = vpop.xlane.xlu1 %856  ;;  %v830_v27 = vadd.f32 %v829_v24, %v828_v25 }
 0x268   : > { %v858_v28 = vadd.f32 %v857_v26, %v829_v24 }
 0x269   : > { %v836_v29 = vand.u32 2147483647, %v830_v27  ;;  %v832_v41 = vmax.f32 %v830_v27, 0.0  ;;  %v834_v42 = vmul.f32 %v833_v39, %v830_v27 }
 0x26a   : > { %v864_v30 = vand.u32 2147483647, %v858_v28  ;;  %v860_v43 = vmax.f32 %v858_v28, 0.0  ;;  %v862_v46 = vmul.f32 %v861_v40, %v858_v28 }
 0x26b   : > { %v837_v31 = vsub.f32 0.0, %v836_v29  ;;  %v835_v48 = vsub.f32 %v832_v41, %v834_v42 }
 0x26c   : > { %v865_v32 = vsub.f32 0.0, %v864_v30  ;;  %v863_v53 = vsub.f32 %v860_v43, %v862_v46 }
 0x26d   : > { %v838_v33 = vmul.f32 1.442695, %v837_v31 }
 0x26e   : > { %v866_v34 = vmul.f32 1.442695, %v865_v32 }
 0x26f   : > { %2741 = vpow2.f32 %v838_v33 }
 0x270   : > { %2743 = vpow2.f32 %v866_v34 }
 0x279   : > { %v2742_v35 = vpop.eup %2741 }
 0x27a   : > { %v2744_v36 = vpop.eup %2743  ;;  %v840_v38 = vadd.f32 1.0, %v2742_v35 }
 0x27b   : > { %v868_v37 = vadd.f32 1.0, %v2744_v36 }
 0x27c   : > { %2745 = vlog2.f32 %v840_v38 }
 0x27d   : > { %2747 = vlog2.f32 %v868_v37 }
 0x286   : > { %v2746_v45 = vpop.eup %2745 }
 0x287   : > { %v2748_v51 = vpop.eup %2747  ;;  %v842_v49 = vmul.f32 0.6931472, %v2746_v45 }
 0x288   : > { %v870_v54 = vmul.f32 0.6931472, %v2748_v51 }
 0x289   : > { %v843_v50 = vadd.f32 %v842_v49, %v835_v48 }
 0x28a   : > { %v871_v55 = vadd.f32 %v870_v54, %v863_v53 }
 0x28c   : > { %v872_v56 = vadd.f32 %v871_v55, %v843_v50 }
 0x28e   : > { %v873_v57 = vmul.f32 0.5, %v872_v56 }
 0x290   : > { %874 = vst [vmem:[%s2955_s22] sm:$0x1] %v873_v57 }
 0x291 PF: > { %p2683_p6 = scmp.ne.s32.totalorder %s2910_s28, 1 }
 0x292   : > { %v885_v58 = vlaneseq (!%p2683_p6)  ;;  %v3595_v61 = vld [vmem:[%s4941_s3 + $0x8] sm:$0xff] (!%p2683_p6)  ;;  %v3600_v62 = vld [vmem:[%s4941_s3] sm:$0xff] (!%p2683_p6)  ;;  %v2853_v63 = vmov (!%p2683_p6), 0.0   ;;  %v2854_v7 = vmov (!%p2683_p6), 1   ;;  %v2855_v8 = vmov (!%p2683_p6), 0   ;;  %s2685_s24 = sld [smem:[#allocation2 + $0x5]] (!%p2683_p6) }
 0x293   : > { %878 = sbr.rel (%p2683_p6) target bundleno = 1238 (0x4d6), region = 68  ;;  %2750 = vset.pattern.permute.xlu1 (!%p2683_p6), %v2854_v7  ;;  %2749 = vset.pattern.permute.xlu0 (!%p2683_p6), %v2855_v8  ;;  %s2684_s25 = sld [smem:[#allocation2 + $0x4]] (!%p2683_p6)  ;;  %vm911_vm14 = vcmask (!%p2683_p6), 7168   ;;  %vm923_vm2 = vcmask (!%p2683_p6), 1046528   ;;  %vm4950_vm0 = vcmask (!%p2683_p6), 1040384  }
 0x294   : > { %v886_v60 = vand.u32 (!%p2683_p6), 127, %v885_v58  ;;  %s2686_s26 = sld [smem:[#allocation2 + $0x6]] (!%p2683_p6)  ;;  %v3619_v45 = vshrl.u32 (!%p2683_p6), %v885_v58, 7  ;;  %s2687_s9 = sld [smem:[#allocation2 + $0x7]] (!%p2683_p6) }
 0x295   : > { %s2688_s10 = sld [smem:[#allocation4 + $0x1]] (!%p2683_p6)  ;;  %s1290_s11 = sld [smem:[#allocation4]] (!%p2683_p6) }
 0x296   : > { %vm888_vm3 = vcmp.lt.s32.totalorder (!%p2683_p6), %v886_v60, 64  ;;  %vm891_vm4 = vcmp.ge.s32.totalorder (!%p2683_p6), %v886_v60, 64  ;;  %v986_v50 = vsub.s32 (!%p2683_p6), 0, %v3619_v45  ;;  %v1002_v55 = vsub.s32 (!%p2683_p6), 1, %v3619_v45 }
 0x297   : > { %v3602_v0 = vsel (!%p2683_p6), %vm888_vm3, 1.0, %v2853_v63  ;;  %v3604_v1 = vsel (!%p2683_p6), %vm891_vm4, 1.0, %v2853_v63  ;;  %v1020_v56 = vsub.s32 (!%p2683_p6), 2, %v3619_v45  ;;  %v1038_v58 = vsub.s32 (!%p2683_p6), 3, %v3619_v45 }
 0x298   : > { %v896_v3 = vmul.f32 (!%p2683_p6), %v3602_v0, %v3595_v61  ;;  %v895_v4 = vmul.f32 (!%p2683_p6), %v3602_v0, %v3600_v62  ;;  %v904_v5 = vmul.f32 (!%p2683_p6), %v3604_v1, %v3595_v61  ;;  %v903_v6 = vmul.f32 (!%p2683_p6), %v3604_v1, %v3600_v62 }
 0x299   : > { %v933_v59 = vstv (!%p2683_p6), %s2685_s24  ;;  %v930_v17 = vstv (!%p2683_p6), %s2684_s25  ;;  %vm992_vm10 = vcmp.gt.s32.totalorder (!%p2683_p6), %v3619_v45, 0  ;;  %vm1008_vm5 = vcmp.gt.s32.totalorder (!%p2683_p6), %v3619_v45, 1 }
 0x29a   : > { %899 = vadd.xlane.f32.xlu1 %v896_v3  ;;  %897 = vadd.xlane.f32.xlu0 %v895_v4  ;;  %v938_v19 = vstv %s2686_s26  ;;  %vm1026_vm15 = vcmp.gt.s32.totalorder %v3619_v45, 2 }
 0x29e   : > { %907 = vadd.xlane.f32.xlu1 %v904_v5  ;;  %905 = vadd.xlane.f32.xlu0 %v903_v6 }
 0x327   : > { %v900_v9 = vpop.xlane.xlu1 %899  ;;  %v898_v10 = vpop.xlane.xlu0 %897 }
 0x328   : > { %v902_v12 = vmul.f32 0.015625, %v900_v9  ;;  %v901_v52 = vmul.f32 0.015625, %v898_v10  ;;  %v1056_v9 = vsub.s32 4, %v3619_v45 }
 0x32b   : > { %v908_v47 = vpop.xlane.xlu1 %907  ;;  %v906_v11 = vpop.xlane.xlu0 %905 }
 0x32c   : > { %v910_v44 = vmul.f32 0.015625, %v908_v47  ;;  %v909_v13 = vmul.f32 0.015625, %v906_v11  ;;  %v1074_v47 = vsub.s32 5, %v3619_v45 }
 0x32e   : > { %v913_v14 = vsel %vm911_vm14, %v902_v12, %v910_v44  ;;  %v912_v15 = vsel %vm911_vm14, %v901_v52, %v909_v13  ;;  %v3661_v12 = vadd.s32 8, %v3619_v45 }
 0x32f   : > { %v918_v2 = vrot.slane %v913_v14, 7  ;;  %v925_v16 = vrot.slane %v913_v14, 1  ;;  %v917_v18 = vrot.slane %v912_v15, 7  ;;  %v924_v20 = vrot.slane %v912_v15, 1 }
 0x330   : > { %v935_v22 = vmul.f32 %v933_v59, %v913_v14  ;;  %v934_v28 = vmul.f32 %v933_v59, %v912_v15 }
 0x331   : > { %v929_v21 = vsel %vm923_vm2, %v925_v16, 0.0  ;;  %v919_v23 = vsel %vm4950_vm0, %v917_v18, %v918_v2  ;;  %v922_v24 = vsel %vm4950_vm0, 0.0, %v917_v18  ;;  %v926_v25 = vsel %vm923_vm2, %v924_v20, %v925_v16 }
 0x332   : > { %v931_v26 = vmul.f32 %v930_v17, %v922_v24  ;;  %v932_v27 = vmul.f32 %v930_v17, %v919_v23  ;;  %v940_v29 = vmul.f32 %v938_v19, %v929_v21  ;;  %v939_v32 = vmul.f32 %v938_v19, %v926_v25 }
 0x333   : > { %vm1044_vm2 = vcmp.gt.s32.totalorder %v3619_v45, 3  ;;  %v1110_v17 = vsub.s32 7, %v3619_v45 }
 0x334   : > { %v936_v30 = vadd.f32 %v934_v28, %v931_v26  ;;  %v937_v31 = vadd.f32 %v935_v22, %v932_v27 }
 0x336   : > { %v941_v33 = vadd.f32 %v939_v32, %v936_v30  ;;  %v942_v34 = vadd.f32 %v940_v29, %v937_v31 }
 0x338   : > { %v943_v35 = vsub.f32 0.0, %v941_v33  ;;  %v944_v36 = vsub.f32 0.0, %v942_v34 }
 0x33a   : > { %v945_v38 = vmul.f32 1.442695, %v943_v35  ;;  %v947_v37 = vmul.f32 1.442695, %v944_v36 }
 0x33c   : > { %2754 = vpow2.f32 %v945_v38 }
 0x33d   : > { %2756 = vpow2.f32 %v947_v37 }
 0x346   : > { %v2755_v39 = vpop.eup %2754 }
 0x347   : > { %v2757_v40 = vpop.eup %2756  ;;  %v949_v41 = vadd.f32 1.0, %v2755_v39 }
 0x348   : > { %v950_v42 = vadd.f32 1.0, %v2757_v40 }
 0x349   : > { %2758 = vrcp.f32 %v949_v41 }
 0x34a   : > { %2760 = vrcp.f32 %v950_v42 }
 0x353   : > { %v2759_v43 = vpop.eup %2758 }
 0x354   : > { %968 = vperm.xlu1 %2750, %v2759_v43   ;;  %957 = vperm.xlu0 %2749, %v2759_v43   ;;  %v2761_v46 = vpop.eup %2760 }
 0x358   : > { %2751 = vset.pattern.permute.xlu1 %v2855_v8  ;;  %2753 = vset.pattern.permute.xlu0 %v2854_v7 }
 0x359   : > { %962 = vperm.xlu1 %2751, %v2761_v46  }
 0x35d   : > { %2752 = vset.pattern.permute.xlu1 %v2854_v7 }
 0x35e   : > { %972 = vperm.xlu1 %2752, %v2761_v46  }
 0x3d3   : > { %v969_v51 = vpop.permute.xlu1 %968  ;;  %v958_v48 = vpop.permute.xlu0 %957 }
 0x3d4   : > { %v975_v49 = vmul.f32 %v969_v51, %v3604_v1  ;;  %v965_v53 = vmul.f32 %v958_v48, %v3602_v0 }
 0x3d6   : > { %v977_v54 = vadd.f32 %v975_v49, %v965_v53 }
 0x3d8   : > { %v3627_v57 = vmul.f32 %v977_v54, %v3600_v62  ;;  %v963_v60 = vpop.permute.xlu1 %962 }
 0x3d9   : > { %v966_v6 = vmul.f32 %v963_v60, %v3602_v0 }
 0x3da   : > { %v987_v63 = vrot.slane %v3627_v57, %v986_v50  ;;  %v1003_v3 = vrot.slane %v3627_v57, %v1002_v55  ;;  %v1021_v4 = vrot.slane %v3627_v57, %v1020_v56  ;;  %v1039_v62 = vrot.slane %v3627_v57, %v1038_v58 }
 0x3db   : > { %v1057_v59 = vrot.slane %v3627_v57, %v1056_v9  ;;  %v1075_v15 = vrot.slane %v3627_v57, %v1074_v47  ;;  %v1111_v25 = vrot.slane %v3627_v57, %v1110_v17 }
 0x3dc   : > { %vm988_vm11 = vcmp.gt.f32.partialorder %v987_v63, %v3627_v57  ;;  %vm990_vm7 = vcmp.eq.f32.partialorder %v987_v63, %v3627_v57  ;;  %vm1006_vm8 = vcmp.eq.f32.partialorder %v1003_v3, %v3627_v57  ;;  %vm1004_vm12 = vcmp.gt.f32.partialorder %v1003_v3, %v3627_v57 }
 0x3dd   : > { %v973_v5 = vpop.permute.xlu1 %972  ;;  %vm994_vm9 = vmand %vm990_vm7, %vm992_vm10  ;;  %vm1024_vm13 = vcmp.eq.f32.partialorder %v1021_v4, %v3627_v57  ;;  %vm1022_vm3 = vcmp.gt.f32.partialorder %v1021_v4, %v3627_v57  ;;  %vm1042_vm14 = vcmp.eq.f32.partialorder %v1039_v62, %v3627_v57  ;;  %vm1062_vm7 = vcmp.gt.s32.totalorder %v3619_v45, 4 }
 0x3de   : > { %v976_v7 = vmul.f32 %v973_v5, %v3604_v1  ;;  %vm996_vm6 = vmor %vm988_vm11, %vm994_vm9  ;;  %vm1080_vm9 = vcmp.gt.s32.totalorder %v3619_v45, 5  ;;  %vm1060_vm0 = vcmp.eq.f32.partialorder %v1057_v59, %v3627_v57 }
 0x3df   : > { %v998_v10 = vsel %vm996_vm6, 1, %v2855_v8  ;;  %vm1010_vm1 = vmand %vm1006_vm8, %vm1008_vm5  ;;  %vm1040_vm5 = vcmp.gt.f32.partialorder %v1039_v62, %v3627_v57 }
 0x3e0   : > { %v978_v11 = vadd.f32 %v976_v7, %v966_v6  ;;  %vm1012_vm4 = vmor %vm1004_vm12, %vm1010_vm1 }
 0x3e1   : > { %v1014_v52 = vsel %vm1012_vm4, 1, %v2855_v8  ;;  %vm1028_vm10 = vmand %vm1024_vm13, %vm1026_vm15 }
 0x3e2   : > { %v3668_v44 = vmul.f32 %v978_v11, %v3595_v61  ;;  %v1016_v13 = vadd.s32 %v1014_v52, %v998_v10  ;;  %vm1030_vm11 = vmor %vm1022_vm3, %vm1028_vm10  ;;  %v1092_v61 = vsub.s32 6, %v3619_v45 }
 0x3e3   : > { %v1032_v14 = vsel %vm1030_vm11, 1, %v2855_v8  ;;  %vm1046_vm8 = vmand %vm1042_vm14, %vm1044_vm2 }
 0x3e4   : > { %vm989_vm12 = vcmp.gt.f32.partialorder %v987_v63, %v3668_v44  ;;  %vm991_vm15 = vcmp.eq.f32.partialorder %v987_v63, %v3668_v44  ;;  %vm1005_vm6 = vcmp.gt.f32.partialorder %v1003_v3, %v3668_v44  ;;  %vm1007_vm13 = vcmp.eq.f32.partialorder %v1003_v3, %v3668_v44  ;;  %vm1048_vm1 = vmor %vm1040_vm5, %vm1046_vm8 }
 0x3e5   : > { %vm997_vm3 = vmor %vm989_vm12, %vm991_vm15  ;;  %vm1023_vm4 = vcmp.gt.f32.partialorder %v1021_v4, %v3668_v44  ;;  %vm1025_vm14 = vcmp.eq.f32.partialorder %v1021_v4, %v3668_v44  ;;  %v1034_v2 = vadd.s32 %v1032_v14, %v1016_v13  ;;  %vm1041_vm2 = vcmp.gt.f32.partialorder %v1039_v62, %v3668_v44 }
 0x3e6   : > { %v999_v16 = vsel %vm997_vm3, 1, %v2855_v8  ;;  %vm1013_vm10 = vmor %vm1005_vm6, %vm1007_vm13  ;;  %vm1043_vm11 = vcmp.eq.f32.partialorder %v1039_v62, %v3668_v44  ;;  %v1050_v19 = vsel %vm1048_vm1, 1, %v2855_v8  ;;  %vm1058_vm8 = vcmp.gt.f32.partialorder %v1057_v59, %v3627_v57 }
 0x3e7   : > { %v1015_v18 = vsel %vm1013_vm10, 1, %v2855_v8  ;;  %vm1031_vm5 = vmor %vm1023_vm4, %vm1025_vm14  ;;  %v1093_v20 = vrot.slane %v3627_v57, %v1092_v61  ;;  %v1052_v22 = vadd.s32 %v1050_v19, %v1034_v2  ;;  %vm1059_vm15 = vcmp.gt.f32.partialorder %v1057_v59, %v3668_v44 }
 0x3e8   : > { %v1017_v21 = vadd.s32 %v1015_v18, %v999_v16  ;;  %vm1049_vm12 = vmor %vm1041_vm2, %vm1043_vm11  ;;  %vm1061_vm6 = vcmp.eq.f32.partialorder %v1057_v59, %v3668_v44  ;;  %v1033_v23 = vsel %vm1031_vm5, 1, %v2855_v8  ;;  %vm1078_vm1 = vcmp.eq.f32.partialorder %v1075_v15, %v3627_v57 }
 0x3e9   : > { %vm1064_vm13 = vmand %vm1060_vm0, %vm1062_vm7  ;;  %vm1098_vm3 = vcmp.gt.s32.totalorder %v3619_v45, 6  ;;  %vm1135_vm4 = vcmp.gt.s32.totalorder %v3661_v12, 8  ;;  %vm1076_vm2 = vcmp.gt.f32.partialorder %v1075_v15, %v3627_v57  ;;  %vm1153_vm10 = vcmp.gt.s32.totalorder %v3661_v12, 9 }
 0x3ea   : > { %v1035_v24 = vadd.s32 %v1033_v23, %v1017_v21  ;;  %vm1066_vm14 = vmor %vm1058_vm8, %vm1064_vm13  ;;  %v1051_v26 = vsel %vm1049_vm12, 1, %v2855_v8  ;;  %vm1077_vm0 = vcmp.gt.f32.partialorder %v1075_v15, %v3668_v44  ;;  %vm1079_vm7 = vcmp.eq.f32.partialorder %v1075_v15, %v3668_v44 }
 0x3eb   : > { %vm1067_vm11 = vmor %vm1059_vm15, %vm1061_vm6  ;;  %v1068_v27 = vsel %vm1066_vm14, 1, %v2855_v8  ;;  %vm1096_vm8 = vcmp.eq.f32.partialorder %v1093_v20, %v3627_v57  ;;  %v1129_v30 = vrot.slane %v3668_v44, %v986_v50  ;;  %vm1094_vm15 = vcmp.gt.f32.partialorder %v1093_v20, %v3627_v57 }
 0x3ec   : > { %v1053_v28 = vadd.s32 %v1051_v26, %v1035_v24  ;;  %v1070_v29 = vadd.s32 %v1068_v27, %v1052_v22  ;;  %vm1082_vm5 = vmand %vm1078_vm1, %vm1080_vm9  ;;  %v1069_v31 = vsel %vm1067_vm11, 1, %v2855_v8  ;;  %vm1095_vm6 = vcmp.gt.f32.partialorder %v1093_v20, %v3668_v44 }
 0x3ed   : > { %vm1084_vm12 = vmor %vm1076_vm2, %vm1082_vm5  ;;  %vm1171_vm13 = vcmp.gt.s32.totalorder %v3661_v12, 10  ;;  %vm1097_vm9 = vcmp.eq.f32.partialorder %v1093_v20, %v3668_v44  ;;  %v1147_v34 = vrot.slane %v3668_v44, %v1002_v55  ;;  %vm1113_vm11 = vcmp.gt.f32.partialorder %v1111_v25, %v3668_v44 }
 0x3ee   : > { %v1071_v32 = vadd.s32 %v1069_v31, %v1053_v28  ;;  %vm1085_vm14 = vmor %vm1077_vm0, %vm1079_vm7  ;;  %v1086_v33 = vsel %vm1084_vm12, 1, %v2855_v8  ;;  %vm1115_vm0 = vcmp.eq.f32.partialorder %v1111_v25, %v3668_v44  ;;  %vm1112_vm5 = vcmp.gt.f32.partialorder %v1111_v25, %v3627_v57 }
 0x3ef   : > { %v1087_v35 = vsel %vm1085_vm14, 1, %v2855_v8  ;;  %v1088_v36 = vadd.s32 %v1086_v33, %v1070_v29  ;;  %vm1100_vm2 = vmand %vm1096_vm8, %vm1098_vm3  ;;  %vm1133_vm12 = vcmp.eq.f32.partialorder %v1129_v30, %v3668_v44  ;;  %v1165_v37 = vrot.slane %v3668_v44, %v1020_v56 }
 0x3f0   : > { %v1089_v38 = vadd.s32 %v1087_v35, %v1071_v32  ;;  %vm1102_vm7 = vmor %vm1094_vm15, %vm1100_vm2  ;;  %vm1131_vm3 = vcmp.gt.f32.partialorder %v1129_v30, %v3668_v44  ;;  %v1183_v40 = vrot.slane %v3668_v44, %v1038_v58  ;;  %vm1207_vm8 = vcmp.gt.s32.totalorder %v3661_v12, 12 }
 0x3f1   : > { %vm1103_vm14 = vmor %vm1095_vm6, %vm1097_vm9  ;;  %v1104_v39 = vsel %vm1102_vm7, 1, %v2855_v8  ;;  %vm1130_vm2 = vcmp.gt.f32.partialorder %v1129_v30, %v3627_v57  ;;  %vm1151_vm1 = vcmp.eq.f32.partialorder %v1147_v34, %v3668_v44  ;;  %vm1225_vm6 = vcmp.gt.s32.totalorder %v3661_v12, 13 }
 0x3f2   : > { %v1105_v41 = vsel %vm1103_vm14, 1, %v2855_v8  ;;  %v1106_v42 = vadd.s32 %v1104_v39, %v1088_v36  ;;  %vm1121_vm15 = vmor %vm1113_vm11, %vm1115_vm0  ;;  %v1122_v46 = vsel %vm1112_vm5, 1, %v2855_v8  ;;  %vm1149_vm7 = vcmp.gt.f32.partialorder %v1147_v34, %v3668_v44 }
 0x3f3   : > { %v1107_v43 = vadd.s32 %v1105_v41, %v1089_v38  ;;  %vm1137_vm9 = vmand %vm1133_vm12, %vm1135_vm4  ;;  %v1201_v51 = vrot.slane %v3668_v44, %v1056_v9  ;;  %v1123_v48 = vsel %vm1121_vm15, 1, %v2855_v8  ;;  %vm1148_vm0 = vcmp.gt.f32.partialorder %v1147_v34, %v3627_v57  ;;  %v1282_v34 = vld [vmem:[%s4944_s6] sm:$0x1] }
 0x3f4   : > { %v1124_v49 = vadd.s32 %v1122_v46, %v1106_v42  ;;  %vm1139_vm11 = vmor %vm1131_vm3, %vm1137_vm9  ;;  %vm1169_vm5 = vcmp.eq.f32.partialorder %v1165_v37, %v3668_v44  ;;  %v1140_v54 = vsel %vm1130_vm2, 1, %v2855_v8  ;;  %vm1167_vm12 = vcmp.gt.f32.partialorder %v1165_v37, %v3668_v44 }
 0x3f5   : > { %v1125_v53 = vadd.s32 %v1123_v48, %v1107_v43  ;;  %vm1155_vm4 = vmand %vm1151_vm1, %vm1153_vm10  ;;  %v1219_v50 = vrot.slane %v3668_v44, %v1074_v47  ;;  %v1141_v55 = vsel %vm1139_vm11, 1, %v2855_v8  ;;  %vm1166_vm3 = vcmp.gt.f32.partialorder %v1165_v37, %v3627_v57 }
 0x3f6   : > { %v1142_v56 = vadd.s32 %v1140_v54, %v1124_v49  ;;  %vm1157_vm14 = vmor %vm1149_vm7, %vm1155_vm4  ;;  %vm1187_vm15 = vcmp.eq.f32.partialorder %v1183_v40, %v3668_v44  ;;  %v1158_v58 = vsel %vm1148_vm0, 1, %v2855_v8  ;;  %vm1184_vm1 = vcmp.gt.f32.partialorder %v1183_v40, %v3627_v57 }
 0x3f7   : > { %v1143_v60 = vadd.s32 %v1141_v55, %v1125_v53  ;;  %vm1173_vm10 = vmand %vm1169_vm5, %vm1171_vm13  ;;  %vm1185_vm2 = vcmp.gt.f32.partialorder %v1183_v40, %v3668_v44  ;;  %v1159_v63 = vsel %vm1157_vm14, 1, %v2855_v8  ;;  %vm1205_vm7 = vcmp.eq.f32.partialorder %v1201_v51, %v3668_v44 }
 0x3f8   : > { %v1160_v3 = vadd.s32 %v1158_v58, %v1142_v56  ;;  %vm1175_vm9 = vmor %vm1167_vm12, %vm1173_vm10  ;;  %v1237_v4 = vrot.slane %v3668_v44, %v1092_v61  ;;  %v1176_v5 = vsel %vm1166_vm3, 1, %v2855_v8  ;;  %vm5102_vm11 = vcmp.gt.s32.totalorder %v3661_v12, 11 }
 0x3f9   : > { %v1161_v62 = vadd.s32 %v1159_v63, %v1143_v60  ;;  %vm1191_vm13 = vmand %vm1187_vm15, %vm5102_vm11  ;;  %vm1203_vm0 = vcmp.gt.f32.partialorder %v1201_v51, %v3668_v44  ;;  %vm1243_vm5 = vcmp.gt.s32.totalorder %v3661_v12, 14  ;;  %v1177_v6 = vsel %vm1175_vm9, 1, %v2855_v8 }
 0x3fa   : > { %v1178_v7 = vadd.s32 %v1176_v5, %v1160_v3  ;;  %vm1193_vm4 = vmor %vm1185_vm2, %vm1191_vm13  ;;  %vm1202_vm12 = vcmp.gt.f32.partialorder %v1201_v51, %v3627_v57  ;;  %vm1223_vm14 = vcmp.eq.f32.partialorder %v1219_v50, %v3668_v44  ;;  %v1194_v10 = vsel %vm1184_vm1, 1, %v2855_v8 }
 0x3fb   : > { %v1179_v9 = vadd.s32 %v1177_v6, %v1161_v62  ;;  %vm1209_vm3 = vmand %vm1205_vm7, %vm1207_vm8  ;;  %vm1220_vm15 = vcmp.gt.f32.partialorder %v1219_v50, %v3627_v57  ;;  %vm1221_vm10 = vcmp.gt.f32.partialorder %v1219_v50, %v3668_v44  ;;  %v1195_v47 = vsel %vm1193_vm4, 1, %v2855_v8 }
 0x3fc   : > { %v1196_v11 = vadd.s32 %v1194_v10, %v1178_v7  ;;  %vm1211_vm2 = vmor %vm1203_vm0, %vm1209_vm3  ;;  %vm1241_vm9 = vcmp.eq.f32.partialorder %v1237_v4, %v3668_v44  ;;  %v1255_v52 = vrot.slane %v3668_v44, %v1110_v17  ;;  %v1212_v59 = vsel %vm1202_vm12, 1, %v2855_v8 }
 0x3fd   : > { %v1197_v13 = vadd.s32 %v1195_v47, %v1179_v9  ;;  %vm1227_vm8 = vmand %vm1223_vm14, %vm1225_vm6  ;;  %vm1239_vm1 = vcmp.gt.f32.partialorder %v1237_v4, %v3668_v44  ;;  %v1213_v14 = vsel %vm1211_vm2, 1, %v2855_v8  ;;  %vm1238_vm11 = vcmp.gt.f32.partialorder %v1237_v4, %v3627_v57 }
 0x3fe   : > { %v1214_v15 = vadd.s32 %v1212_v59, %v1196_v11  ;;  %vm1229_vm7 = vmor %vm1221_vm10, %vm1227_vm8  ;;  %v1230_v45 = vsel %vm1220_vm15, 1, %v2855_v8  ;;  %vm1256_vm0 = vcmp.gt.f32.partialorder %v1255_v52, %v3627_v57  ;;  %v1248_v18 = vsel %vm1238_vm11, 1, %v2855_v8 }
 0x3ff   : > { %v1215_v61 = vadd.s32 %v1213_v14, %v1197_v13  ;;  %vm1245_vm13 = vmand %vm1241_vm9, %vm1243_vm5  ;;  %v1231_v2 = vsel %vm1229_vm7, 1, %v2855_v8  ;;  %vm1257_vm4 = vcmp.gt.f32.partialorder %v1255_v52, %v3668_v44  ;;  %v1266_v22 = vsel %vm1256_vm0, 1, %v2855_v8 }
 0x400   : > { %v1232_v16 = vadd.s32 %v1230_v45, %v1214_v15  ;;  %vm1247_vm6 = vmor %vm1239_vm1, %vm1245_vm13  ;;  %v1267_v12 = vsel %vm1257_vm4, 1, %v2855_v8  ;;  %vm5103_vm14 = vcmask 1040384   ;;  %v1288_v37 = vstv %s2687_s9 }
 0x401   : > { %v1233_v17 = vadd.s32 %v1231_v2, %v1215_v61  ;;  %v1249_v19 = vsel %vm1247_vm6, 1, %v2855_v8  ;;  %vm5104_vm3 = vmmov %vm5103_vm14  ;;  %v1311_v55 = vstv %s2688_s10  ;;  %v1292_v56 = vstv %s1290_s11 }
 0x402   : > { %v1250_v20 = vadd.s32 %v1248_v18, %v1232_v16 }
 0x403   : > { %v1251_v21 = vadd.s32 %v1249_v19, %v1233_v17 }
 0x404   : > { %v1268_v23 = vadd.s32 %v1266_v22, %v1250_v20 }
 0x405   : > { %v1269_v24 = vadd.s32 %v1267_v12, %v1251_v21 }
 0x406   : > { %vm1270_vm5 = vcmp.lt.s32.totalorder %v1268_v23, 8 }
 0x407   : > { %vm1271_vm12 = vcmp.lt.s32.totalorder %v1269_v24, 8  ;;  %v1272_v25 = vsel %vm1270_vm5, %v3627_v57, 0.0 }
 0x408   : > { %v1273_v26 = vsel %vm1271_vm12, %v3668_v44, 0.0 }
 0x409   : > { %v1274_v27 = vadd.f32 %v1273_v26, %v1272_v25 }
 0x40b   : > { %v1275_v28 = vrot.slane %v1274_v27, 4 }
 0x40d   : > { %v1276_v29 = vadd.f32 %v1275_v28, %v1274_v27 }
 0x40f   : > { %v1277_v30 = vrot.slane %v1276_v29, 2 }
 0x411   : > { %v1278_v31 = vadd.f32 %v1277_v30, %v1276_v29 }
 0x413   : > { %v1279_v32 = vrot.slane %v1278_v31, 1 }
 0x415   : > { %v1280_v33 = vadd.f32 %v1279_v32, %v1278_v31 }
 0x417   : > { %v1281_v8 = vmul.f32 0.125, %v1280_v33 }
 0x419   : > { %v1283_v35 = vmul.f32 %v1282_v34, %v1281_v8 }
 0x41b   : > { %v1304_v36 = vmul.f32 %v1283_v35, %v3604_v1  ;;  %v1284_v38 = vmul.f32 %v1283_v35, %v3602_v0 }
 0x41d   : > { %v1305_v57 = vsel %vm5103_vm14, %v1304_v36, 0.0  ;;  %v1285_v44 = vsel %vm5104_vm3, %v1284_v38, 0.0 }
 0x41e   : > { %1306 = vadd.xlane.f32.xlu0 %v1305_v57  ;;  %1286 = vadd.xlane.f32.xlu1 %v1285_v44 }
 0x4ab   : > { %v1307_v39 = vpop.xlane.xlu0 %1306  ;;  %v1287_v40 = vpop.xlane.xlu1 %1286 }
 0x4ac   : > { %v1308_v41 = vadd.f32 %v1307_v39, %v1288_v37  ;;  %v1289_v42 = vadd.f32 %v1288_v37, %v1287_v40 }
 0x4ae   : > { %v1314_v43 = vand.u32 2147483647, %v1308_v41  ;;  %v1295_v46 = vand.u32 2147483647, %v1289_v42  ;;  %v1310_v60 = vmax.f32 %v1308_v41, 0.0  ;;  %v1312_v58 = vmul.f32 %v1311_v55, %v1308_v41 }
 0x4af   : > { %v1291_v63 = vmax.f32 %v1289_v42, 0.0  ;;  %v1293_v3 = vmul.f32 %v1292_v56, %v1289_v42 }
 0x4b0   : > { %v1315_v51 = vsub.f32 0.0, %v1314_v43  ;;  %v1296_v48 = vsub.f32 0.0, %v1295_v46  ;;  %v1313_v5 = vsub.f32 %v1310_v60, %v1312_v58 }
 0x4b1   : > { %v1294_v7 = vsub.f32 %v1291_v63, %v1293_v3 }
 0x4b2   : > { %v1316_v49 = vmul.f32 1.442695, %v1315_v51  ;;  %v1297_v1 = vmul.f32 1.442695, %v1296_v48 }
 0x4b4   : > { %2762 = vpow2.f32 %v1316_v49 }
 0x4b5   : > { %2764 = vpow2.f32 %v1297_v1 }
 0x4be   : > { %v2763_v0 = vpop.eup %2762 }
 0x4bf   : > { %v2765_v53 = vpop.eup %2764  ;;  %v1318_v54 = vadd.f32 1.0, %v2763_v0 }
 0x4c0   : > { %v1299_v50 = vadd.f32 1.0, %v2765_v53 }
 0x4c1   : > { %2766 = vlog2.f32 %v1318_v54 }
 0x4c2   : > { %2768 = vlog2.f32 %v1299_v50 }
 0x4cb   : > { %v2767_v4 = vpop.eup %2766 }
 0x4cc   : > { %v2769_v62 = vpop.eup %2768  ;;  %v1320_v6 = vmul.f32 0.6931472, %v2767_v4 }
 0x4cd   : > { %v1301_v9 = vmul.f32 0.6931472, %v2769_v62 }
 0x4ce   : > { %v1321_v10 = vadd.f32 %v1320_v6, %v1313_v5 }
 0x4cf   : > { %v1302_v47 = vadd.f32 %v1301_v9, %v1294_v7 }
 0x4d1   : > { %v1322_v11 = vadd.f32 %v1321_v10, %v1302_v47 }
 0x4d3   : > { %v1323_v52 = vmul.f32 0.5, %v1322_v11 }
 0x4d5   : > { %1324 = vst [vmem:[%s2955_s22] sm:$0x1] %v1323_v52 }
 0x4d6 PF: > { %p2689_p13 = scmp.ne.s32.totalorder %s2910_s28, 2 }
 0x4d7   : > { %v1337_v13 = vlaneseq (!%p2689_p13)  ;;  %v3847_v14 = vld [vmem:[%s4942_s4 + $0x8] sm:$0xff] (!%p2689_p13)  ;;  %v3852_v15 = vld [vmem:[%s4942_s4] sm:$0xff] (!%p2689_p13)  ;;  %v2856_v61 = vmov (!%p2689_p13), 0.0   ;;  %vm4951_vm9 = vcmask (!%p2689_p13), 261120   ;;  %v3869_v20 = vld [vmem:[%s4942_s4 + $0x10] sm:$0xff] (!%p2689_p13)  ;;  %v2857_v33 = vmov (!%p2689_p13), 1  }
 0x4d8   : > { %1328 = sbr.rel (%p2689_p13) target bundleno = 1916 (0x77c), region = 72  ;;  %v3882_v26 = vld [vmem:[%s4942_s4 + $0x18] sm:$0xff] (!%p2689_p13)  ;;  %2771 = vset.pattern.permute.xlu1 (!%p2689_p13), %v2857_v33  ;;  %v2858_v34 = vmov (!%p2689_p13), 0   ;;  %s2691_s19 = sld [smem:[#allocation2 + $0x9]] (!%p2689_p13)  ;;  %vm1388_vm1 = vcmask (!%p2689_p13), 7168   ;;  %vm1397_vm7 = vcmask (!%p2689_p13), 1040384  }
 0x4d9   : > { %v1338_v59 = vand.u32 (!%p2689_p13), 127, %v1337_v13  ;;  %2770 = vset.pattern.permute.xlu0 (!%p2689_p13), %v2858_v34  ;;  %s2690_s20 = sld [smem:[#allocation2 + $0x8]] (!%p2689_p13)  ;;  %s2692_s21 = sld [smem:[#allocation2 + $0xa]] (!%p2689_p13)  ;;  %vm1410_vm11 = vcmask (!%p2689_p13), 1046528  }
 0x4da   : > { %s2693_s25 = sld [smem:[#allocation2 + $0xb]] (!%p2689_p13)  ;;  %s2694_s26 = sld [smem:[#allocation4 + $0x1]] (!%p2689_p13) }
 0x4db   : > { %vm1340_vm15 = vcmp.lt.s32.totalorder (!%p2689_p13), %v1338_v59, 16  ;;  %vm1343_vm10 = vcmp.ge.s32.totalorder (!%p2689_p13), %v1338_v59, 16  ;;  %vm1344_vm2 = vcmp.lt.s32.totalorder (!%p2689_p13), %v1338_v59, 32  ;;  %s2578_s29 = sld [smem:[#allocation4]] (!%p2689_p13) }
 0x4dc   : > { %v3854_v45 = vsel (!%p2689_p13), %vm1340_vm15, 1.0, %v2856_v61  ;;  %vm1345_vm8 = vmand (!%p2689_p13), %vm1343_vm10, %vm1344_vm2 }
 0x4dd   : > { %v1348_v2 = vmul.f32 (!%p2689_p13), %v3854_v45, %v3847_v14  ;;  %v1347_v16 = vmul.f32 (!%p2689_p13), %v3854_v45, %v3852_v15  ;;  %v3860_v17 = vsel (!%p2689_p13), %vm1345_vm8, 1.0, %v2856_v61  ;;  %v1349_v25 = vmul.f32 (!%p2689_p13), %v3854_v45, %v3869_v20 }
 0x4de   : > { %v1369_v18 = vmul.f32 (!%p2689_p13), %v3860_v17, %v3847_v14  ;;  %v1368_v19 = vmul.f32 (!%p2689_p13), %v3860_v17, %v3852_v15  ;;  %v1370_v24 = vmul.f32 (!%p2689_p13), %v3860_v17, %v3869_v20  ;;  %v1371_v29 = vmul.f32 (!%p2689_p13), %v3860_v17, %v3882_v26 }
 0x4df   : > { %v1355_v21 = vsel %vm4951_vm9, %v1348_v2, 0.0  ;;  %v1352_v22 = vsel %vm4951_vm9, %v1347_v16, 0.0  ;;  %v1358_v28 = vsel %vm4951_vm9, %v1349_v25, 0.0  ;;  %v1350_v30 = vmul.f32 %v3854_v45, %v3882_v26 }
 0x4e0   : > { %1356 = vadd.xlane.f32.xlu1 %v1355_v21  ;;  %1353 = vadd.xlane.f32.xlu0 %v1352_v22  ;;  %v1375_v12 = vsel %vm4951_vm9, %v1369_v18, 0.0  ;;  %v1372_v23 = vsel %vm4951_vm9, %v1368_v19, 0.0  ;;  %v1378_v27 = vsel %vm4951_vm9, %v1370_v24, 0.0  ;;  %v1381_v31 = vsel %vm4951_vm9, %v1371_v29, 0.0 }
 0x4e1   : > { %v1361_v32 = vsel %vm4951_vm9, %v1350_v30, 0.0  ;;  %v1428_v40 = vstv %s2691_s19  ;;  %v1423_v51 = vstv %s2690_s20  ;;  %v1437_v50 = vstv %s2692_s21 }
 0x4e4   : > { %1376 = vadd.xlane.f32.xlu1 %v1375_v12  ;;  %1373 = vadd.xlane.f32.xlu0 %v1372_v23 }
 0x4e8   : > { %1379 = vadd.xlane.f32.xlu1 %v1378_v27  ;;  %1359 = vadd.xlane.f32.xlu0 %v1358_v28 }
 0x4ec   : > { %1382 = vadd.xlane.f32.xlu1 %v1381_v31  ;;  %1362 = vadd.xlane.f32.xlu0 %v1361_v32 }
 0x56d   : > { %v1357_v8 = vpop.xlane.xlu1 %1356  ;;  %v1354_v35 = vpop.xlane.xlu0 %1353 }
 0x56e   : > { %v1365_v57 = vmul.f32 0.0625, %v1357_v8  ;;  %v1364_v44 = vmul.f32 0.0625, %v1354_v35 }
 0x571   : > { %v1377_v36 = vpop.xlane.xlu1 %1376  ;;  %v1374_v38 = vpop.xlane.xlu0 %1373 }
 0x572   : > { %v1385_v37 = vmul.f32 0.0625, %v1377_v36  ;;  %v1384_v39 = vmul.f32 0.0625, %v1374_v38 }
 0x574   : > { %v1390_v41 = vsel %vm1388_vm1, %v1365_v57, %v1385_v37  ;;  %v1389_v42 = vsel %vm1388_vm1, %v1364_v44, %v1384_v39 }
 0x575   : > { %v1399_v43 = vrot.slane %v1390_v41, 7  ;;  %v1412_v46 = vrot.slane %v1390_v41, 1  ;;  %v1398_v48 = vrot.slane %v1389_v42, 7  ;;  %v1380_v49 = vpop.xlane.xlu1 %1379  ;;  %v1360_v1 = vpop.xlane.xlu0 %1359  ;;  %v1411_v0 = vrot.slane %v1389_v42, 1 }
 0x576   : > { %v1386_v53 = vmul.f32 0.0625, %v1380_v49  ;;  %v1366_v54 = vmul.f32 0.0625, %v1360_v1  ;;  %v1429_v60 = vmul.f32 %v1428_v40, %v1389_v42  ;;  %v1430_v62 = vmul.f32 %v1428_v40, %v1390_v41 }
 0x577   : > { %v1400_v55 = vsel %vm1397_vm7, %v1398_v48, %v1399_v43  ;;  %v1409_v56 = vsel %vm1397_vm7, 0.0, %v1398_v48  ;;  %v1413_v58 = vsel %vm1410_vm11, %v1411_v0, %v1412_v46 }
 0x578   : > { %v1424_v63 = vmul.f32 %v1423_v51, %v1409_v56  ;;  %v1425_v3 = vmul.f32 %v1423_v51, %v1400_v55  ;;  %v1391_v4 = vsel %vm1388_vm1, %v1366_v54, %v1386_v53  ;;  %v1438_v47 = vmul.f32 %v1437_v50, %v1413_v58 }
 0x579   : > { %v1401_v5 = vrot.slane %v1391_v4, 7  ;;  %v1414_v6 = vrot.slane %v1391_v4, 1  ;;  %v1383_v7 = vpop.xlane.xlu1 %1382  ;;  %v1363_v9 = vpop.xlane.xlu0 %1362  ;;  %v1431_v16 = vmul.f32 %v1428_v40, %v1391_v4  ;;  %v3914_v58 = vshrl.u32 %v1337_v13, 7 }
 0x57a   : > { %v1433_v10 = vadd.f32 %v1429_v60, %v1424_v63  ;;  %v1387_v11 = vmul.f32 0.0625, %v1383_v7  ;;  %v1367_v52 = vmul.f32 0.0625, %v1363_v9  ;;  %v1434_v59 = vadd.f32 %v1430_v62, %v1425_v3 }
 0x57b   : > { %v1402_v61 = vsel %vm1397_vm7, %v1399_v43, %v1401_v5  ;;  %v1415_v2 = vsel %vm1410_vm11, %v1412_v46, %v1414_v6  ;;  %v3922_v7 = vsub.s32 1, %v3914_v58  ;;  %v3925_v9 = vsub.s32 2, %v3914_v58 }
 0x57c   : > { %v1442_v18 = vadd.f32 %v1438_v47, %v1433_v10  ;;  %v1426_v19 = vmul.f32 %v1423_v51, %v1402_v61  ;;  %v1439_v21 = vmul.f32 %v1437_v50, %v1415_v2  ;;  %v1392_v22 = vsel %vm1388_vm1, %v1367_v52, %v1387_v11 }
 0x57d   : > { %v1403_v12 = vrot.slane %v1392_v22, 7  ;;  %v1416_v23 = vrot.slane %v1392_v22, 1  ;;  %v1432_v38 = vmul.f32 %v1428_v40, %v1392_v22  ;;  %v3931_v10 = vsub.s32 3, %v3914_v58 }
 0x57e   : > { %v1446_v24 = vsub.f32 0.0, %v1442_v18  ;;  %v1443_v25 = vadd.f32 %v1439_v21, %v1434_v59  ;;  %v1435_v27 = vadd.f32 %v1431_v16, %v1426_v19  ;;  %vm1539_vm13 = vcmp.gt.s32.totalorder %v3914_v58, 0 }
 0x57f   : > { %v1417_v28 = vsel %vm1410_vm11, %v1414_v6, %v1416_v23  ;;  %v1404_v31 = vsel %vm1397_vm7, %v1401_v5, %v1403_v12  ;;  %v1422_v57 = vsel %vm1410_vm11, %v1416_v23, 0.0  ;;  %v3919_v6 = vsub.s32 0, %v3914_v58 }
 0x580   : > { %v1450_v29 = vmul.f32 1.442695, %v1446_v24  ;;  %v1447_v30 = vsub.f32 0.0, %v1443_v25  ;;  %v1440_v32 = vmul.f32 %v1437_v50, %v1417_v28  ;;  %v1427_v36 = vmul.f32 %v1423_v51, %v1404_v31 }
 0x581   : > { %v1441_v39 = vmul.f32 %v1437_v50, %v1422_v57  ;;  %vm1567_vm6 = vcmp.gt.s32.totalorder %v3914_v58, 1  ;;  %v3960_v61 = vsub.s32 4, %v3914_v58  ;;  %vm1599_vm10 = vcmp.gt.s32.totalorder %v3914_v58, 2 }
 0x582   : > { %2779 = vpow2.f32 %v1450_v29  ;;  %v1452_v8 = vmul.f32 1.442695, %v1447_v30  ;;  %v1444_v35 = vadd.f32 %v1440_v32, %v1435_v27  ;;  %v1436_v37 = vadd.f32 %v1432_v38, %v1427_v36 }
 0x583   : > { %v3970_v18 = vsub.s32 5, %v3914_v58  ;;  %v3973_v19 = vsub.s32 6, %v3914_v58  ;;  %v3976_v21 = vsub.s32 7, %v3914_v58  ;;  %vm1631_vm11 = vcmp.gt.s32.totalorder %v3914_v58, 3 }
 0x584   : > { %2781 = vpow2.f32 %v1452_v8  ;;  %v1448_v44 = vsub.f32 0.0, %v1444_v35  ;;  %v1445_v42 = vadd.f32 %v1441_v39, %v1436_v37  ;;  %v3994_v28 = vadd.s32 8, %v3914_v58 }
 0x585   : > { %v3997_v29 = vadd.s32 16, %v3914_v58 }
 0x586   : > { %v1454_v41 = vmul.f32 1.442695, %v1448_v44  ;;  %v1449_v49 = vsub.f32 0.0, %v1445_v42 }
 0x588   : > { %2783 = vpow2.f32 %v1454_v41  ;;  %v1456_v0 = vmul.f32 1.442695, %v1449_v49 }
 0x58c   : > { %v2780_v43 = vpop.eup %2779 }
 0x58d   : > { %v1458_v46 = vadd.f32 1.0, %v2780_v43  ;;  %v4063_v43 = vadd.s32 24, %v3914_v58 }
 0x58e   : > { %v2782_v48 = vpop.eup %2781 }
 0x58f   : > { %2785 = vrcp.f32 %v1458_v46  ;;  %v1459_v1 = vadd.f32 1.0, %v2782_v48 }
 0x591   : > { %2787 = vrcp.f32 %v1459_v1 }
 0x592   : > { %v2784_v53 = vpop.eup %2783  ;;  %2789 = vpow2.f32 %v1456_v0 }
 0x593   : > { %v1460_v51 = vadd.f32 1.0, %v2784_v53 }
 0x595   : > { %2791 = vrcp.f32 %v1460_v51 }
 0x599   : > { %v2786_v40 = vpop.eup %2785 }
 0x59a   : > { %1495 = vperm.xlu1 %2771, %v2786_v40   ;;  %1472 = vperm.xlu0 %2770, %v2786_v40  }
 0x59b   : > { %v2788_v54 = vpop.eup %2787 }
 0x59c   : > { %v2790_v50 = vpop.eup %2789 }
 0x59d   : > { %v1461_v55 = vadd.f32 1.0, %v2790_v50 }
 0x59e   : > { %2772 = vset.pattern.permute.xlu1 %v2858_v34  ;;  %2778 = vset.pattern.permute.xlu0 %v2857_v33 }
 0x59f   : > { %1477 = vperm.xlu1 %2772, %v2788_v54   ;;  %v2792_v56 = vpop.eup %2791  ;;  %2793 = vrcp.f32 %v1461_v55 }
 0x5a3   : > { %2773 = vset.pattern.permute.xlu1 %v2857_v33 }
 0x5a4   : > { %1499 = vperm.xlu1 %2773, %v2788_v54  }
 0x5a8   : > { %2774 = vset.pattern.permute.xlu1 %v2858_v34 }
 0x5a9   : > { %1482 = vperm.xlu1 %2774, %v2792_v56   ;;  %v2794_v60 = vpop.eup %2793 }
 0x5ad   : > { %2775 = vset.pattern.permute.xlu1 %v2857_v33 }
 0x5ae   : > { %1503 = vperm.xlu1 %2775, %v2792_v56  }
 0x5b2   : > { %2776 = vset.pattern.permute.xlu1 %v2858_v34 }
 0x5b3   : > { %1487 = vperm.xlu1 %2776, %v2794_v60  }
 0x5b7   : > { %2777 = vset.pattern.permute.xlu1 %v2857_v33 }
 0x5b8   : > { %1507 = vperm.xlu1 %2777, %v2794_v60  }
 0x619   : > { %v1496_v63 = vpop.permute.xlu1 %1495  ;;  %v1473_v3 = vpop.permute.xlu0 %1472 }
 0x61a   : > { %v1510_v4 = vmul.f32 %v1496_v63, %v3860_v17  ;;  %v1490_v62 = vmul.f32 %v1473_v3, %v3854_v45 }
 0x61c   : > { %v1514_v5 = vadd.f32 %v1510_v4, %v1490_v62 }
 0x61e   : > { %v3928_v33 = vmul.f32 %v1514_v5, %v3852_v15  ;;  %v1478_v13 = vpop.permute.xlu1 %1477 }
 0x61f   : > { %v1491_v2 = vmul.f32 %v1478_v13, %v3854_v45 }
 0x620   : > { %v3935_v47 = vrot.slane %v3928_v33, %v3919_v6  ;;  %v3940_v11 = vrot.slane %v3928_v33, %v3922_v7  ;;  %v3944_v52 = vrot.slane %v3928_v33, %v3925_v9  ;;  %v3955_v15 = vrot.slane %v3928_v33, %v3931_v10 }
 0x621   : > { %v3987_v24 = vrot.slane %v3928_v33, %v3960_v61  ;;  %v4013_v32 = vrot.slane %v3928_v33, %v3973_v19  ;;  %v4017_v8 = vrot.slane %v3928_v33, %v3976_v21 }
 0x622   : > { %vm1531_vm0 = vcmp.gt.f32.partialorder %v3935_v47, %v3928_v33  ;;  %vm1535_vm4 = vcmp.eq.f32.partialorder %v3935_v47, %v3928_v33  ;;  %vm1563_vm5 = vcmp.eq.f32.partialorder %v3940_v11, %v3928_v33  ;;  %vm1559_vm14 = vcmp.gt.f32.partialorder %v3940_v11, %v3928_v33 }
 0x623   : > { %v1500_v59 = vpop.permute.xlu1 %1499  ;;  %vm1543_vm12 = vmand %vm1535_vm4, %vm1539_vm13  ;;  %vm1595_vm15 = vcmp.eq.f32.partialorder %v3944_v52, %v3928_v33  ;;  %vm1591_vm8 = vcmp.gt.f32.partialorder %v3944_v52, %v3928_v33  ;;  %vm1627_vm7 = vcmp.eq.f32.partialorder %v3955_v15, %v3928_v33 }
 0x624   : > { %v1511_v16 = vmul.f32 %v1500_v59, %v3860_v17  ;;  %vm1547_vm3 = vmor %vm1531_vm0, %vm1543_vm12  ;;  %vm1663_vm0 = vcmp.gt.s32.totalorder %v3914_v58, 4 }
 0x625   : > { %vm1571_vm2 = vmand %vm1563_vm5, %vm1567_vm6  ;;  %v1551_v12 = vsel %vm1547_vm3, 1, %v2858_v34  ;;  %vm1623_vm6 = vcmp.gt.f32.partialorder %v3955_v15, %v3928_v33  ;;  %vm1695_vm5 = vcmp.gt.s32.totalorder %v3914_v58, 5 }
 0x626   : > { %v1515_v22 = vadd.f32 %v1511_v16, %v1491_v2  ;;  %vm1575_vm1 = vmor %vm1559_vm14, %vm1571_vm2 }
 0x627   : > { %v1579_v23 = vsel %vm1575_vm1, 1, %v2858_v34  ;;  %vm1603_vm13 = vmand %vm1595_vm15, %vm1599_vm10 }
 0x628   : > { %v3991_v25 = vmul.f32 %v1515_v22, %v3847_v14  ;;  %v1483_v27 = vpop.permute.xlu1 %1482  ;;  %vm4002_vm4 = vmor %vm1591_vm8, %vm1603_vm13  ;;  %v1583_v31 = vadd.s32 %v1579_v23, %v1551_v12  ;;  %v4009_v14 = vrot.slane %v3928_v33, %v3970_v18  ;;  %vm1655_vm13 = vcmp.gt.f32.partialorder %v3987_v24, %v3928_v33 }
 0x629   : > { %vm1635_vm12 = vmand %vm1627_vm7, %vm1631_vm11  ;;  %v1611_v38 = vsel %vm4002_vm4, 1, %v2858_v34  ;;  %v1492_v57 = vmul.f32 %v1483_v27, %v3854_v45 }
 0x62a   : > { %vm1532_vm14 = vcmp.gt.f32.partialorder %v3935_v47, %v3991_v25  ;;  %vm1536_vm3 = vcmp.eq.f32.partialorder %v3935_v47, %v3991_v25  ;;  %vm1560_vm15 = vcmp.gt.f32.partialorder %v3940_v11, %v3991_v25  ;;  %vm1564_vm10 = vcmp.eq.f32.partialorder %v3940_v11, %v3991_v25  ;;  %vm4030_vm2 = vmor %vm1623_vm6, %vm1635_vm12 }
 0x62b   : > { %vm1548_vm8 = vmor %vm1532_vm14, %vm1536_vm3  ;;  %vm1592_vm1 = vcmp.gt.f32.partialorder %v3944_v52, %v3991_v25  ;;  %vm1596_vm7 = vcmp.eq.f32.partialorder %v3944_v52, %v3991_v25  ;;  %vm1624_vm11 = vcmp.gt.f32.partialorder %v3955_v15, %v3991_v25  ;;  %vm1628_vm6 = vcmp.eq.f32.partialorder %v3955_v15, %v3991_v25 }
 0x62c   : > { %v1552_v36 = vsel %vm1548_vm8, 1, %v2858_v34  ;;  %vm1576_vm9 = vmor %vm1560_vm15, %vm1564_vm10  ;;  %vm1659_vm12 = vcmp.eq.f32.partialorder %v3987_v24, %v3928_v33  ;;  %v1615_v39 = vadd.s32 %v1611_v38, %v1583_v31  ;;  %vm1751_vm3 = vcmp.gt.f32.partialorder %v4017_v8, %v3928_v33 }
 0x62d   : > { %v1504_v44 = vpop.permute.xlu1 %1503  ;;  %v1580_v37 = vsel %vm1576_vm9, 1, %v2858_v34  ;;  %vm1608_vm14 = vmor %vm1592_vm1, %vm1596_vm7  ;;  %vm1656_vm15 = vcmp.gt.f32.partialorder %v3987_v24, %v3991_v25  ;;  %vm1660_vm10 = vcmp.eq.f32.partialorder %v3987_v24, %v3991_v25  ;;  %vm1687_vm8 = vcmp.gt.f32.partialorder %v4009_v14, %v3928_v33 }
 0x62e   : > { %v1512_v41 = vmul.f32 %v1504_v44, %v3860_v17  ;;  %v1584_v42 = vadd.s32 %v1580_v37, %v1552_v36  ;;  %vm1640_vm4 = vmor %vm1624_vm11, %vm1628_vm6  ;;  %v1612_v46 = vsel %vm1608_vm14, 1, %v2858_v34  ;;  %vm1691_vm1 = vcmp.eq.f32.partialorder %v4009_v14, %v3928_v33 }
 0x62f   : > { %vm1667_vm9 = vmand %vm1659_vm12, %vm1663_vm0  ;;  %v1643_v1 = vsel %vm4030_vm2, 1, %v2858_v34  ;;  %vm1727_vm11 = vcmp.gt.s32.totalorder %v3914_v58, 6  ;;  %v4089_v53 = vsel %vm1751_vm3, 1, %v2858_v34  ;;  %v1644_v40 = vsel %vm1640_vm4, 1, %v2858_v34 }
 0x630   : > { %v1516_v48 = vadd.f32 %v1512_v41, %v1492_v57  ;;  %v1616_v49 = vadd.s32 %v1612_v46, %v1584_v42  ;;  %vm4078_vm7 = vmor %vm1655_vm13, %vm1667_vm9  ;;  %v1647_v51 = vadd.s32 %v1643_v1, %v1615_v39  ;;  %vm1688_vm13 = vcmp.gt.f32.partialorder %v4009_v14, %v3991_v25 }
 0x631   : > { %vm1672_vm2 = vmor %vm1656_vm15, %vm1660_vm10  ;;  %vm1692_vm6 = vcmp.eq.f32.partialorder %v4009_v14, %v3991_v25  ;;  %v4118_v55 = vrot.slane %v3991_v25, %v3919_v6  ;;  %v4133_v3 = vrot.slane %v3991_v25, %v3922_v7  ;;  %v4181_v23 = vrot.slane %v3991_v25, %v3925_v9 }
 0x632   : > { %v4105_v54 = vmul.f32 %v1516_v48, %v3869_v20  ;;  %v1488_v50 = vpop.permute.xlu1 %1487  ;;  %vm1699_vm14 = vmand %vm1691_vm1, %vm1695_vm5  ;;  %v1648_v56 = vadd.s32 %v1644_v40, %v1616_v49  ;;  %v1675_v20 = vsel %vm4078_vm7, 1, %v2858_v34  ;;  %v1676_v60 = vsel %vm1672_vm2, 1, %v2858_v34 }
 0x633   : > { %vm4127_vm5 = vmor %vm1687_vm8, %vm1699_vm14  ;;  %v1679_v5 = vadd.s32 %v1675_v20, %v1647_v51  ;;  %v1493_v16 = vmul.f32 %v1488_v50, %v3854_v45  ;;  %v4198_v35 = vrot.slane %v3991_v25, %v3931_v10 }
 0x634   : > { %vm1533_vm15 = vcmp.gt.f32.partialorder %v3935_v47, %v4105_v54  ;;  %vm1537_vm10 = vcmp.eq.f32.partialorder %v3935_v47, %v4105_v54  ;;  %vm1561_vm9 = vcmp.gt.f32.partialorder %v3940_v11, %v4105_v54  ;;  %vm1565_vm1 = vcmp.eq.f32.partialorder %v3940_v11, %v4105_v54  ;;  %vm4149_vm8 = vmor %vm1688_vm13, %vm1692_vm6 }
 0x635   : > { %vm1549_vm7 = vmor %vm1533_vm15, %vm1537_vm10  ;;  %vm1593_vm2 = vcmp.gt.f32.partialorder %v3944_v52, %v4105_v54  ;;  %vm1597_vm14 = vcmp.eq.f32.partialorder %v3944_v52, %v4105_v54  ;;  %vm1625_vm3 = vcmp.gt.f32.partialorder %v3955_v15, %v4105_v54  ;;  %vm1629_vm4 = vcmp.eq.f32.partialorder %v3955_v15, %v4105_v54 }
 0x636   : > { %v1553_v62 = vsel %vm1549_vm7, 1, %v2858_v34  ;;  %vm1577_vm12 = vmor %vm1561_vm9, %vm1565_vm1  ;;  %vm1657_vm13 = vcmp.gt.f32.partialorder %v3987_v24, %v4105_v54  ;;  %vm1661_vm6 = vcmp.eq.f32.partialorder %v3987_v24, %v4105_v54  ;;  %v1680_v2 = vadd.s32 %v1676_v60, %v1648_v56 }
 0x637   : > { %v1508_v13 = vpop.permute.xlu1 %1507  ;;  %v1581_v59 = vsel %vm1577_vm12, 1, %v2858_v34  ;;  %vm1609_vm15 = vmor %vm1593_vm2, %vm1597_vm14  ;;  %vm1689_vm10 = vcmp.gt.f32.partialorder %v4009_v14, %v4105_v54  ;;  %vm1693_vm0 = vcmp.eq.f32.partialorder %v4009_v14, %v4105_v54  ;;  %v1707_v31 = vsel %vm4127_vm5, 1, %v2858_v34 }
 0x638   : > { %v1513_v22 = vmul.f32 %v1508_v13, %v3860_v17  ;;  %v1585_v12 = vadd.s32 %v1581_v59, %v1553_v62  ;;  %vm1641_vm12 = vmor %vm1625_vm3, %vm1629_vm4  ;;  %v1613_v27 = vsel %vm1609_vm15, 1, %v2858_v34  ;;  %vm1783_vm3 = vcmp.gt.f32.partialorder %v4118_v55, %v3928_v33 }
 0x639   : > { %vm4187_vm9 = vmor %vm1657_vm13, %vm1661_vm6  ;;  %v1645_v57 = vsel %vm1641_vm12, 1, %v2858_v34  ;;  %v1708_v44 = vsel %vm4149_vm8, 1, %v2858_v34  ;;  %v1711_v37 = vadd.s32 %v1707_v31, %v1679_v5  ;;  %vm1721_vm5 = vcmp.gt.f32.partialorder %v4013_v32, %v4105_v54 }
 0x63a   : > { %v1517_v36 = vadd.f32 %v1513_v22, %v1493_v16  ;;  %v1617_v38 = vadd.s32 %v1613_v27, %v1585_v12  ;;  %vm1705_vm4 = vmor %vm1689_vm10, %vm1693_vm0  ;;  %v1712_v39 = vadd.s32 %v1708_v44, %v1680_v2  ;;  %vm1725_vm1 = vcmp.eq.f32.partialorder %v4013_v32, %v4105_v54 }
 0x63b   : > { %vm5117_vm7 = vcmp.eq.f32.partialorder %v4013_v32, %v3928_v33  ;;  %v1677_v46 = vsel %vm4187_vm9, 1, %v2858_v34  ;;  %v1709_v58 = vsel %vm1705_vm4, 1, %v2858_v34  ;;  %vm5118_vm14 = vcmp.gt.f32.partialorder %v4013_v32, %v3928_v33 }
 0x63c   : > { %vm1731_vm2 = vmand %vm5117_vm7, %vm1727_vm11  ;;  %v4221_v41 = vmul.f32 %v1517_v36, %v3882_v26  ;;  %v1649_v42 = vadd.s32 %v1645_v57, %v1617_v38  ;;  %vm5119_vm13 = vcmp.eq.f32.partialorder %v4013_v32, %v3991_v25  ;;  %vm5120_vm6 = vcmp.gt.f32.partialorder %v4013_v32, %v3991_v25 }
 0x63d   : > { %vm1735_vm11 = vmor %vm5118_vm14, %vm1731_vm2  ;;  %v1803_v49 = vsel %vm1783_vm3, 1, %v2858_v34  ;;  %vm1784_vm3 = vcmp.gt.f32.partialorder %v4118_v55, %v3991_v25  ;;  %vm1789_vm0 = vcmp.eq.f32.partialorder %v4118_v55, %v4105_v54 }
 0x63e   : > { %vm4236_vm15 = vmor %vm5120_vm6, %vm5119_vm13  ;;  %v1739_v48 = vsel %vm1735_vm11, 1, %v2858_v34  ;;  %vm1534_vm9 = vcmp.gt.f32.partialorder %v3935_v47, %v4221_v41  ;;  %vm1538_vm4 = vcmp.eq.f32.partialorder %v3935_v47, %v4221_v41  ;;  %vm1562_vm7 = vcmp.gt.f32.partialorder %v3940_v11, %v4221_v41 }
 0x63f   : > { %vm1566_vm2 = vcmp.eq.f32.partialorder %v3940_v11, %v4221_v41  ;;  %vm4263_vm14 = vmor %vm1721_vm5, %vm1725_vm1  ;;  %vm1594_vm10 = vcmp.gt.f32.partialorder %v3944_v52, %v4221_v41  ;;  %vm1598_vm12 = vcmp.eq.f32.partialorder %v3944_v52, %v4221_v41  ;;  %vm1626_vm5 = vcmp.gt.f32.partialorder %v3955_v15, %v4221_v41 }
 0x640   : > { %vm1550_vm6 = vmor %vm1534_vm9, %vm1538_vm4  ;;  %vm1630_vm1 = vcmp.eq.f32.partialorder %v3955_v15, %v4221_v41  ;;  %vm1658_vm9 = vcmp.gt.f32.partialorder %v3987_v24, %v4221_v41  ;;  %vm1662_vm4 = vcmp.eq.f32.partialorder %v3987_v24, %v4221_v41  ;;  %v1681_v11 = vadd.s32 %v1677_v46, %v1649_v42 }
 0x641   : > { %v1554_v47 = vsel %vm1550_vm6, 1, %v2858_v34  ;;  %vm1578_vm11 = vmor %vm1562_vm7, %vm1566_vm2  ;;  %vm1785_vm13 = vcmp.gt.f32.partialorder %v4118_v55, %v4105_v54  ;;  %vm1690_vm6 = vcmp.gt.f32.partialorder %v4009_v14, %v4221_v41  ;;  %vm1694_vm7 = vcmp.eq.f32.partialorder %v4009_v14, %v4221_v41 }
 0x642   : > { %v1582_v52 = vsel %vm1578_vm11, 1, %v2858_v34  ;;  %vm1610_vm8 = vmor %vm1594_vm10, %vm1598_vm12  ;;  %vm1722_vm2 = vcmp.gt.f32.partialorder %v4013_v32, %v4221_v41  ;;  %v1713_v51 = vadd.s32 %v1709_v58, %v1681_v11  ;;  %vm1726_vm10 = vcmp.eq.f32.partialorder %v4013_v32, %v4221_v41 }
 0x643   : > { %v1586_v0 = vadd.s32 %v1582_v52, %v1554_v47  ;;  %v1614_v40 = vsel %vm1610_vm8, 1, %v2858_v34  ;;  %vm1642_vm11 = vmor %vm1626_vm5, %vm1630_vm1  ;;  %vm1824_vm12 = vcmp.gt.s32.totalorder %v3994_v28, 9  ;;  %v1740_v15 = vsel %vm4236_vm15, 1, %v2858_v34 }
 0x644   : > { %v1646_v50 = vsel %vm1642_vm11, 1, %v2858_v34  ;;  %vm1674_vm8 = vmor %vm1658_vm9, %vm1662_vm4  ;;  %v1741_v56 = vsel %vm4263_vm14, 1, %v2858_v34  ;;  %v1743_v20 = vadd.s32 %v1739_v48, %v1711_v37  ;;  %v1744_v24 = vadd.s32 %v1740_v15, %v1712_v39 }
 0x645   : > { %v1618_v60 = vadd.s32 %v1614_v40, %v1586_v0  ;;  %v1678_v63 = vsel %vm1674_vm8, 1, %v2858_v34  ;;  %vm1706_vm1 = vmor %vm1690_vm6, %vm1694_vm7  ;;  %v1745_v4 = vadd.s32 %v1741_v56, %v1713_v51  ;;  %vm1754_vm9 = vcmp.gt.f32.partialorder %v4017_v8, %v4221_v41 }
 0x646   : > { %v1710_v62 = vsel %vm1706_vm1, 1, %v2858_v34  ;;  %vm1738_vm14 = vmor %vm1722_vm2, %vm1726_vm10  ;;  %vm1758_vm4 = vcmp.eq.f32.partialorder %v4017_v8, %v4221_v41  ;;  %v1775_v14 = vadd.s32 %v4089_v53, %v1743_v20  ;;  %vm5125_vm6 = vcmp.eq.f32.partialorder %v4017_v8, %v3991_v25 }
 0x647   : > { %v1650_v5 = vadd.s32 %v1646_v50, %v1618_v60  ;;  %v1742_v13 = vsel %vm1738_vm14, 1, %v2858_v34  ;;  %vm5126_vm7 = vcmp.gt.f32.partialorder %v4017_v8, %v3991_v25  ;;  %vm1786_vm2 = vcmp.gt.f32.partialorder %v4118_v55, %v4221_v41  ;;  %vm1770_vm8 = vmor %vm1754_vm9, %vm1758_vm4 }
 0x648   : > { %vm1768_vm11 = vmor %vm5126_vm7, %vm5125_vm6  ;;  %vm1790_vm10 = vcmp.eq.f32.partialorder %v4118_v55, %v4221_v41  ;;  %vm5127_vm1 = vcmp.eq.f32.partialorder %v4017_v8, %v4105_v54  ;;  %vm5128_vm14 = vcmp.gt.f32.partialorder %v4017_v8, %v4105_v54  ;;  %v1807_v53 = vadd.s32 %v1803_v49, %v1775_v14 }
 0x649   : > { %vm1769_vm15 = vmor %vm5128_vm14, %vm5127_vm1  ;;  %v1772_v32 = vsel %vm1768_vm11, 1, %v2858_v34  ;;  %vm1820_vm7 = vcmp.eq.f32.partialorder %v4133_v3, %v3991_v25  ;;  %v1682_v59 = vadd.s32 %v1678_v63, %v1650_v5  ;;  %vm1821_vm1 = vcmp.eq.f32.partialorder %v4133_v3, %v4105_v54 }
 0x64a   : > { %v1773_v2 = vsel %vm1769_vm15, 1, %v2858_v34  ;;  %v1776_v16 = vadd.s32 %v1772_v32, %v1744_v24  ;;  %v1774_v22 = vsel %vm1770_vm8, 1, %v2858_v34  ;;  %vm5129_vm11 = vcmp.gt.s32.totalorder %v3994_v28, 8 }
 0x64b   : > { %v1777_v12 = vadd.s32 %v1773_v2, %v1745_v4  ;;  %vm5130_vm14 = vcmp.eq.f32.partialorder %v4118_v55, %v3991_v25  ;;  %vm1822_vm5 = vcmp.eq.f32.partialorder %v4133_v3, %v4221_v41  ;;  %vm5131_vm15 = vcmp.gt.f32.partialorder %v4133_v3, %v3928_v33 }
 0x64c   : > { %vm1796_vm6 = vmand %vm5130_vm14, %vm5129_vm11  ;;  %v1835_v8 = vsel %vm5131_vm15, 1, %v2858_v34  ;;  %v1714_v27 = vadd.s32 %v1710_v62, %v1682_v59  ;;  %vm1847_vm4 = vcmp.gt.f32.partialorder %v4181_v23, %v3928_v33  ;;  %vm1848_vm8 = vcmp.gt.f32.partialorder %v4181_v23, %v3991_v25 }
 0x64d   : > { %vm1800_vm9 = vmor %vm1784_vm3, %vm1796_vm6  ;;  %v1839_v30 = vadd.s32 %v1835_v8, %v1807_v53  ;;  %vm1849_vm3 = vcmp.gt.f32.partialorder %v4181_v23, %v4105_v54  ;;  %vm1852_vm15 = vcmp.eq.f32.partialorder %v4181_v23, %v3991_v25  ;;  %v1867_v55 = vsel %vm1847_vm4, 1, %v2858_v34 }
 0x64e   : > { %vm1801_vm14 = vmor %vm1785_vm13, %vm1789_vm0  ;;  %v1804_v31 = vsel %vm1800_vm9, 1, %v2858_v34  ;;  %v1746_v36 = vadd.s32 %v1742_v13, %v1714_v27  ;;  %vm1853_vm0 = vcmp.eq.f32.partialorder %v4181_v23, %v4105_v54  ;;  %vm1854_vm9 = vcmp.eq.f32.partialorder %v4181_v23, %v4221_v41 }
 0x64f   : > { %vm1802_vm11 = vmor %vm1786_vm2, %vm1790_vm10  ;;  %v1805_v38 = vsel %vm1801_vm14, 1, %v2858_v34  ;;  %v1808_v57 = vadd.s32 %v1804_v31, %v1776_v16  ;;  %vm5132_vm2 = vcmp.gt.f32.partialorder %v4133_v3, %v3991_v25  ;;  %v1871_v42 = vadd.s32 %v1867_v55, %v1839_v30 }
 0x650   : > { %v1806_v44 = vsel %vm1802_vm11, 1, %v2858_v34  ;;  %v1809_v37 = vadd.s32 %v1805_v38, %v1777_v12  ;;  %vm1828_vm13 = vmand %vm1820_vm7, %vm1824_vm12  ;;  %v1778_v39 = vadd.s32 %v1774_v22, %v1746_v36  ;;  %vm1879_vm11 = vcmp.gt.f32.partialorder %v4198_v35, %v3928_v33 }
 0x651   : > { %vm1832_vm10 = vmor %vm5132_vm2, %vm1828_vm13  ;;  %vm5133_vm4 = vcmp.gt.f32.partialorder %v4133_v3, %v4105_v54  ;;  %vm1881_vm13 = vcmp.gt.f32.partialorder %v4198_v35, %v4105_v54  ;;  %vm1884_vm12 = vcmp.eq.f32.partialorder %v4198_v35, %v3991_v25  ;;  %vm5134_vm7 = vcmp.gt.f32.partialorder %v4133_v3, %v4221_v41 }
 0x652   : > { %vm1833_vm14 = vmor %vm5133_vm4, %vm1821_vm1  ;;  %v1836_v46 = vsel %vm1832_vm10, 1, %v2858_v34  ;;  %v1810_v58 = vadd.s32 %v1806_v44, %v1778_v39  ;;  %vm1885_vm1 = vcmp.eq.f32.partialorder %v4198_v35, %v4105_v54  ;;  %vm5135_vm10 = vcmp.gt.s32.totalorder %v3994_v28, 10 }
 0x653   : > { %vm1834_vm6 = vmor %vm5134_vm7, %vm1822_vm5  ;;  %v1837_v26 = vsel %vm1833_vm14, 1, %v2858_v34  ;;  %v1840_v48 = vadd.s32 %v1836_v46, %v1808_v57  ;;  %vm1886_vm2 = vcmp.eq.f32.partialorder %v4198_v35, %v4221_v41  ;;  %v1899_v3 = vsel %vm1879_vm11, 1, %v2858_v34 }
 0x654   : > { %v1838_v49 = vsel %vm1834_vm6, 1, %v2858_v34  ;;  %v1841_v1 = vadd.s32 %v1837_v26, %v1809_v37  ;;  %vm1860_vm4 = vmand %vm1852_vm15, %vm5135_vm10  ;;  %v1903_v11 = vadd.s32 %v1899_v3, %v1871_v42  ;;  %v1910_v52 = vrot.slane %v3991_v25, %v3960_v61 }
 0x655   : > { %v1842_v47 = vadd.s32 %v1838_v49, %v1810_v58  ;;  %vm1864_vm5 = vmor %vm1848_vm8, %vm1860_vm4  ;;  %v4476_v0 = vrot.slane %v3991_v25, %v3970_v18  ;;  %v4488_v51 = vrot.slane %v3991_v25, %v3973_v19  ;;  %v4492_v50 = vrot.slane %v3991_v25, %v3976_v21 }
 0x656   : > { %vm1865_vm15 = vmor %vm1849_vm3, %vm1853_vm0  ;;  %v1868_v40 = vsel %vm1864_vm5, 1, %v2858_v34  ;;  %v4496_v15 = vrot.slane %v4105_v54, %v3919_v6  ;;  %vm5136_vm8 = vcmp.gt.f32.partialorder %v4181_v23, %v4221_v41  ;;  %vm1911_vm0 = vcmp.gt.f32.partialorder %v1910_v52, %v3928_v33 }
 0x657   : > { %vm1866_vm3 = vmor %vm5136_vm8, %vm1854_vm9  ;;  %v1869_v56 = vsel %vm1865_vm15, 1, %v2858_v34  ;;  %v1872_v20 = vadd.s32 %v1868_v40, %v1840_v48  ;;  %vm1912_vm11 = vcmp.gt.f32.partialorder %v1910_v52, %v3991_v25  ;;  %vm5137_vm7 = vcmp.gt.s32.totalorder %v3994_v28, 11 }
 0x658   : > { %v1870_v60 = vsel %vm1866_vm3, 1, %v2858_v34  ;;  %v1873_v63 = vadd.s32 %v1869_v56, %v1841_v1  ;;  %vm1892_vm14 = vmand %vm1884_vm12, %vm5137_vm7  ;;  %vm1913_vm10 = vcmp.gt.f32.partialorder %v1910_v52, %v4105_v54  ;;  %vm1914_vm9 = vcmp.gt.f32.partialorder %v1910_v52, %v4221_v41 }
 0x659   : > { %v1874_v23 = vadd.s32 %v1870_v60, %v1842_v47  ;;  %vm5138_vm4 = vcmp.gt.f32.partialorder %v4198_v35, %v3991_v25  ;;  %vm1916_vm15 = vcmp.eq.f32.partialorder %v1910_v52, %v3991_v25  ;;  %vm1917_vm8 = vcmp.eq.f32.partialorder %v1910_v52, %v4105_v54  ;;  %vm1897_vm12 = vmor %vm1881_vm13, %vm1885_vm1 }
 0x65a   : > { %vm1896_vm5 = vmor %vm5138_vm4, %vm1892_vm14  ;;  %vm1918_vm3 = vcmp.eq.f32.partialorder %v1910_v52, %v4221_v41  ;;  %v1931_v4 = vsel %vm1911_vm0, 1, %v2858_v34  ;;  %vm1943_vm7 = vcmp.gt.f32.partialorder %v4476_v0, %v3928_v33  ;;  %vm1944_vm14 = vcmp.gt.f32.partialorder %v4476_v0, %v3991_v25 }
 0x65b   : > { %v1900_v24 = vsel %vm1896_vm5, 1, %v2858_v34  ;;  %vm5139_vm4 = vcmp.gt.f32.partialorder %v4198_v35, %v4221_v41  ;;  %v1901_v62 = vsel %vm1897_vm12, 1, %v2858_v34  ;;  %v1935_v5 = vadd.s32 %v1931_v4, %v1903_v11 }
 0x65c   : > { %vm1898_vm6 = vmor %vm5139_vm4, %vm1886_vm2  ;;  %v1904_v14 = vadd.s32 %v1900_v24, %v1872_v20  ;;  %vm1945_vm13 = vcmp.gt.f32.partialorder %v4476_v0, %v4105_v54  ;;  %v1905_v32 = vadd.s32 %v1901_v62, %v1873_v63  ;;  %vm5140_vm1 = vcmp.gt.s32.totalorder %v3994_v28, 12 }
 0x65d   : > { %v1902_v13 = vsel %vm1898_vm6, 1, %v2858_v34  ;;  %vm1924_vm0 = vmand %vm1916_vm15, %vm5140_vm1  ;;  %vm1946_vm5 = vcmp.gt.f32.partialorder %v4476_v0, %v4221_v41  ;;  %vm1948_vm2 = vcmp.eq.f32.partialorder %v4476_v0, %v3991_v25  ;;  %vm1949_vm4 = vcmp.eq.f32.partialorder %v4476_v0, %v4105_v54 }
 0x65e   : > { %v1906_v35 = vadd.s32 %v1902_v13, %v1874_v23  ;;  %vm1928_vm12 = vmor %vm1912_vm11, %vm1924_vm0  ;;  %vm1950_vm6 = vcmp.eq.f32.partialorder %v4476_v0, %v4221_v41  ;;  %v1963_v53 = vsel %vm1943_vm7, 1, %v2858_v34  ;;  %vm1975_vm11 = vcmp.gt.f32.partialorder %v4488_v51, %v3928_v33 }
 0x65f   : > { %vm1929_vm15 = vmor %vm1913_vm10, %vm1917_vm8  ;;  %v1932_v59 = vsel %vm1928_vm12, 1, %v2858_v34  ;;  %v1967_v2 = vadd.s32 %v1963_v53, %v1935_v5  ;;  %vm1976_vm1 = vcmp.gt.f32.partialorder %v4488_v51, %v3991_v25  ;;  %vm1977_vm10 = vcmp.gt.f32.partialorder %v4488_v51, %v4105_v54 }
 0x660   : > { %vm1930_vm0 = vmor %vm1914_vm9, %vm1918_vm3  ;;  %v1933_v16 = vsel %vm1929_vm15, 1, %v2858_v34  ;;  %v1936_v22 = vadd.s32 %v1932_v59, %v1904_v14  ;;  %vm1978_vm8 = vcmp.gt.f32.partialorder %v4488_v51, %v4221_v41  ;;  %vm5141_vm12 = vcmp.gt.s32.totalorder %v3994_v28, 13 }
 0x661   : > { %v1934_v12 = vsel %vm1930_vm0, 1, %v2858_v34  ;;  %v1937_v8 = vadd.s32 %v1933_v16, %v1905_v32  ;;  %vm1956_vm9 = vmand %vm1948_vm2, %vm5141_vm12  ;;  %vm1980_vm3 = vcmp.eq.f32.partialorder %v4488_v51, %v3991_v25  ;;  %vm1981_vm15 = vcmp.eq.f32.partialorder %v4488_v51, %v4105_v54 }
 0x662   : > { %v1938_v27 = vadd.s32 %v1934_v12, %v1906_v35  ;;  %vm1960_vm7 = vmor %vm1944_vm14, %vm1956_vm9  ;;  %vm1982_vm0 = vcmp.eq.f32.partialorder %v4488_v51, %v4221_v41  ;;  %v1995_v30 = vsel %vm1975_vm11, 1, %v2858_v34  ;;  %vm2007_vm2 = vcmp.gt.f32.partialorder %v4492_v50, %v3928_v33 }
 0x663   : > { %vm1961_vm12 = vmor %vm1945_vm13, %vm1949_vm4  ;;  %v1964_v31 = vsel %vm1960_vm7, 1, %v2858_v34  ;;  %v1999_v36 = vadd.s32 %v1995_v30, %v1967_v2  ;;  %vm2008_vm14 = vcmp.gt.f32.partialorder %v4492_v50, %v3991_v25  ;;  %vm2010_vm13 = vcmp.gt.f32.partialorder %v4492_v50, %v4221_v41 }
 0x664   : > { %vm1962_vm11 = vmor %vm1946_vm5, %vm1950_vm6  ;;  %v1965_v38 = vsel %vm1961_vm12, 1, %v2858_v34  ;;  %v1968_v57 = vadd.s32 %v1964_v31, %v1936_v22  ;;  %vm2013_vm4 = vcmp.eq.f32.partialorder %v4492_v50, %v4105_v54  ;;  %vm2081_vm7 = vcmp.gt.s32.totalorder %v3997_v29, 17 }
 0x665   : > { %v1966_v44 = vsel %vm1962_vm11, 1, %v2858_v34  ;;  %v1969_v37 = vadd.s32 %v1965_v38, %v1937_v8  ;;  %vm5142_vm9 = vcmp.gt.s32.totalorder %v3994_v28, 14  ;;  %vm2014_vm6 = vcmp.eq.f32.partialorder %v4492_v50, %v4221_v41 }
 0x666   : > { %vm1988_vm5 = vmand %vm1980_vm3, %vm5142_vm9  ;;  %v2027_v55 = vsel %vm2007_vm2, 1, %v2858_v34  ;;  %v1970_v39 = vadd.s32 %v1966_v44, %v1938_v27  ;;  %v2028_v28 = vsel %vm2008_vm14, 1, %v2858_v34  ;;  %vm2039_vm3 = vcmp.gt.f32.partialorder %v4496_v15, %v3928_v33 }
 0x667   : > { %vm1992_vm12 = vmor %vm1976_vm1, %vm1988_vm5  ;;  %v2031_v42 = vadd.s32 %v2027_v55, %v1999_v36  ;;  %vm2040_vm1 = vcmp.gt.f32.partialorder %v4496_v15, %v3991_v25  ;;  %vm2041_vm9 = vcmp.gt.f32.partialorder %v4496_v15, %v4105_v54  ;;  %vm2042_vm14 = vcmp.gt.f32.partialorder %v4496_v15, %v4221_v41 }
 0x668   : > { %vm1993_vm2 = vmor %vm1977_vm10, %vm1981_vm15  ;;  %v1996_v46 = vsel %vm1992_vm12, 1, %v2858_v34  ;;  %vm2045_vm15 = vcmp.eq.f32.partialorder %v4496_v15, %v4105_v54  ;;  %vm2046_vm5 = vcmp.eq.f32.partialorder %v4496_v15, %v4221_v41  ;;  %vm5143_vm12 = vcmp.gt.f32.partialorder %v4492_v50, %v4105_v54 }
 0x669   : > { %vm1994_vm10 = vmor %vm1978_vm8, %vm1982_vm0  ;;  %v1997_v58 = vsel %vm1993_vm2, 1, %v2858_v34  ;;  %v2000_v26 = vadd.s32 %v1996_v46, %v1968_v57  ;;  %v2059_v1 = vsel %vm2039_vm3, 1, %v2858_v34  ;;  %v2060_v3 = vsel %vm2040_vm1, 1, %v2858_v34 }
 0x66a   : > { %v1998_v48 = vsel %vm1994_vm10, 1, %v2858_v34  ;;  %v2001_v49 = vadd.s32 %v1997_v58, %v1969_v37  ;;  %vm2025_vm11 = vmor %vm5143_vm12, %vm2013_vm4  ;;  %v2063_v0 = vadd.s32 %v2059_v1, %v2031_v42  ;;  %vm5144_vm0 = vcmp.gt.s32.totalorder %v3997_v29, 16 }
 0x66b   : > { %v2002_v47 = vadd.s32 %v1998_v48, %v1970_v39  ;;  %vm2026_vm8 = vmor %vm2010_vm13, %vm2014_vm6  ;;  %v2029_v11 = vsel %vm2025_vm11, 1, %v2858_v34  ;;  %v2032_v52 = vadd.s32 %v2028_v28, %v2000_v26  ;;  %v2070_v56 = vrot.slane %v4105_v54, %v3922_v7 }
 0x66c   : > { %v2030_v40 = vsel %vm2026_vm8, 1, %v2858_v34  ;;  %v2033_v51 = vadd.s32 %v2029_v11, %v2001_v49  ;;  %vm2053_vm4 = vmand %vm2045_vm15, %vm5144_vm0  ;;  %v2102_v20 = vrot.slane %v4105_v54, %v3925_v9  ;;  %vm2145_vm3 = vcmp.gt.s32.totalorder %v3997_v29, 19 }
 0x66d   : > { %v2034_v50 = vadd.s32 %v2030_v40, %v2002_v47  ;;  %vm2057_vm13 = vmor %vm2041_vm9, %vm2053_vm4  ;;  %v2064_v60 = vadd.s32 %v2060_v3, %v2032_v52  ;;  %v2134_v63 = vrot.slane %v4105_v54, %v3931_v10  ;;  %v4705_v23 = vrot.slane %v4105_v54, %v3960_v61 }
 0x66e   : > { %vm2058_vm6 = vmor %vm2042_vm14, %vm2046_vm5  ;;  %v2061_v24 = vsel %vm2057_vm13, 1, %v2858_v34  ;;  %vm2071_vm2 = vcmp.gt.f32.partialorder %v2070_v56, %v3928_v33  ;;  %vm2072_vm1 = vcmp.gt.f32.partialorder %v2070_v56, %v3991_v25  ;;  %vm2073_vm9 = vcmp.gt.f32.partialorder %v2070_v56, %v4105_v54 }
 0x66f   : > { %v2062_v4 = vsel %vm2058_vm6, 1, %v2858_v34  ;;  %v2065_v62 = vadd.s32 %v2061_v24, %v2033_v51  ;;  %vm2074_vm11 = vcmp.gt.f32.partialorder %v2070_v56, %v4221_v41  ;;  %vm2077_vm10 = vcmp.eq.f32.partialorder %v2070_v56, %v4105_v54 }
 0x670   : > { %vm2177_vm15 = vcmp.gt.s32.totalorder %v3997_v29, 20  ;;  %v2066_v14 = vadd.s32 %v2062_v4, %v2034_v50  ;;  %vm2078_vm14 = vcmp.eq.f32.partialorder %v2070_v56, %v4221_v41  ;;  %vm2085_vm5 = vmand %vm2077_vm10, %vm2081_vm7  ;;  %v2091_v15 = vsel %vm2071_vm2, 1, %v2858_v34 }
 0x671   : > { %v2092_v5 = vsel %vm2072_vm1, 1, %v2858_v34  ;;  %vm2089_vm12 = vmor %vm2073_vm9, %vm2085_vm5  ;;  %v2095_v13 = vadd.s32 %v2091_v15, %v2063_v0  ;;  %vm2103_vm8 = vcmp.gt.f32.partialorder %v2102_v20, %v3928_v33  ;;  %vm2104_vm0 = vcmp.gt.f32.partialorder %v2102_v20, %v3991_v25 }
 0x672   : > { %v2096_v32 = vadd.s32 %v2092_v5, %v2064_v60  ;;  %vm2090_vm4 = vmor %vm2074_vm11, %vm2078_vm14  ;;  %v2093_v35 = vsel %vm2089_vm12, 1, %v2858_v34  ;;  %vm2105_vm13 = vcmp.gt.f32.partialorder %v2102_v20, %v4105_v54  ;;  %vm2106_vm6 = vcmp.gt.f32.partialorder %v2102_v20, %v4221_v41 }
 0x673   : > { %vm2109_vm7 = vcmp.eq.f32.partialorder %v2102_v20, %v4105_v54  ;;  %v2094_v53 = vsel %vm2090_vm4, 1, %v2858_v34  ;;  %v2097_v59 = vadd.s32 %v2093_v35, %v2065_v62  ;;  %vm2110_vm2 = vcmp.eq.f32.partialorder %v2102_v20, %v4221_v41 }
 0x674   : > { %vm5145_vm1 = vcmp.gt.s32.totalorder %v3997_v29, 18  ;;  %v2123_v2 = vsel %vm2103_vm8, 1, %v2858_v34  ;;  %v2098_v16 = vadd.s32 %v2094_v53, %v2066_v14  ;;  %v2124_v22 = vsel %vm2104_vm0, 1, %v2858_v34  ;;  %vm2122_vm5 = vmor %vm2106_vm6, %vm2110_vm2 }
 0x675   : > { %vm2117_vm9 = vmand %vm2109_vm7, %vm5145_vm1  ;;  %v2127_v12 = vadd.s32 %v2123_v2, %v2095_v13  ;;  %vm2135_vm10 = vcmp.gt.f32.partialorder %v2134_v63, %v3928_v33  ;;  %vm2209_vm14 = vcmp.gt.s32.totalorder %v3997_v29, 21  ;;  %v2128_v27 = vadd.s32 %v2124_v22, %v2096_v32 }
 0x676   : > { %vm2121_vm11 = vmor %vm2105_vm13, %vm2117_vm9  ;;  %vm2136_vm12 = vcmp.gt.f32.partialorder %v2134_v63, %v3991_v25  ;;  %vm2137_vm4 = vcmp.gt.f32.partialorder %v2134_v63, %v4105_v54  ;;  %v2126_v30 = vsel %vm2122_vm5, 1, %v2858_v34  ;;  %vm2138_vm8 = vcmp.gt.f32.partialorder %v2134_v63, %v4221_v41 }
 0x677   : > { %v2125_v8 = vsel %vm2121_vm11, 1, %v2858_v34  ;;  %vm2141_vm0 = vcmp.eq.f32.partialorder %v2134_v63, %v4105_v54  ;;  %v2130_v36 = vadd.s32 %v2126_v30, %v2098_v16  ;;  %vm2142_vm13 = vcmp.eq.f32.partialorder %v2134_v63, %v4221_v41 }
 0x678   : > { %v2129_v31 = vadd.s32 %v2125_v8, %v2097_v59  ;;  %vm2149_vm6 = vmand %vm2141_vm0, %vm2145_vm3  ;;  %v2155_v38 = vsel %vm2135_vm10, 1, %v2858_v34  ;;  %v2156_v57 = vsel %vm2136_vm12, 1, %v2858_v34  ;;  %vm2241_vm7 = vcmp.gt.s32.totalorder %v3997_v29, 22 }
 0x679   : > { %vm2153_vm2 = vmor %vm2137_vm4, %vm2149_vm6  ;;  %v2159_v44 = vadd.s32 %v2155_v38, %v2127_v12  ;;  %v2160_v37 = vadd.s32 %v2156_v57, %v2128_v27  ;;  %vm2167_vm1 = vcmp.gt.f32.partialorder %v4705_v23, %v3928_v33  ;;  %vm2168_vm9 = vcmp.gt.f32.partialorder %v4705_v23, %v3991_v25 }
 0x67a   : > { %vm2154_vm11 = vmor %vm2138_vm8, %vm2142_vm13  ;;  %v2157_v55 = vsel %vm2153_vm2, 1, %v2858_v34  ;;  %vm2169_vm3 = vcmp.gt.f32.partialorder %v4705_v23, %v4105_v54  ;;  %vm2170_vm10 = vcmp.gt.f32.partialorder %v4705_v23, %v4221_v41  ;;  %vm2173_vm5 = vcmp.eq.f32.partialorder %v4705_v23, %v4105_v54 }
 0x67b   : > { %v2158_v39 = vsel %vm2154_vm11, 1, %v2858_v34  ;;  %v2161_v28 = vadd.s32 %v2157_v55, %v2129_v31  ;;  %vm2174_vm12 = vcmp.eq.f32.partialorder %v4705_v23, %v4221_v41  ;;  %vm2181_vm4 = vmand %vm2173_vm5, %vm2177_vm15  ;;  %v2187_v42 = vsel %vm2167_vm1, 1, %v2858_v34 }
 0x67c   : > { %v2162_v46 = vadd.s32 %v2158_v39, %v2130_v36  ;;  %vm2185_vm8 = vmor %vm2169_vm3, %vm2181_vm4  ;;  %v2188_v58 = vsel %vm2168_vm9, 1, %v2858_v34  ;;  %v2191_v26 = vadd.s32 %v2187_v42, %v2159_v44  ;;  %v2198_v48 = vrot.slane %v4105_v54, %v3970_v18 }
 0x67d   : > { %vm2186_vm0 = vmor %vm2170_vm10, %vm2174_vm12  ;;  %v2189_v49 = vsel %vm2185_vm8, 1, %v2858_v34  ;;  %v2192_v1 = vadd.s32 %v2188_v58, %v2160_v37  ;;  %v2230_v3 = vrot.slane %v4105_v54, %v3973_v19  ;;  %v2262_v47 = vrot.slane %v4105_v54, %v3976_v21 }
 0x67e   : > { %v2190_v11 = vsel %vm2186_vm0, 1, %v2858_v34  ;;  %v2193_v52 = vadd.s32 %v2189_v49, %v2161_v28  ;;  %vm2199_vm15 = vcmp.gt.f32.partialorder %v2198_v48, %v3928_v33  ;;  %vm2200_vm13 = vcmp.gt.f32.partialorder %v2198_v48, %v3991_v25 }
 0x67f   : > { %v2194_v0 = vadd.s32 %v2190_v11, %v2162_v46  ;;  %vm2201_vm6 = vcmp.gt.f32.partialorder %v2198_v48, %v4105_v54  ;;  %vm2202_vm2 = vcmp.gt.f32.partialorder %v2198_v48, %v4221_v41  ;;  %vm2205_vm1 = vcmp.eq.f32.partialorder %v2198_v48, %v4105_v54 }
 0x680   : > { %vm2206_vm9 = vcmp.eq.f32.partialorder %v2198_v48, %v4221_v41  ;;  %vm2213_vm11 = vmand %vm2205_vm1, %vm2209_vm14  ;;  %v2219_v40 = vsel %vm2199_vm15, 1, %v2858_v34  ;;  %v2220_v51 = vsel %vm2200_vm13, 1, %v2858_v34  ;;  %vm2231_vm3 = vcmp.gt.f32.partialorder %v2230_v3, %v3928_v33 }
 0x681   : > { %vm2217_vm10 = vmor %vm2201_vm6, %vm2213_vm11  ;;  %v2223_v56 = vadd.s32 %v2219_v40, %v2191_v26  ;;  %v2224_v20 = vadd.s32 %v2220_v51, %v2192_v1  ;;  %vm2232_vm5 = vcmp.gt.f32.partialorder %v2230_v3, %v3991_v25  ;;  %vm2233_vm12 = vcmp.gt.f32.partialorder %v2230_v3, %v4105_v54 }
 0x682   : > { %vm2306_vm4 = vcmp.gt.s32.totalorder %v4063_v43, 24  ;;  %vm2218_vm8 = vmor %vm2202_vm2, %vm2206_vm9  ;;  %v2221_v50 = vsel %vm2217_vm10, 1, %v2858_v34  ;;  %vm2234_vm14 = vcmp.gt.f32.partialorder %v2230_v3, %v4221_v41  ;;  %vm2237_vm0 = vcmp.eq.f32.partialorder %v2230_v3, %v4105_v54 }
 0x683   : > { %vm2238_vm15 = vcmp.eq.f32.partialorder %v2230_v3, %v4221_v41  ;;  %v2222_v60 = vsel %vm2218_vm8, 1, %v2858_v34  ;;  %v2225_v63 = vadd.s32 %v2221_v50, %v2193_v52  ;;  %vm2245_vm13 = vmand %vm2237_vm0, %vm2241_vm7  ;;  %v2251_v23 = vsel %vm2231_vm3, 1, %v2858_v34 }
 0x684   : > { %v2252_v24 = vsel %vm2232_vm5, 1, %v2858_v34  ;;  %vm2338_vm6 = vcmp.gt.s32.totalorder %v4063_v43, 25  ;;  %v2226_v4 = vadd.s32 %v2222_v60, %v2194_v0  ;;  %vm2249_vm2 = vmor %vm2233_vm12, %vm2245_vm13  ;;  %v2255_v62 = vadd.s32 %v2251_v23, %v2223_v56 }
 0x685   : > { %v2256_v14 = vadd.s32 %v2252_v24, %v2224_v20  ;;  %vm2263_vm1 = vcmp.gt.f32.partialorder %v2262_v47, %v3928_v33  ;;  %vm2250_vm9 = vmor %vm2234_vm14, %vm2238_vm15  ;;  %v2253_v15 = vsel %vm2249_vm2, 1, %v2858_v34  ;;  %vm2264_vm11 = vcmp.gt.f32.partialorder %v2262_v47, %v3991_v25 }
 0x686   : > { %vm2265_vm7 = vcmp.gt.f32.partialorder %v2262_v47, %v4105_v54  ;;  %vm2266_vm10 = vcmp.gt.f32.partialorder %v2262_v47, %v4221_v41  ;;  %v2254_v29 = vsel %vm2250_vm9, 1, %v2858_v34  ;;  %v2257_v5 = vadd.s32 %v2253_v15, %v2225_v63 }
 0x687   : > { %vm2270_vm3 = vcmp.eq.f32.partialorder %v2262_v47, %v4221_v41  ;;  %v2283_v13 = vsel %vm2263_vm1, 1, %v2858_v34  ;;  %v2258_v32 = vadd.s32 %v2254_v29, %v2226_v4  ;;  %v2284_v35 = vsel %vm2264_vm11, 1, %v2858_v34 }
 0x688   : > { %vm2282_vm5 = vmor %vm2266_vm10, %vm2270_vm3  ;;  %v2285_v53 = vsel %vm2265_vm7, 1, %v2858_v34  ;;  %v2287_v59 = vadd.s32 %v2283_v13, %v2255_v62  ;;  %vm2370_vm12 = vcmp.gt.s32.totalorder %v4063_v43, 26  ;;  %v2288_v16 = vadd.s32 %v2284_v35, %v2256_v14 }
 0x689   : > { %v2286_v2 = vsel %vm2282_vm5, 1, %v2858_v34  ;;  %v2289_v22 = vadd.s32 %v2285_v53, %v2257_v5  ;;  %v2294_v12 = vrot.slane %v4221_v41, %v3919_v6  ;;  %v2326_v27 = vrot.slane %v4221_v41, %v3922_v7 }
 0x68a   : > { %v2290_v8 = vadd.s32 %v2286_v2, %v2258_v32  ;;  %v2358_v30 = vrot.slane %v4221_v41, %v3925_v9  ;;  %v2390_v31 = vrot.slane %v4221_v41, %v3931_v10  ;;  %vm2402_vm13 = vcmp.gt.s32.totalorder %v4063_v43, 27 }
 0x68b   : > { %vm2295_vm8 = vcmp.gt.f32.partialorder %v2294_v12, %v3928_v33  ;;  %vm2296_vm14 = vcmp.gt.f32.partialorder %v2294_v12, %v3991_v25  ;;  %vm2297_vm0 = vcmp.gt.f32.partialorder %v2294_v12, %v4105_v54  ;;  %vm2298_vm15 = vcmp.gt.f32.partialorder %v2294_v12, %v4221_v41 }
 0x68c   : > { %vm2302_vm2 = vcmp.eq.f32.partialorder %v2294_v12, %v4221_v41  ;;  %v2315_v6 = vsel %vm2295_vm8, 1, %v2858_v34  ;;  %v2316_v7 = vsel %vm2296_vm14, 1, %v2858_v34  ;;  %v2317_v9 = vsel %vm2297_vm0, 1, %v2858_v34 }
 0x68d   : > { %vm2310_vm1 = vmand %vm2302_vm2, %vm2306_vm4  ;;  %v2319_v10 = vadd.s32 %v2315_v6, %v2287_v59  ;;  %v2320_v36 = vadd.s32 %v2316_v7, %v2288_v16  ;;  %v2321_v38 = vadd.s32 %v2317_v9, %v2289_v22  ;;  %vm2327_vm9 = vcmp.gt.f32.partialorder %v2326_v27, %v3928_v33 }
 0x68e   : > { %vm2314_vm11 = vmor %vm2298_vm15, %vm2310_vm1  ;;  %vm2328_vm7 = vcmp.gt.f32.partialorder %v2326_v27, %v3991_v25  ;;  %vm2329_vm10 = vcmp.gt.f32.partialorder %v2326_v27, %v4105_v54  ;;  %vm2330_vm3 = vcmp.gt.f32.partialorder %v2326_v27, %v4221_v41  ;;  %vm2334_vm5 = vcmp.eq.f32.partialorder %v2326_v27, %v4221_v41 }
 0x68f   : > { %v2318_v57 = vsel %vm2314_vm11, 1, %v2858_v34  ;;  %vm2342_vm8 = vmand %vm2334_vm5, %vm2338_vm6  ;;  %v2347_v44 = vsel %vm2327_vm9, 1, %v2858_v34  ;;  %v2348_v37 = vsel %vm2328_vm7, 1, %v2858_v34  ;;  %v2349_v55 = vsel %vm2329_vm10, 1, %v2858_v34 }
 0x690   : > { %v2322_v39 = vadd.s32 %v2318_v57, %v2290_v8  ;;  %vm2346_vm4 = vmor %vm2330_vm3, %vm2342_vm8  ;;  %v2351_v28 = vadd.s32 %v2347_v44, %v2319_v10  ;;  %v2352_v42 = vadd.s32 %v2348_v37, %v2320_v36  ;;  %v2353_v46 = vadd.s32 %v2349_v55, %v2321_v38 }
 0x691   : > { %vm2434_vm14 = vcmp.gt.s32.totalorder %v4063_v43, 28  ;;  %v2350_v58 = vsel %vm2346_vm4, 1, %v2858_v34  ;;  %vm2359_vm0 = vcmp.gt.f32.partialorder %v2358_v30, %v3928_v33  ;;  %vm2360_vm15 = vcmp.gt.f32.partialorder %v2358_v30, %v3991_v25 }
 0x692   : > { %vm2361_vm6 = vcmp.gt.f32.partialorder %v2358_v30, %v4105_v54  ;;  %v2354_v26 = vadd.s32 %v2350_v58, %v2322_v39  ;;  %vm2362_vm2 = vcmp.gt.f32.partialorder %v2358_v30, %v4221_v41  ;;  %vm2366_vm1 = vcmp.eq.f32.partialorder %v2358_v30, %v4221_v41 }
 0x693   : > { %v2379_v48 = vsel %vm2359_vm0, 1, %v2858_v34  ;;  %vm2374_vm9 = vmand %vm2366_vm1, %vm2370_vm12  ;;  %v2380_v49 = vsel %vm2360_vm15, 1, %v2858_v34  ;;  %v2381_v1 = vsel %vm2361_vm6, 1, %v2858_v34  ;;  %vm2391_vm11 = vcmp.gt.f32.partialorder %v2390_v31, %v3928_v33 }
 0x694   : > { %v2383_v3 = vadd.s32 %v2379_v48, %v2351_v28  ;;  %vm2378_vm7 = vmor %vm2362_vm2, %vm2374_vm9  ;;  %v2384_v47 = vadd.s32 %v2380_v49, %v2352_v42  ;;  %v2385_v11 = vadd.s32 %v2381_v1, %v2353_v46  ;;  %vm2392_vm10 = vcmp.gt.f32.partialorder %v2390_v31, %v3991_v25 }
 0x695   : > { %vm2393_vm3 = vcmp.gt.f32.partialorder %v2390_v31, %v4105_v54  ;;  %v2382_v52 = vsel %vm2378_vm7, 1, %v2858_v34  ;;  %vm2394_vm5 = vcmp.gt.f32.partialorder %v2390_v31, %v4221_v41  ;;  %vm2398_vm12 = vcmp.eq.f32.partialorder %v2390_v31, %v4221_v41 }
 0x696   : > { %vm2466_vm8 = vcmp.gt.s32.totalorder %v4063_v43, 29  ;;  %v2386_v0 = vadd.s32 %v2382_v52, %v2354_v26  ;;  %vm2406_vm4 = vmand %vm2398_vm12, %vm2402_vm13  ;;  %v2411_v40 = vsel %vm2391_vm11, 1, %v2858_v34  ;;  %v2412_v51 = vsel %vm2392_vm10, 1, %v2858_v34 }
 0x697   : > { %v2413_v56 = vsel %vm2393_vm3, 1, %v2858_v34  ;;  %vm2498_vm0 = vcmp.gt.s32.totalorder %v4063_v43, 30  ;;  %vm2410_vm15 = vmor %vm2394_vm5, %vm2406_vm4  ;;  %v2415_v20 = vadd.s32 %v2411_v40, %v2383_v3  ;;  %v2416_v50 = vadd.s32 %v2412_v51, %v2384_v47 }
 0x698   : > { %v2422_v60 = vrot.slane %v4221_v41, %v3960_v61  ;;  %v2454_v63 = vrot.slane %v4221_v41, %v3970_v18  ;;  %v2414_v23 = vsel %vm2410_vm15, 1, %v2858_v34  ;;  %v2417_v24 = vadd.s32 %v2413_v56, %v2385_v11 }
 0x699   : > { %v2486_v4 = vrot.slane %v4221_v41, %v3973_v19  ;;  %v2518_v62 = vrot.slane %v4221_v41, %v3976_v21  ;;  %v2418_v14 = vadd.s32 %v2414_v23, %v2386_v0 }
 0x69a   : > { %vm2423_vm13 = vcmp.gt.f32.partialorder %v2422_v60, %v3928_v33  ;;  %vm2424_vm6 = vcmp.gt.f32.partialorder %v2422_v60, %v3991_v25  ;;  %vm2425_vm2 = vcmp.gt.f32.partialorder %v2422_v60, %v4105_v54  ;;  %vm2426_vm1 = vcmp.gt.f32.partialorder %v2422_v60, %v4221_v41 }
 0x69b   : > { %vm2430_vm9 = vcmp.eq.f32.partialorder %v2422_v60, %v4221_v41  ;;  %v2443_v61 = vsel %vm2423_vm13, 1, %v2858_v34  ;;  %v2444_v18 = vsel %vm2424_vm6, 1, %v2858_v34  ;;  %v2445_v19 = vsel %vm2425_vm2, 1, %v2858_v34 }
 0x69c   : > { %vm2438_vm11 = vmand %vm2430_vm9, %vm2434_vm14  ;;  %v2447_v21 = vadd.s32 %v2443_v61, %v2415_v20  ;;  %v2448_v15 = vadd.s32 %v2444_v18, %v2416_v50  ;;  %vm2455_vm7 = vcmp.gt.f32.partialorder %v2454_v63, %v3928_v33  ;;  %v2449_v29 = vadd.s32 %v2445_v19, %v2417_v24 }
 0x69d   : > { %vm2442_vm10 = vmor %vm2426_vm1, %vm2438_vm11  ;;  %vm2456_vm3 = vcmp.gt.f32.partialorder %v2454_v63, %v3991_v25  ;;  %vm2457_vm5 = vcmp.gt.f32.partialorder %v2454_v63, %v4105_v54  ;;  %vm2458_vm12 = vcmp.gt.f32.partialorder %v2454_v63, %v4221_v41  ;;  %vm2462_vm4 = vcmp.eq.f32.partialorder %v2454_v63, %v4221_v41 }
 0x69e   : > { %v2446_v5 = vsel %vm2442_vm10, 1, %v2858_v34  ;;  %v2475_v13 = vsel %vm2455_vm7, 1, %v2858_v34  ;;  %v2476_v32 = vsel %vm2456_vm3, 1, %v2858_v34  ;;  %vm2470_vm14 = vmand %vm2462_vm4, %vm2466_vm8  ;;  %v2477_v53 = vsel %vm2457_vm5, 1, %v2858_v34 }
 0x69f   : > { %v2450_v35 = vadd.s32 %v2446_v5, %v2418_v14  ;;  %v2479_v59 = vadd.s32 %v2475_v13, %v2447_v21  ;;  %v2480_v2 = vadd.s32 %v2476_v32, %v2448_v15  ;;  %vm2474_vm15 = vmor %vm2458_vm12, %vm2470_vm14  ;;  %v2481_v16 = vadd.s32 %v2477_v53, %v2449_v29 }
 0x6a0   : > { %vm2487_vm13 = vcmp.gt.f32.partialorder %v2486_v4, %v3928_v33  ;;  %vm2488_vm6 = vcmp.gt.f32.partialorder %v2486_v4, %v3991_v25  ;;  %vm2489_vm2 = vcmp.gt.f32.partialorder %v2486_v4, %v4105_v54  ;;  %v2478_v22 = vsel %vm2474_vm15, 1, %v2858_v34 }
 0x6a1   : > { %vm2490_vm1 = vcmp.gt.f32.partialorder %v2486_v4, %v4221_v41  ;;  %vm2494_vm9 = vcmp.eq.f32.partialorder %v2486_v4, %v4221_v41  ;;  %v2507_v12 = vsel %vm2487_vm13, 1, %v2858_v34  ;;  %v2482_v8 = vadd.s32 %v2478_v22, %v2450_v35 }
 0x6a2   : > { %vm2502_vm8 = vmand %vm2494_vm9, %vm2498_vm0  ;;  %v2508_v27 = vsel %vm2488_vm6, 1, %v2858_v34  ;;  %v2509_v30 = vsel %vm2489_vm2, 1, %v2858_v34  ;;  %v2511_v31 = vadd.s32 %v2507_v12, %v2479_v59  ;;  %vm2519_vm7 = vcmp.gt.f32.partialorder %v2518_v62, %v3928_v33 }
 0x6a3   : > { %vm2506_vm11 = vmor %vm2490_vm1, %vm2502_vm8  ;;  %v2512_v6 = vadd.s32 %v2508_v27, %v2480_v2  ;;  %v2513_v7 = vadd.s32 %v2509_v30, %v2481_v16  ;;  %vm2520_vm10 = vcmp.gt.f32.partialorder %v2518_v62, %v3991_v25  ;;  %vm2521_vm3 = vcmp.gt.f32.partialorder %v2518_v62, %v4105_v54 }
 0x6a4   : > { %v2510_v9 = vsel %vm2506_vm11, 1, %v2858_v34  ;;  %vm2522_vm5 = vcmp.gt.f32.partialorder %v2518_v62, %v4221_v41  ;;  %v2539_v10 = vsel %vm2519_vm7, 1, %v2858_v34  ;;  %v2540_v36 = vsel %vm2520_vm10, 1, %v2858_v34 }
 0x6a5   : > { %v2514_v43 = vadd.s32 %v2510_v9, %v2482_v8  ;;  %v2541_v38 = vsel %vm2521_vm3, 1, %v2858_v34  ;;  %v2542_v57 = vsel %vm2522_vm5, 1, %v2858_v34  ;;  %v2543_v44 = vadd.s32 %v2539_v10, %v2511_v31 }
 0x6a6   : > { %v2544_v37 = vadd.s32 %v2540_v36, %v2512_v6  ;;  %v2545_v55 = vadd.s32 %v2541_v38, %v2513_v7  ;;  %vm5146_vm15 = vcmask 261120   ;;  %vm2572_vm1 = vcmask 253952  }
 0x6a7   : > { %v2546_v39 = vadd.s32 %v2542_v57, %v2514_v43  ;;  %vm2547_vm0 = vcmp.lt.s32.totalorder %v2543_v44, 16  ;;  %vm5147_vm13 = vmmov %vm5146_vm15  ;;  %v2576_v63 = vstv %s2693_s25  ;;  %v2599_v13 = vstv %s2694_s26 }
 0x6a8   : > { %vm2548_vm12 = vcmp.lt.s32.totalorder %v2544_v37, 16  ;;  %vm2549_vm4 = vcmp.lt.s32.totalorder %v2545_v55, 16  ;;  %v2551_v28 = vsel %vm2547_vm0, %v3928_v33, 0.0  ;;  %vm5148_vm6 = vmmov %vm5147_vm13  ;;  %v2580_v32 = vstv %s2578_s29 }
 0x6a9   : > { %vm2550_vm14 = vcmp.lt.s32.totalorder %v2546_v39, 16  ;;  %v2552_v42 = vsel %vm2548_vm12, %v3991_v25, 0.0  ;;  %v2553_v46 = vsel %vm2549_vm4, %v4105_v54, 0.0  ;;  %v2555_v26 = vsel %vm5146_vm15, %v2551_v28, 0.0  ;;  %vm5149_vm2 = vmmov %vm5148_vm6  ;;  %v2569_v54 = vld [vmem:[%s4945_s7] sm:$0x1] }
 0x6aa   : > { %v2554_v58 = vsel %vm2550_vm14, %v4221_v41, 0.0  ;;  %v2556_v34 = vsel %vm5147_vm13, %v2552_v42, 0.0  ;;  %v2558_v48 = vsel %vm5148_vm6, %v2553_v46, 0.0 }
 0x6ab   : > { %v2557_v49 = vadd.f32 %v2556_v34, %v2555_v26  ;;  %v2560_v1 = vsel %vm5149_vm2, %v2554_v58, 0.0 }
 0x6ad   : > { %v2559_v3 = vadd.f32 %v2558_v48, %v2557_v49 }
 0x6af   : > { %v2561_v47 = vadd.f32 %v2560_v1, %v2559_v3 }
 0x6b1   : > { %v2562_v11 = vrot.slane %v2561_v47, 4 }
 0x6b3   : > { %v2563_v52 = vadd.f32 %v2562_v11, %v2561_v47 }
 0x6b5   : > { %v2564_v33 = vrot.slane %v2563_v52, 2 }
 0x6b7   : > { %v2565_v0 = vadd.f32 %v2564_v33, %v2563_v52 }
 0x6b9   : > { %v2566_v25 = vrot.slane %v2565_v0, 1 }
 0x6bb   : > { %v2567_v40 = vadd.f32 %v2566_v25, %v2565_v0 }
 0x6bd   : > { %v2568_v41 = vmul.f32 0.0625, %v2567_v40 }
 0x6bf   : > { %v2570_v51 = vmul.f32 %v2569_v54, %v2568_v41 }
 0x6c1   : > { %v2592_v56 = vmul.f32 %v2570_v51, %v3860_v17  ;;  %v2571_v20 = vmul.f32 %v2570_v51, %v3854_v45 }
 0x6c3   : > { %v2593_v50 = vsel %vm2572_vm1, %v2592_v56, 0.0  ;;  %v2573_v60 = vsel %vm2572_vm1, %v2571_v20, 0.0 }
 0x6c4   : > { %2594 = vadd.xlane.f32.xlu0 %v2593_v50  ;;  %2574 = vadd.xlane.f32.xlu1 %v2573_v60 }
 0x751   : > { %v2595_v23 = vpop.xlane.xlu0 %2594  ;;  %v2575_v24 = vpop.xlane.xlu1 %2574 }
 0x752   : > { %v2596_v4 = vadd.f32 %v2595_v23, %v2576_v63  ;;  %v2577_v62 = vadd.f32 %v2576_v63, %v2575_v24 }
 0x754   : > { %v2602_v14 = vand.u32 2147483647, %v2596_v4  ;;  %v2583_v61 = vand.u32 2147483647, %v2577_v62  ;;  %v2598_v35 = vmax.f32 %v2596_v4, 0.0  ;;  %v2600_v53 = vmul.f32 %v2599_v13, %v2596_v4 }
 0x755   : > { %v2579_v59 = vmax.f32 %v2577_v62, 0.0  ;;  %v2581_v2 = vmul.f32 %v2580_v32, %v2577_v62 }
 0x756   : > { %v2603_v18 = vsub.f32 0.0, %v2602_v14  ;;  %v2584_v19 = vsub.f32 0.0, %v2583_v61  ;;  %v2601_v12 = vsub.f32 %v2598_v35, %v2600_v53 }
 0x757   : > { %v2582_v27 = vsub.f32 %v2579_v59, %v2581_v2 }
 0x758   : > { %v2604_v21 = vmul.f32 1.442695, %v2603_v18  ;;  %v2585_v15 = vmul.f32 1.442695, %v2584_v19 }
 0x75a   : > { %2795 = vpow2.f32 %v2604_v21 }
 0x75b   : > { %2797 = vpow2.f32 %v2585_v15 }
 0x764   : > { %v2796_v45 = vpop.eup %2795 }
 0x765   : > { %v2798_v17 = vpop.eup %2797  ;;  %v2606_v29 = vadd.f32 1.0, %v2796_v45 }
 0x766   : > { %v2587_v5 = vadd.f32 1.0, %v2798_v17 }
 0x767   : > { %2799 = vlog2.f32 %v2606_v29 }
 0x768   : > { %2801 = vlog2.f32 %v2587_v5 }
 0x771   : > { %v2800_v16 = vpop.eup %2799 }
 0x772   : > { %v2802_v22 = vpop.eup %2801  ;;  %v2608_v8 = vmul.f32 0.6931472, %v2800_v16 }
 0x773   : > { %v2589_v30 = vmul.f32 0.6931472, %v2802_v22 }
 0x774   : > { %v2609_v31 = vadd.f32 %v2608_v8, %v2601_v12 }
 0x775   : > { %v2590_v6 = vadd.f32 %v2589_v30, %v2582_v27 }
 0x777   : > { %v2610_v7 = vadd.f32 %v2609_v31, %v2590_v6 }
 0x779   : > { %v2611_v9 = vmul.f32 0.5, %v2610_v7 }
 0x77b   : > { %2612 = vst [vmem:[%s2955_s22] sm:$0x1] %v2611_v9 }
 0x77c PF: > { %s20_s27 = sadd.s32 1, %s2847_s27  }
 0x77d   : > { %p17_p0 = scmp.ge.s32.totalorder %s20_s27, 5  }
 0x77f   :  { %19 = sbr.rel (!%p17_p0) target bundleno = 2 (0x2), region = 100 }
 0x786   :  { %2630 = vsyncpa [#allocation3], 1 }
 0x787   :  { %2632 = vsyncpa [#allocation3 + $0x1], 1 }
 0x788   :  { %2633 = vsyncpa [#allocation5], 1 }

</bundles_post_ra>
